<compile_context>
chip_gen: v6e
topology: v6e:2x2x1
jax: 0.10.0
libtpu: 0.0.40
codegen_flags: <defaults>
</compile_context>

<pallas_src>
import math

import jax
import jax.numpy as jnp
from jax.experimental import pallas as pl
from jax.experimental.pallas import tpu as pltpu

BN_EPS = 1e-5
AVAILABLE_OPERATIONS = (
    "max_pool_3x3", "avg_pool_3x3", "conv_3x3", "sep_conv_3x3", "identity", "none",
)

NUM_INPUT_NODES = 2
NUM_INTERMEDIATE_NODES = 4
NUM_OUTPUT_NODES = 1

# Destination (intermediate) nodes and edge bookkeeping -----------------------
_DEST_NODES = tuple(range(NUM_INPUT_NODES, NUM_INPUT_NODES + NUM_INTERMEDIATE_NODES))
# PyTorch parameter order: for dest node 2..5, for src 0..dest-1
_EDGE_ORDER = tuple((src, dest) for dest in _DEST_NODES for src in range(dest))
_EDGE_INDEX = {pair: i for i, pair in enumerate(_EDGE_ORDER)}
# Kernel processing order: source-major, so each source's tap stack is built once
_SRC_ORDER = tuple((src, tuple(d for d in _DEST_NODES if d > src))
                   for src in range(NUM_INPUT_NODES + NUM_INTERMEDIATE_NODES - 1))
NUM_EDGES = len(_EDGE_ORDER)  # 14

_VMEM = pl.BlockSpec(memory_space=pltpu.MemorySpace.VMEM)
_SMEM = pl.BlockSpec(memory_space=pltpu.MemorySpace.SMEM)

_CENTER_TAP = 4  # tap (kh=1, kw=1) is always in-bounds for 3x3 / padding=1


# ----------------------------------------------------------------------------
# Kernel
# ----------------------------------------------------------------------------
def _bn_rows(y, gamma, beta):
    """nn.BatchNorm2d (training mode) on (channels, R): per-row batch mean /
    biased variance over all N*H*W positions."""
    mean = jnp.mean(y, axis=1, keepdims=True)
    var = jnp.mean(jnp.square(y - mean), axis=1, keepdims=True)
    return (y - mean) * jax.lax.rsqrt(var + BN_EPS) * gamma + beta


def _build_cell_kernel(c, n, h, w):
    """Returns the fused whole-cell kernel for static geometry (c, n, h, w)."""
    r = n * h * w
    # Lane shifts for the 9 taps: tap k=(kh*3+kw) at flat position i reads
    # src[i + (kh-1)*w + (kw-1)]  (circular; out-of-image reads are masked).
    shifts = []
    for kh in range(3):
        for kw in range(3):
            off = (kh - 1) * w + (kw - 1)
            shifts.append((-off) % r)

    def kernel(wmix_ref,                     # SMEM (14*6,) softmax(alphas), flat
               x_ref,                        # VMEM (C_in, R) input, NCHW->(C,R)
               mask_ref,                     # VMEM (9, 1, R) tap validity {0,1}
               wpre_ref, bpre_ref,           # VMEM (2C, C_in), (2C, 1)
               gpre_ref, betapre_ref,        # VMEM (2C, 1) BN affine (s0|s1)
               wcs_ref,                      # VMEM (28C, 9C) packed conv|sep wts
               gcs_ref, bcs_ref,             # VMEM (28C, 1) alpha-folded BN affine
               o_ref):                       # VMEM (C, R) node-5 output
        # ---- fused preprocess: s0/s1 = BN(Conv1x1(ReLU(x))) ------------------
        xr = jnp.maximum(x_ref[...], 0.0)
        pre = jnp.dot(wpre_ref[...], xr, preferred_element_type=jnp.float32)
        pre = _bn_rows(pre + bpre_ref[...], gpre_ref[...], betapre_ref[...])
        node = [pre[:c], pre[c:2 * c], None, None, None, None]

        # Tap validity masks and additive "-inf" biases for max-pool padding.
        # Geometry-only -> loaded/built once and shared by all 14 edges.
        big = jnp.float32(1e30)
        m = [mask_ref[k] for k in range(9)]
        neg = [(m[k] - 1.0) * big for k in range(9)]

        acc = [None] * (NUM_INPUT_NODES + NUM_INTERMEDIATE_NODES)
        row = 0
        for src_idx, dests in _SRC_ORDER:
            if src_idx >= NUM_INPUT_NODES:
                node[src_idx] = acc[src_idx]      # this intermediate node is complete
            src = node[src_idx]                   # (C, R)

            # 9 shifted + zero-masked taps (zero-padded 3x3 windows), built once
            # per source and reused by every edge leaving it.  Centre tap is the
            # unmodified source (always valid -> no roll, no mask multiply).
            taps = []
            for k in range(9):
                t = src if shifts[k] == 0 else pltpu.roll(src, shifts[k], axis=1)
                taps.append(t if k == _CENTER_TAP else t * m[k])
            x_cat = jnp.concatenate(taps, axis=0)          # (9C, R)

            # Pooling branches (shared across this source's edges).
            ap = taps[0]
            for k in range(1, 9):
                ap = ap + taps[k]
            ap = ap * jnp.float32(1.0 / 9.0)               # AvgPool count_include_pad=True
            mp = taps[_CENTER_TAP]                         # MaxPool pads with -inf
            for k in range(9):
                if k != _CENTER_TAP:
                    mp = jnp.maximum(mp, taps[k] + neg[k])

            # conv_3x3 and (folded) sep_conv_3x3 of ALL edges leaving this
            # source: one (2C*n_dest, 9C) x (9C, R) matmul, then row-wise
            # BN + ReLU (each row = one channel of one BatchNorm2d, with the
            # edge's softmax(alpha) already folded into gamma/beta).
            rows = 2 * c * len(dests)
            y = jnp.dot(wcs_ref[row:row + rows, :], x_cat,
                        preferred_element_type=jnp.float32)
            y = jnp.maximum(_bn_rows(y, gcs_ref[row:row + rows, :],
                                     bcs_ref[row:row + rows, :]), 0.0)

            # Distribute the softmax(alpha)-weighted mix to destination nodes.
            for t_i, dest in enumerate(dests):
                e = _EDGE_INDEX[(src_idx, dest)]
                w_max = wmix_ref[6 * e + 0]
                w_avg = wmix_ref[6 * e + 1]
                w_idn = wmix_ref[6 * e + 4]     # index 5 == 'none' -> contributes 0
                conv_o = y[2 * c * t_i: 2 * c * t_i + c]
                sep_o = y[2 * c * t_i + c: 2 * c * (t_i + 1)]
                contrib = (w_max * mp + w_avg * ap + conv_o + sep_o + w_idn * src)
                acc[dest] = contrib if acc[dest] is None else acc[dest] + contrib
            row += rows

        o_ref[...] = acc[NUM_INPUT_NODES + NUM_INTERMEDIATE_NODES - 1]

    return kernel


# ----------------------------------------------------------------------------
# Host-side packing (layout plumbing, traced under jit once)
# ----------------------------------------------------------------------------
def _tap_masks(n, h, w):
    """(9, 1, N*H*W) validity of x[h+kh-1, w+kw-1]; geometry-only, shared by all edges."""
    hh = jnp.arange(h)
    ww = jnp.arange(w)
    masks = []
    for kh in range(3):
        for kw in range(3):
            mh = ((hh + (kh - 1)) >= 0) & ((hh + (kh - 1)) < h)
            mw = ((ww + (kw - 1)) >= 0) & ((ww + (kw - 1)) < w)
            m2d = (mh[:, None] & mw[None, :]).astype(jnp.float32)   # (h, w)
            masks.append(jnp.tile(m2d.reshape(1, h * w), (1, n)))   # (1, n*h*w)
    return jnp.stack(masks, axis=0)                                 # (9, 1, R)


def _pack_operands(params, n, h, w):
    c = params["pre_prev"]["w"].shape[0]

    # --- preprocess: rows [0:C) = prev_prev (s0), rows [C:2C) = prev (s1) ----
    pp, pv = params["pre_prev_prev"], params["pre_prev"]
    wpre = jnp.concatenate([pp["w"], pv["w"]], axis=0)               # (2C, C_in)
    bpre = jnp.concatenate([pp["b"], pv["b"]])[:, None]              # (2C, 1)
    gpre = jnp.concatenate([pp["gamma"], pv["gamma"]])[:, None]
    bepre = jnp.concatenate([pp["beta"], pv["beta"]])[:, None]

    # --- softmax mixing weights, flat, PyTorch edge order --------------------
    smax = [jax.nn.softmax(e["alphas"]) for e in params["edges"]]
    wmix = jnp.concatenate(smax)

    # --- conv_3x3 + folded sep_conv weights, packed source-major -------------
    # Row layout per edge: [dense-3x3 conv (C rows) ; depthwise*pointwise (C rows)]
    # Column layout: tap k = kh*3+kw, then input channel (matches x_cat).
    # The edge's softmax(alpha) for conv/sep is folded into BN gamma/beta
    # (softmax > 0, so alpha*ReLU(BN(y)) == ReLU(alpha*BN(y))).
    wcs_rows, g_rows, b_rows = [], [], []
    for src, dests in _SRC_ORDER:
        for dest in dests:
            ei = _EDGE_INDEX[(src, dest)]
            e = params["edges"][ei]
            a_conv, a_sep = smax[ei][2], smax[ei][3]
            wc = jnp.transpose(e["w_conv"], (0, 2, 3, 1)).reshape(c, 9 * c)
            wd = jnp.transpose(e["w_dw"][:, 0], (1, 2, 0)).reshape(9, c)   # [k, cin]
            wsep = (e["w_pw"][:, None, :] * wd[None, :, :]).reshape(c, 9 * c)
            wcs_rows += [wc, wsep]
            g_rows += [e["g_conv"] * a_conv, e["g_sep"] * a_sep]
            b_rows += [e["b_conv"] * a_conv, e["b_sep"] * a_sep]
    wcs = jnp.concatenate(wcs_rows, axis=0)                          # (28C, 9C)
    gcs = jnp.concatenate(g_rows)[:, None]                           # (28C, 1)
    bcs = jnp.concatenate(b_rows)[:, None]

    mask = _tap_masks(n, h, w)                                       # (9, 1, R)
    return wmix, mask, wpre, bpre, gpre, bepre, wcs, gcs, bcs


def cell_forward(x_nchw, params):
    n, c_in, h, w = x_nchw.shape
    c = params["pre_prev"]["w"].shape[0]
    r = n * h * w

    # Lane-dense layout: channels on sublanes, flattened (n, h, w) on lanes.
    x_cr = jnp.transpose(x_nchw.astype(jnp.float32), (1, 0, 2, 3)).reshape(c_in, r)
    (wmix, mask, wpre, bpre, gpre, bepre, wcs, gcs, bcs) = _pack_operands(params, n, h, w)

    out = pl.pallas_call(
        _build_cell_kernel(c, n, h, w),
        out_shape=jax.ShapeDtypeStruct((c, r), jnp.float32),
        in_specs=[_SMEM] + [_VMEM] * 9,
        out_specs=_VMEM,
    )(wmix, x_cr, mask, wpre, bpre, gpre, bepre, wcs, gcs, bcs)

    return [jnp.transpose(out.reshape(c, n, h, w), (1, 0, 2, 3))]


# ----------------------------------------------------------------------------
# Deterministic, module-shaped synthetic parameters
# ----------------------------------------------------------------------------
def _make_preprocess_params(key, c_in, c_out):
    kw_, kb = jax.random.split(key)
    return dict(
        w=jax.random.normal(kw_, (c_out, c_in), jnp.float32) / math.sqrt(c_in),
        b=jax.random.normal(kb, (c_out,), jnp.float32) * 0.01,
        gamma=jnp.ones((c_out,), jnp.float32),
        beta=jnp.zeros((c_out,), jnp.float32),
    )


def _make_edge_params(key, c):
    k0, k1, k2, k3 = jax.random.split(key, 4)
    return dict(
        alphas=jax.random.normal(k3, (len(AVAILABLE_OPERATIONS),), jnp.float32) * 0.001,
        # dense 3x3 conv (Conv2d(c, c, 3, padding=1, bias=False))
        w_conv=jax.random.normal(k0, (c, c, 3, 3), jnp.float32) / (3.0 * math.sqrt(c)),
        g_conv=jnp.ones((c,), jnp.float32),
        b_conv=jnp.zeros((c,), jnp.float32),
        # sep conv: depthwise (c,1,3,3) then pointwise (c,c)
        w_dw=jax.random.normal(k1, (c, 1, 3, 3), jnp.float32) / 3.0,
        w_pw=jax.random.normal(k2, (c, c), jnp.float32) / math.sqrt(c),
        g_sep=jnp.ones((c,), jnp.float32),
        b_sep=jnp.zeros((c,), jnp.float32),
    )


def make_cell_params(key, c_prev, c_prev_prev, c_out):
    k_pp, k_p, k_e = jax.random.split(key, 3)
    edge_keys = jax.random.split(k_e, NUM_EDGES)
    return dict(
        pre_prev_prev=_make_preprocess_params(k_pp, c_prev_prev, c_out),
        pre_prev=_make_preprocess_params(k_p, c_prev, c_out),
        edges=[_make_edge_params(edge_keys[i], c_out) for i in range(NUM_EDGES)],
    )


# ----------------------------------------------------------------------------
if __name__ == "__main__":
    key = jax.random.PRNGKey(0)
    k_x, k_params = jax.random.split(key)

    N, C_IN, H, W = 2, 8, 8, 8      # in_channels_prev == in_channels_prev_prev == 8
    C_OUT = 8                        # cell / edge channels  -> R = N*H*W = 128 lanes

    x = jax.random.normal(k_x, (N, C_IN, H, W), jnp.float32)
    params = make_cell_params(k_params, C_IN, C_IN, C_OUT)

    fwd = jax.jit(cell_forward)
    outputs = fwd(x, params)                    # list of length num_output_nodes (=1)
    out = jax.block_until_ready(outputs[0])
    assert out.shape == (N, C_OUT, H, W), out.shape
    assert bool(jnp.all(jnp.isfinite(out)))
    print("KERNEL_OK")
</pallas_src>

<mosaic_0001>
module attributes {stable_mosaic.version = 11 : i64} {
  func.func @kernel(%arg0: memref<84xf32, #tpu.memory_space<smem>>, %arg1: memref<8x128xf32, #tpu.memory_space<vmem>>, %arg2: memref<9x1x128xf32, #tpu.memory_space<vmem>>, %arg3: memref<16x8xf32, #tpu.memory_space<vmem>>, %arg4: memref<16x1xf32, #tpu.memory_space<vmem>>, %arg5: memref<16x1xf32, #tpu.memory_space<vmem>>, %arg6: memref<16x1xf32, #tpu.memory_space<vmem>>, %arg7: memref<224x72xf32, #tpu.memory_space<vmem>>, %arg8: memref<224x1xf32, #tpu.memory_space<vmem>>, %arg9: memref<224x1xf32, #tpu.memory_space<vmem>>, %arg10: memref<8x128xf32, #tpu.memory_space<vmem>>) attributes {dimension_semantics = [], scalar_prefetch = 0 : i64, scratch_operands = 0 : i64, tpu.core_type = #tpu.core_type<tc>} {
    %c0 = arith.constant 0 : index
    %c0_0 = arith.constant 0 : index
    %0 = vector.load %arg1[%c0, %c0_0] : memref<8x128xf32, #tpu.memory_space<vmem>>, vector<8x128xf32>
    %cst = arith.constant 0.000000e+00 : f32
    %1 = vector.broadcast %cst : f32 to vector<8x128xf32>
    %2 = arith.maximumf %0, %1 : vector<8x128xf32>
    %c0_1 = arith.constant 0 : index
    %c0_2 = arith.constant 0 : index
    %3 = vector.load %arg3[%c0_1, %c0_2] : memref<16x8xf32, #tpu.memory_space<vmem>>, vector<16x8xf32>
    %cst_3 = arith.constant dense<0.000000e+00> : vector<16x128xf32>
    %4 = tpu.matmul %3, %2, %cst_3 {dimension_numbers = #tpu.dot_dimension_numbers<[1], [0], [0], [1], [0, 0, 1, 1], [], []>} : vector<16x8xf32>, vector<8x128xf32>, vector<16x128xf32> -> vector<16x128xf32>
    %c0_4 = arith.constant 0 : index
    %c0_5 = arith.constant 0 : index
    %5 = vector.load %arg4[%c0_4, %c0_5] : memref<16x1xf32, #tpu.memory_space<vmem>>, vector<16x1xf32>
    %6 = vector.broadcast %5 : vector<16x1xf32> to vector<16x128xf32>
    %7 = arith.addf %4, %6 : vector<16x128xf32>
    %c0_6 = arith.constant 0 : index
    %c0_7 = arith.constant 0 : index
    %8 = vector.load %arg5[%c0_6, %c0_7] : memref<16x1xf32, #tpu.memory_space<vmem>>, vector<16x1xf32>
    %c0_8 = arith.constant 0 : index
    %c0_9 = arith.constant 0 : index
    %9 = vector.load %arg6[%c0_8, %c0_9] : memref<16x1xf32, #tpu.memory_space<vmem>>, vector<16x1xf32>
    %cst_10 = arith.constant dense<0.000000e+00> : vector<16xf32>
    %10 = vector.multi_reduction <add>, %7, %cst_10 [1] : vector<16x128xf32> to vector<16xf32>
    %11 = vector.shape_cast %10 : vector<16xf32> to vector<16x1xf32>
    %cst_11 = arith.constant 1.280000e+02 : f32
    %12 = vector.broadcast %cst_11 : f32 to vector<16x1xf32>
    %13 = arith.divf %11, %12 : vector<16x1xf32>
    %14 = vector.broadcast %13 : vector<16x1xf32> to vector<16x128xf32>
    %15 = arith.subf %7, %14 : vector<16x128xf32>
    %16 = arith.mulf %15, %15 : vector<16x128xf32>
    %cst_12 = arith.constant dense<0.000000e+00> : vector<16xf32>
    %17 = vector.multi_reduction <add>, %16, %cst_12 [1] : vector<16x128xf32> to vector<16xf32>
    %18 = vector.shape_cast %17 : vector<16xf32> to vector<16x1xf32>
    %cst_13 = arith.constant 1.280000e+02 : f32
    %19 = vector.broadcast %cst_13 : f32 to vector<16x1xf32>
    %20 = arith.divf %18, %19 : vector<16x1xf32>
    %21 = vector.broadcast %13 : vector<16x1xf32> to vector<16x128xf32>
    %22 = arith.subf %7, %21 : vector<16x128xf32>
    %cst_14 = arith.constant 9.99999974E-6 : f32
    %23 = vector.broadcast %cst_14 : f32 to vector<16x1xf32>
    %24 = arith.addf %20, %23 : vector<16x1xf32>
    %25 = math.rsqrt %24 : vector<16x1xf32>
    %26 = vector.broadcast %25 : vector<16x1xf32> to vector<16x128xf32>
    %27 = arith.mulf %22, %26 : vector<16x128xf32>
    %28 = vector.broadcast %8 : vector<16x1xf32> to vector<16x128xf32>
    %29 = arith.mulf %27, %28 : vector<16x128xf32>
    %30 = vector.broadcast %9 : vector<16x1xf32> to vector<16x128xf32>
    %31 = arith.addf %29, %30 : vector<16x128xf32>
    %32 = vector.extract_strided_slice %31 {offsets = [0, 0], sizes = [8, 128], strides = [1, 1]} : vector<16x128xf32> to vector<8x128xf32>
    %33 = vector.extract_strided_slice %31 {offsets = [8, 0], sizes = [8, 128], strides = [1, 1]} : vector<16x128xf32> to vector<8x128xf32>
    %c0_15 = arith.constant 0 : index
    %c0_16 = arith.constant 0 : index
    %c0_17 = arith.constant 0 : index
    %34 = vector.load %arg2[%c0_15, %c0_16, %c0_17] : memref<9x1x128xf32, #tpu.memory_space<vmem>>, vector<1x1x128xf32>
    %35 = vector.shape_cast %34 : vector<1x1x128xf32> to vector<1x128xf32>
    %c1 = arith.constant 1 : index
    %c0_18 = arith.constant 0 : index
    %c0_19 = arith.constant 0 : index
    %36 = vector.load %arg2[%c1, %c0_18, %c0_19] : memref<9x1x128xf32, #tpu.memory_space<vmem>>, vector<1x1x128xf32>
    %37 = vector.shape_cast %36 : vector<1x1x128xf32> to vector<1x128xf32>
    %c2 = arith.constant 2 : index
    %c0_20 = arith.constant 0 : index
    %c0_21 = arith.constant 0 : index
    %38 = vector.load %arg2[%c2, %c0_20, %c0_21] : memref<9x1x128xf32, #tpu.memory_space<vmem>>, vector<1x1x128xf32>
    %39 = vector.shape_cast %38 : vector<1x1x128xf32> to vector<1x128xf32>
    %c3 = arith.constant 3 : index
    %c0_22 = arith.constant 0 : index
    %c0_23 = arith.constant 0 : index
    %40 = vector.load %arg2[%c3, %c0_22, %c0_23] : memref<9x1x128xf32, #tpu.memory_space<vmem>>, vector<1x1x128xf32>
    %41 = vector.shape_cast %40 : vector<1x1x128xf32> to vector<1x128xf32>
    %c5 = arith.constant 5 : index
    %c0_24 = arith.constant 0 : index
    %c0_25 = arith.constant 0 : index
    %42 = vector.load %arg2[%c5, %c0_24, %c0_25] : memref<9x1x128xf32, #tpu.memory_space<vmem>>, vector<1x1x128xf32>
    %43 = vector.shape_cast %42 : vector<1x1x128xf32> to vector<1x128xf32>
    %c6 = arith.constant 6 : index
    %c0_26 = arith.constant 0 : index
    %c0_27 = arith.constant 0 : index
    %44 = vector.load %arg2[%c6, %c0_26, %c0_27] : memref<9x1x128xf32, #tpu.memory_space<vmem>>, vector<1x1x128xf32>
    %45 = vector.shape_cast %44 : vector<1x1x128xf32> to vector<1x128xf32>
    %c7 = arith.constant 7 : index
    %c0_28 = arith.constant 0 : index
    %c0_29 = arith.constant 0 : index
    %46 = vector.load %arg2[%c7, %c0_28, %c0_29] : memref<9x1x128xf32, #tpu.memory_space<vmem>>, vector<1x1x128xf32>
    %47 = vector.shape_cast %46 : vector<1x1x128xf32> to vector<1x128xf32>
    %c8 = arith.constant 8 : index
    %c0_30 = arith.constant 0 : index
    %c0_31 = arith.constant 0 : index
    %48 = vector.load %arg2[%c8, %c0_30, %c0_31] : memref<9x1x128xf32, #tpu.memory_space<vmem>>, vector<1x1x128xf32>
    %49 = vector.shape_cast %48 : vector<1x1x128xf32> to vector<1x128xf32>
    %cst_32 = arith.constant 1.000000e+00 : f32
    %50 = vector.broadcast %cst_32 : f32 to vector<1x128xf32>
    %51 = arith.subf %35, %50 : vector<1x128xf32>
    %cst_33 = arith.constant 1.000000e+30 : f32
    %52 = vector.broadcast %cst_33 : f32 to vector<1x128xf32>
    %53 = arith.mulf %51, %52 : vector<1x128xf32>
    %cst_34 = arith.constant 1.000000e+00 : f32
    %54 = vector.broadcast %cst_34 : f32 to vector<1x128xf32>
    %55 = arith.subf %37, %54 : vector<1x128xf32>
    %cst_35 = arith.constant 1.000000e+30 : f32
    %56 = vector.broadcast %cst_35 : f32 to vector<1x128xf32>
    %57 = arith.mulf %55, %56 : vector<1x128xf32>
    %cst_36 = arith.constant 1.000000e+00 : f32
    %58 = vector.broadcast %cst_36 : f32 to vector<1x128xf32>
    %59 = arith.subf %39, %58 : vector<1x128xf32>
    %cst_37 = arith.constant 1.000000e+30 : f32
    %60 = vector.broadcast %cst_37 : f32 to vector<1x128xf32>
    %61 = arith.mulf %59, %60 : vector<1x128xf32>
    %cst_38 = arith.constant 1.000000e+00 : f32
    %62 = vector.broadcast %cst_38 : f32 to vector<1x128xf32>
    %63 = arith.subf %41, %62 : vector<1x128xf32>
    %cst_39 = arith.constant 1.000000e+30 : f32
    %64 = vector.broadcast %cst_39 : f32 to vector<1x128xf32>
    %65 = arith.mulf %63, %64 : vector<1x128xf32>
    %cst_40 = arith.constant 1.000000e+00 : f32
    %66 = vector.broadcast %cst_40 : f32 to vector<1x128xf32>
    %67 = arith.subf %43, %66 : vector<1x128xf32>
    %cst_41 = arith.constant 1.000000e+30 : f32
    %68 = vector.broadcast %cst_41 : f32 to vector<1x128xf32>
    %69 = arith.mulf %67, %68 : vector<1x128xf32>
    %cst_42 = arith.constant 1.000000e+00 : f32
    %70 = vector.broadcast %cst_42 : f32 to vector<1x128xf32>
    %71 = arith.subf %45, %70 : vector<1x128xf32>
    %cst_43 = arith.constant 1.000000e+30 : f32
    %72 = vector.broadcast %cst_43 : f32 to vector<1x128xf32>
    %73 = arith.mulf %71, %72 : vector<1x128xf32>
    %cst_44 = arith.constant 1.000000e+00 : f32
    %74 = vector.broadcast %cst_44 : f32 to vector<1x128xf32>
    %75 = arith.subf %47, %74 : vector<1x128xf32>
    %cst_45 = arith.constant 1.000000e+30 : f32
    %76 = vector.broadcast %cst_45 : f32 to vector<1x128xf32>
    %77 = arith.mulf %75, %76 : vector<1x128xf32>
    %cst_46 = arith.constant 1.000000e+00 : f32
    %78 = vector.broadcast %cst_46 : f32 to vector<1x128xf32>
    %79 = arith.subf %49, %78 : vector<1x128xf32>
    %cst_47 = arith.constant 1.000000e+30 : f32
    %80 = vector.broadcast %cst_47 : f32 to vector<1x128xf32>
    %81 = arith.mulf %79, %80 : vector<1x128xf32>
    %c9_i32 = arith.constant 9 : i32
    %82 = tpu.dynamic_rotate %32 by %c9_i32 dim 1 : vector<8x128xf32>, i32 -> vector<8x128xf32>
    %83 = vector.broadcast %35 : vector<1x128xf32> to vector<8x128xf32>
    %84 = arith.mulf %82, %83 : vector<8x128xf32>
    %c8_i32 = arith.constant 8 : i32
    %85 = tpu.dynamic_rotate %32 by %c8_i32 dim 1 : vector<8x128xf32>, i32 -> vector<8x128xf32>
    %86 = vector.broadcast %37 : vector<1x128xf32> to vector<8x128xf32>
    %87 = arith.mulf %85, %86 : vector<8x128xf32>
    %c7_i32 = arith.constant 7 : i32
    %88 = tpu.dynamic_rotate %32 by %c7_i32 dim 1 : vector<8x128xf32>, i32 -> vector<8x128xf32>
    %89 = vector.broadcast %39 : vector<1x128xf32> to vector<8x128xf32>
    %90 = arith.mulf %88, %89 : vector<8x128xf32>
    %c1_i32 = arith.constant 1 : i32
    %91 = tpu.dynamic_rotate %32 by %c1_i32 dim 1 : vector<8x128xf32>, i32 -> vector<8x128xf32>
    %92 = vector.broadcast %41 : vector<1x128xf32> to vector<8x128xf32>
    %93 = arith.mulf %91, %92 : vector<8x128xf32>
    %c127_i32 = arith.constant 127 : i32
    %94 = tpu.dynamic_rotate %32 by %c127_i32 dim 1 : vector<8x128xf32>, i32 -> vector<8x128xf32>
    %95 = vector.broadcast %43 : vector<1x128xf32> to vector<8x128xf32>
    %96 = arith.mulf %94, %95 : vector<8x128xf32>
    %c121_i32 = arith.constant 121 : i32
    %97 = tpu.dynamic_rotate %32 by %c121_i32 dim 1 : vector<8x128xf32>, i32 -> vector<8x128xf32>
    %98 = vector.broadcast %45 : vector<1x128xf32> to vector<8x128xf32>
    %99 = arith.mulf %97, %98 : vector<8x128xf32>
    %c120_i32 = arith.constant 120 : i32
    %100 = tpu.dynamic_rotate %32 by %c120_i32 dim 1 : vector<8x128xf32>, i32 -> vector<8x128xf32>
    %101 = vector.broadcast %47 : vector<1x128xf32> to vector<8x128xf32>
    %102 = arith.mulf %100, %101 : vector<8x128xf32>
    %c119_i32 = arith.constant 119 : i32
    %103 = tpu.dynamic_rotate %32 by %c119_i32 dim 1 : vector<8x128xf32>, i32 -> vector<8x128xf32>
    %104 = vector.broadcast %49 : vector<1x128xf32> to vector<8x128xf32>
    %105 = arith.mulf %103, %104 : vector<8x128xf32>
    %106 = tpu.concatenate %84, %87, %90, %93, %32, %96, %99, %102, %105 in 0 : vector<8x128xf32>, vector<8x128xf32>, vector<8x128xf32>, vector<8x128xf32>, vector<8x128xf32>, vector<8x128xf32>, vector<8x128xf32>, vector<8x128xf32>, vector<8x128xf32> -> vector<72x128xf32>
    %107 = arith.addf %84, %87 : vector<8x128xf32>
    %108 = arith.addf %107, %90 : vector<8x128xf32>
    %109 = arith.addf %108, %93 : vector<8x128xf32>
    %110 = arith.addf %109, %32 : vector<8x128xf32>
    %111 = arith.addf %110, %96 : vector<8x128xf32>
    %112 = arith.addf %111, %99 : vector<8x128xf32>
    %113 = arith.addf %112, %102 : vector<8x128xf32>
    %114 = arith.addf %113, %105 : vector<8x128xf32>
    %cst_48 = arith.constant 0.111111112 : f32
    %115 = vector.broadcast %cst_48 : f32 to vector<8x128xf32>
    %116 = arith.mulf %114, %115 : vector<8x128xf32>
    %117 = vector.broadcast %53 : vector<1x128xf32> to vector<8x128xf32>
    %118 = arith.addf %84, %117 : vector<8x128xf32>
    %119 = arith.maximumf %32, %118 : vector<8x128xf32>
    %120 = vector.broadcast %57 : vector<1x128xf32> to vector<8x128xf32>
    %121 = arith.addf %87, %120 : vector<8x128xf32>
    %122 = arith.maximumf %119, %121 : vector<8x128xf32>
    %123 = vector.broadcast %61 : vector<1x128xf32> to vector<8x128xf32>
    %124 = arith.addf %90, %123 : vector<8x128xf32>
    %125 = arith.maximumf %122, %124 : vector<8x128xf32>
    %126 = vector.broadcast %65 : vector<1x128xf32> to vector<8x128xf32>
    %127 = arith.addf %93, %126 : vector<8x128xf32>
    %128 = arith.maximumf %125, %127 : vector<8x128xf32>
    %129 = vector.broadcast %69 : vector<1x128xf32> to vector<8x128xf32>
    %130 = arith.addf %96, %129 : vector<8x128xf32>
    %131 = arith.maximumf %128, %130 : vector<8x128xf32>
    %132 = vector.broadcast %73 : vector<1x128xf32> to vector<8x128xf32>
    %133 = arith.addf %99, %132 : vector<8x128xf32>
    %134 = arith.maximumf %131, %133 : vector<8x128xf32>
    %135 = vector.broadcast %77 : vector<1x128xf32> to vector<8x128xf32>
    %136 = arith.addf %102, %135 : vector<8x128xf32>
    %137 = arith.maximumf %134, %136 : vector<8x128xf32>
    %138 = vector.broadcast %81 : vector<1x128xf32> to vector<8x128xf32>
    %139 = arith.addf %105, %138 : vector<8x128xf32>
    %140 = arith.maximumf %137, %139 : vector<8x128xf32>
    %c0_49 = arith.constant 0 : index
    %c0_50 = arith.constant 0 : index
    %141 = vector.load %arg7[%c0_49, %c0_50] : memref<224x72xf32, #tpu.memory_space<vmem>>, vector<64x72xf32>
    %cst_51 = arith.constant dense<0.000000e+00> : vector<64x128xf32>
    %142 = tpu.matmul %141, %106, %cst_51 {dimension_numbers = #tpu.dot_dimension_numbers<[1], [0], [0], [1], [0, 0, 1, 1], [], []>} : vector<64x72xf32>, vector<72x128xf32>, vector<64x128xf32> -> vector<64x128xf32>
    %c0_52 = arith.constant 0 : index
    %c0_53 = arith.constant 0 : index
    %143 = vector.load %arg8[%c0_52, %c0_53] : memref<224x1xf32, #tpu.memory_space<vmem>>, vector<64x1xf32>
    %c0_54 = arith.constant 0 : index
    %c0_55 = arith.constant 0 : index
    %144 = vector.load %arg9[%c0_54, %c0_55] : memref<224x1xf32, #tpu.memory_space<vmem>>, vector<64x1xf32>
    %cst_56 = arith.constant dense<0.000000e+00> : vector<64xf32>
    %145 = vector.multi_reduction <add>, %142, %cst_56 [1] : vector<64x128xf32> to vector<64xf32>
    %146 = vector.shape_cast %145 : vector<64xf32> to vector<64x1xf32>
    %cst_57 = arith.constant 1.280000e+02 : f32
    %147 = vector.broadcast %cst_57 : f32 to vector<64x1xf32>
    %148 = arith.divf %146, %147 : vector<64x1xf32>
    %149 = vector.broadcast %148 : vector<64x1xf32> to vector<64x128xf32>
    %150 = arith.subf %142, %149 : vector<64x128xf32>
    %151 = arith.mulf %150, %150 : vector<64x128xf32>
    %cst_58 = arith.constant dense<0.000000e+00> : vector<64xf32>
    %152 = vector.multi_reduction <add>, %151, %cst_58 [1] : vector<64x128xf32> to vector<64xf32>
    %153 = vector.shape_cast %152 : vector<64xf32> to vector<64x1xf32>
    %cst_59 = arith.constant 1.280000e+02 : f32
    %154 = vector.broadcast %cst_59 : f32 to vector<64x1xf32>
    %155 = arith.divf %153, %154 : vector<64x1xf32>
    %156 = vector.broadcast %148 : vector<64x1xf32> to vector<64x128xf32>
    %157 = arith.subf %142, %156 : vector<64x128xf32>
    %cst_60 = arith.constant 9.99999974E-6 : f32
    %158 = vector.broadcast %cst_60 : f32 to vector<64x1xf32>
    %159 = arith.addf %155, %158 : vector<64x1xf32>
    %160 = math.rsqrt %159 : vector<64x1xf32>
    %161 = vector.broadcast %160 : vector<64x1xf32> to vector<64x128xf32>
    %162 = arith.mulf %157, %161 : vector<64x128xf32>
    %163 = vector.broadcast %143 : vector<64x1xf32> to vector<64x128xf32>
    %164 = arith.mulf %162, %163 : vector<64x128xf32>
    %165 = vector.broadcast %144 : vector<64x1xf32> to vector<64x128xf32>
    %166 = arith.addf %164, %165 : vector<64x128xf32>
    %cst_61 = arith.constant 0.000000e+00 : f32
    %167 = vector.broadcast %cst_61 : f32 to vector<64x128xf32>
    %168 = arith.maximumf %166, %167 : vector<64x128xf32>
    %c0_62 = arith.constant 0 : index
    %169 = memref.load %arg0[%c0_62] : memref<84xf32, #tpu.memory_space<smem>>
    %c1_63 = arith.constant 1 : index
    %170 = memref.load %arg0[%c1_63] : memref<84xf32, #tpu.memory_space<smem>>
    %c4 = arith.constant 4 : index
    %171 = memref.load %arg0[%c4] : memref<84xf32, #tpu.memory_space<smem>>
    %172 = vector.extract_strided_slice %168 {offsets = [0, 0], sizes = [8, 128], strides = [1, 1]} : vector<64x128xf32> to vector<8x128xf32>
    %173 = vector.extract_strided_slice %168 {offsets = [8, 0], sizes = [8, 128], strides = [1, 1]} : vector<64x128xf32> to vector<8x128xf32>
    %174 = vector.broadcast %169 : f32 to vector<8x128xf32>
    %175 = arith.mulf %174, %140 : vector<8x128xf32>
    %176 = vector.broadcast %170 : f32 to vector<8x128xf32>
    %177 = arith.mulf %176, %116 : vector<8x128xf32>
    %178 = arith.addf %175, %177 : vector<8x128xf32>
    %179 = arith.addf %178, %172 : vector<8x128xf32>
    %180 = arith.addf %179, %173 : vector<8x128xf32>
    %181 = vector.broadcast %171 : f32 to vector<8x128xf32>
    %182 = arith.mulf %181, %32 : vector<8x128xf32>
    %183 = arith.addf %180, %182 : vector<8x128xf32>
    %c12 = arith.constant 12 : index
    %184 = memref.load %arg0[%c12] : memref<84xf32, #tpu.memory_space<smem>>
    %c13 = arith.constant 13 : index
    %185 = memref.load %arg0[%c13] : memref<84xf32, #tpu.memory_space<smem>>
    %c16 = arith.constant 16 : index
    %186 = memref.load %arg0[%c16] : memref<84xf32, #tpu.memory_space<smem>>
    %187 = vector.extract_strided_slice %168 {offsets = [16, 0], sizes = [8, 128], strides = [1, 1]} : vector<64x128xf32> to vector<8x128xf32>
    %188 = vector.extract_strided_slice %168 {offsets = [24, 0], sizes = [8, 128], strides = [1, 1]} : vector<64x128xf32> to vector<8x128xf32>
    %189 = vector.broadcast %184 : f32 to vector<8x128xf32>
    %190 = arith.mulf %189, %140 : vector<8x128xf32>
    %191 = vector.broadcast %185 : f32 to vector<8x128xf32>
    %192 = arith.mulf %191, %116 : vector<8x128xf32>
    %193 = arith.addf %190, %192 : vector<8x128xf32>
    %194 = arith.addf %193, %187 : vector<8x128xf32>
    %195 = arith.addf %194, %188 : vector<8x128xf32>
    %196 = vector.broadcast %186 : f32 to vector<8x128xf32>
    %197 = arith.mulf %196, %32 : vector<8x128xf32>
    %198 = arith.addf %195, %197 : vector<8x128xf32>
    %c30 = arith.constant 30 : index
    %199 = memref.load %arg0[%c30] : memref<84xf32, #tpu.memory_space<smem>>
    %c31 = arith.constant 31 : index
    %200 = memref.load %arg0[%c31] : memref<84xf32, #tpu.memory_space<smem>>
    %c34 = arith.constant 34 : index
    %201 = memref.load %arg0[%c34] : memref<84xf32, #tpu.memory_space<smem>>
    %202 = vector.extract_strided_slice %168 {offsets = [32, 0], sizes = [8, 128], strides = [1, 1]} : vector<64x128xf32> to vector<8x128xf32>
    %203 = vector.extract_strided_slice %168 {offsets = [40, 0], sizes = [8, 128], strides = [1, 1]} : vector<64x128xf32> to vector<8x128xf32>
    %204 = vector.broadcast %199 : f32 to vector<8x128xf32>
    %205 = arith.mulf %204, %140 : vector<8x128xf32>
    %206 = vector.broadcast %200 : f32 to vector<8x128xf32>
    %207 = arith.mulf %206, %116 : vector<8x128xf32>
    %208 = arith.addf %205, %207 : vector<8x128xf32>
    %209 = arith.addf %208, %202 : vector<8x128xf32>
    %210 = arith.addf %209, %203 : vector<8x128xf32>
    %211 = vector.broadcast %201 : f32 to vector<8x128xf32>
    %212 = arith.mulf %211, %32 : vector<8x128xf32>
    %213 = arith.addf %210, %212 : vector<8x128xf32>
    %c54 = arith.constant 54 : index
    %214 = memref.load %arg0[%c54] : memref<84xf32, #tpu.memory_space<smem>>
    %c55 = arith.constant 55 : index
    %215 = memref.load %arg0[%c55] : memref<84xf32, #tpu.memory_space<smem>>
    %c58 = arith.constant 58 : index
    %216 = memref.load %arg0[%c58] : memref<84xf32, #tpu.memory_space<smem>>
    %217 = vector.extract_strided_slice %168 {offsets = [48, 0], sizes = [8, 128], strides = [1, 1]} : vector<64x128xf32> to vector<8x128xf32>
    %218 = vector.extract_strided_slice %168 {offsets = [56, 0], sizes = [8, 128], strides = [1, 1]} : vector<64x128xf32> to vector<8x128xf32>
    %219 = vector.broadcast %214 : f32 to vector<8x128xf32>
    %220 = arith.mulf %219, %140 : vector<8x128xf32>
    %221 = vector.broadcast %215 : f32 to vector<8x128xf32>
    %222 = arith.mulf %221, %116 : vector<8x128xf32>
    %223 = arith.addf %220, %222 : vector<8x128xf32>
    %224 = arith.addf %223, %217 : vector<8x128xf32>
    %225 = arith.addf %224, %218 : vector<8x128xf32>
    %226 = vector.broadcast %216 : f32 to vector<8x128xf32>
    %227 = arith.mulf %226, %32 : vector<8x128xf32>
    %228 = arith.addf %225, %227 : vector<8x128xf32>
    %c9_i32_64 = arith.constant 9 : i32
    %229 = tpu.dynamic_rotate %33 by %c9_i32_64 dim 1 : vector<8x128xf32>, i32 -> vector<8x128xf32>
    %230 = vector.broadcast %35 : vector<1x128xf32> to vector<8x128xf32>
    %231 = arith.mulf %229, %230 : vector<8x128xf32>
    %c8_i32_65 = arith.constant 8 : i32
    %232 = tpu.dynamic_rotate %33 by %c8_i32_65 dim 1 : vector<8x128xf32>, i32 -> vector<8x128xf32>
    %233 = vector.broadcast %37 : vector<1x128xf32> to vector<8x128xf32>
    %234 = arith.mulf %232, %233 : vector<8x128xf32>
    %c7_i32_66 = arith.constant 7 : i32
    %235 = tpu.dynamic_rotate %33 by %c7_i32_66 dim 1 : vector<8x128xf32>, i32 -> vector<8x128xf32>
    %236 = vector.broadcast %39 : vector<1x128xf32> to vector<8x128xf32>
    %237 = arith.mulf %235, %236 : vector<8x128xf32>
    %c1_i32_67 = arith.constant 1 : i32
    %238 = tpu.dynamic_rotate %33 by %c1_i32_67 dim 1 : vector<8x128xf32>, i32 -> vector<8x128xf32>
    %239 = vector.broadcast %41 : vector<1x128xf32> to vector<8x128xf32>
    %240 = arith.mulf %238, %239 : vector<8x128xf32>
    %c127_i32_68 = arith.constant 127 : i32
    %241 = tpu.dynamic_rotate %33 by %c127_i32_68 dim 1 : vector<8x128xf32>, i32 -> vector<8x128xf32>
    %242 = vector.broadcast %43 : vector<1x128xf32> to vector<8x128xf32>
    %243 = arith.mulf %241, %242 : vector<8x128xf32>
    %c121_i32_69 = arith.constant 121 : i32
    %244 = tpu.dynamic_rotate %33 by %c121_i32_69 dim 1 : vector<8x128xf32>, i32 -> vector<8x128xf32>
    %245 = vector.broadcast %45 : vector<1x128xf32> to vector<8x128xf32>
    %246 = arith.mulf %244, %245 : vector<8x128xf32>
    %c120_i32_70 = arith.constant 120 : i32
    %247 = tpu.dynamic_rotate %33 by %c120_i32_70 dim 1 : vector<8x128xf32>, i32 -> vector<8x128xf32>
    %248 = vector.broadcast %47 : vector<1x128xf32> to vector<8x128xf32>
    %249 = arith.mulf %247, %248 : vector<8x128xf32>
    %c119_i32_71 = arith.constant 119 : i32
    %250 = tpu.dynamic_rotate %33 by %c119_i32_71 dim 1 : vector<8x128xf32>, i32 -> vector<8x128xf32>
    %251 = vector.broadcast %49 : vector<1x128xf32> to vector<8x128xf32>
    %252 = arith.mulf %250, %251 : vector<8x128xf32>
    %253 = tpu.concatenate %231, %234, %237, %240, %33, %243, %246, %249, %252 in 0 : vector<8x128xf32>, vector<8x128xf32>, vector<8x128xf32>, vector<8x128xf32>, vector<8x128xf32>, vector<8x128xf32>, vector<8x128xf32>, vector<8x128xf32>, vector<8x128xf32> -> vector<72x128xf32>
    %254 = arith.addf %231, %234 : vector<8x128xf32>
    %255 = arith.addf %254, %237 : vector<8x128xf32>
    %256 = arith.addf %255, %240 : vector<8x128xf32>
    %257 = arith.addf %256, %33 : vector<8x128xf32>
    %258 = arith.addf %257, %243 : vector<8x128xf32>
    %259 = arith.addf %258, %246 : vector<8x128xf32>
    %260 = arith.addf %259, %249 : vector<8x128xf32>
    %261 = arith.addf %260, %252 : vector<8x128xf32>
    %cst_72 = arith.constant 0.111111112 : f32
    %262 = vector.broadcast %cst_72 : f32 to vector<8x128xf32>
    %263 = arith.mulf %261, %262 : vector<8x128xf32>
    %264 = vector.broadcast %53 : vector<1x128xf32> to vector<8x128xf32>
    %265 = arith.addf %231, %264 : vector<8x128xf32>
    %266 = arith.maximumf %33, %265 : vector<8x128xf32>
    %267 = vector.broadcast %57 : vector<1x128xf32> to vector<8x128xf32>
    %268 = arith.addf %234, %267 : vector<8x128xf32>
    %269 = arith.maximumf %266, %268 : vector<8x128xf32>
    %270 = vector.broadcast %61 : vector<1x128xf32> to vector<8x128xf32>
    %271 = arith.addf %237, %270 : vector<8x128xf32>
    %272 = arith.maximumf %269, %271 : vector<8x128xf32>
    %273 = vector.broadcast %65 : vector<1x128xf32> to vector<8x128xf32>
    %274 = arith.addf %240, %273 : vector<8x128xf32>
    %275 = arith.maximumf %272, %274 : vector<8x128xf32>
    %276 = vector.broadcast %69 : vector<1x128xf32> to vector<8x128xf32>
    %277 = arith.addf %243, %276 : vector<8x128xf32>
    %278 = arith.maximumf %275, %277 : vector<8x128xf32>
    %279 = vector.broadcast %73 : vector<1x128xf32> to vector<8x128xf32>
    %280 = arith.addf %246, %279 : vector<8x128xf32>
    %281 = arith.maximumf %278, %280 : vector<8x128xf32>
    %282 = vector.broadcast %77 : vector<1x128xf32> to vector<8x128xf32>
    %283 = arith.addf %249, %282 : vector<8x128xf32>
    %284 = arith.maximumf %281, %283 : vector<8x128xf32>
    %285 = vector.broadcast %81 : vector<1x128xf32> to vector<8x128xf32>
    %286 = arith.addf %252, %285 : vector<8x128xf32>
    %287 = arith.maximumf %284, %286 : vector<8x128xf32>
    %c64 = arith.constant 64 : index
    %c0_73 = arith.constant 0 : index
    %288 = vector.load %arg7[%c64, %c0_73] : memref<224x72xf32, #tpu.memory_space<vmem>>, vector<64x72xf32>
    %cst_74 = arith.constant dense<0.000000e+00> : vector<64x128xf32>
    %289 = tpu.matmul %288, %253, %cst_74 {dimension_numbers = #tpu.dot_dimension_numbers<[1], [0], [0], [1], [0, 0, 1, 1], [], []>} : vector<64x72xf32>, vector<72x128xf32>, vector<64x128xf32> -> vector<64x128xf32>
    %c64_75 = arith.constant 64 : index
    %c0_76 = arith.constant 0 : index
    %290 = vector.load %arg8[%c64_75, %c0_76] : memref<224x1xf32, #tpu.memory_space<vmem>>, vector<64x1xf32>
    %c64_77 = arith.constant 64 : index
    %c0_78 = arith.constant 0 : index
    %291 = vector.load %arg9[%c64_77, %c0_78] : memref<224x1xf32, #tpu.memory_space<vmem>>, vector<64x1xf32>
    %cst_79 = arith.constant dense<0.000000e+00> : vector<64xf32>
    %292 = vector.multi_reduction <add>, %289, %cst_79 [1] : vector<64x128xf32> to vector<64xf32>
    %293 = vector.shape_cast %292 : vector<64xf32> to vector<64x1xf32>
    %cst_80 = arith.constant 1.280000e+02 : f32
    %294 = vector.broadcast %cst_80 : f32 to vector<64x1xf32>
    %295 = arith.divf %293, %294 : vector<64x1xf32>
    %296 = vector.broadcast %295 : vector<64x1xf32> to vector<64x128xf32>
    %297 = arith.subf %289, %296 : vector<64x128xf32>
    %298 = arith.mulf %297, %297 : vector<64x128xf32>
    %cst_81 = arith.constant dense<0.000000e+00> : vector<64xf32>
    %299 = vector.multi_reduction <add>, %298, %cst_81 [1] : vector<64x128xf32> to vector<64xf32>
    %300 = vector.shape_cast %299 : vector<64xf32> to vector<64x1xf32>
    %cst_82 = arith.constant 1.280000e+02 : f32
    %301 = vector.broadcast %cst_82 : f32 to vector<64x1xf32>
    %302 = arith.divf %300, %301 : vector<64x1xf32>
    %303 = vector.broadcast %295 : vector<64x1xf32> to vector<64x128xf32>
    %304 = arith.subf %289, %303 : vector<64x128xf32>
    %cst_83 = arith.constant 9.99999974E-6 : f32
    %305 = vector.broadcast %cst_83 : f32 to vector<64x1xf32>
    %306 = arith.addf %302, %305 : vector<64x1xf32>
    %307 = math.rsqrt %306 : vector<64x1xf32>
    %308 = vector.broadcast %307 : vector<64x1xf32> to vector<64x128xf32>
    %309 = arith.mulf %304, %308 : vector<64x128xf32>
    %310 = vector.broadcast %290 : vector<64x1xf32> to vector<64x128xf32>
    %311 = arith.mulf %309, %310 : vector<64x128xf32>
    %312 = vector.broadcast %291 : vector<64x1xf32> to vector<64x128xf32>
    %313 = arith.addf %311, %312 : vector<64x128xf32>
    %cst_84 = arith.constant 0.000000e+00 : f32
    %314 = vector.broadcast %cst_84 : f32 to vector<64x128xf32>
    %315 = arith.maximumf %313, %314 : vector<64x128xf32>
    %c6_85 = arith.constant 6 : index
    %316 = memref.load %arg0[%c6_85] : memref<84xf32, #tpu.memory_space<smem>>
    %c7_86 = arith.constant 7 : index
    %317 = memref.load %arg0[%c7_86] : memref<84xf32, #tpu.memory_space<smem>>
    %c10 = arith.constant 10 : index
    %318 = memref.load %arg0[%c10] : memref<84xf32, #tpu.memory_space<smem>>
    %319 = vector.extract_strided_slice %315 {offsets = [0, 0], sizes = [8, 128], strides = [1, 1]} : vector<64x128xf32> to vector<8x128xf32>
    %320 = vector.extract_strided_slice %315 {offsets = [8, 0], sizes = [8, 128], strides = [1, 1]} : vector<64x128xf32> to vector<8x128xf32>
    %321 = vector.broadcast %316 : f32 to vector<8x128xf32>
    %322 = arith.mulf %321, %287 : vector<8x128xf32>
    %323 = vector.broadcast %317 : f32 to vector<8x128xf32>
    %324 = arith.mulf %323, %263 : vector<8x128xf32>
    %325 = arith.addf %322, %324 : vector<8x128xf32>
    %326 = arith.addf %325, %319 : vector<8x128xf32>
    %327 = arith.addf %326, %320 : vector<8x128xf32>
    %328 = vector.broadcast %318 : f32 to vector<8x128xf32>
    %329 = arith.mulf %328, %33 : vector<8x128xf32>
    %330 = arith.addf %327, %329 : vector<8x128xf32>
    %331 = arith.addf %183, %330 : vector<8x128xf32>
    %c18 = arith.constant 18 : index
    %332 = memref.load %arg0[%c18] : memref<84xf32, #tpu.memory_space<smem>>
    %c19 = arith.constant 19 : index
    %333 = memref.load %arg0[%c19] : memref<84xf32, #tpu.memory_space<smem>>
    %c22 = arith.constant 22 : index
    %334 = memref.load %arg0[%c22] : memref<84xf32, #tpu.memory_space<smem>>
    %335 = vector.extract_strided_slice %315 {offsets = [16, 0], sizes = [8, 128], strides = [1, 1]} : vector<64x128xf32> to vector<8x128xf32>
    %336 = vector.extract_strided_slice %315 {offsets = [24, 0], sizes = [8, 128], strides = [1, 1]} : vector<64x128xf32> to vector<8x128xf32>
    %337 = vector.broadcast %332 : f32 to vector<8x128xf32>
    %338 = arith.mulf %337, %287 : vector<8x128xf32>
    %339 = vector.broadcast %333 : f32 to vector<8x128xf32>
    %340 = arith.mulf %339, %263 : vector<8x128xf32>
    %341 = arith.addf %338, %340 : vector<8x128xf32>
    %342 = arith.addf %341, %335 : vector<8x128xf32>
    %343 = arith.addf %342, %336 : vector<8x128xf32>
    %344 = vector.broadcast %334 : f32 to vector<8x128xf32>
    %345 = arith.mulf %344, %33 : vector<8x128xf32>
    %346 = arith.addf %343, %345 : vector<8x128xf32>
    %347 = arith.addf %198, %346 : vector<8x128xf32>
    %c36 = arith.constant 36 : index
    %348 = memref.load %arg0[%c36] : memref<84xf32, #tpu.memory_space<smem>>
    %c37 = arith.constant 37 : index
    %349 = memref.load %arg0[%c37] : memref<84xf32, #tpu.memory_space<smem>>
    %c40 = arith.constant 40 : index
    %350 = memref.load %arg0[%c40] : memref<84xf32, #tpu.memory_space<smem>>
    %351 = vector.extract_strided_slice %315 {offsets = [32, 0], sizes = [8, 128], strides = [1, 1]} : vector<64x128xf32> to vector<8x128xf32>
    %352 = vector.extract_strided_slice %315 {offsets = [40, 0], sizes = [8, 128], strides = [1, 1]} : vector<64x128xf32> to vector<8x128xf32>
    %353 = vector.broadcast %348 : f32 to vector<8x128xf32>
    %354 = arith.mulf %353, %287 : vector<8x128xf32>
    %355 = vector.broadcast %349 : f32 to vector<8x128xf32>
    %356 = arith.mulf %355, %263 : vector<8x128xf32>
    %357 = arith.addf %354, %356 : vector<8x128xf32>
    %358 = arith.addf %357, %351 : vector<8x128xf32>
    %359 = arith.addf %358, %352 : vector<8x128xf32>
    %360 = vector.broadcast %350 : f32 to vector<8x128xf32>
    %361 = arith.mulf %360, %33 : vector<8x128xf32>
    %362 = arith.addf %359, %361 : vector<8x128xf32>
    %363 = arith.addf %213, %362 : vector<8x128xf32>
    %c60 = arith.constant 60 : index
    %364 = memref.load %arg0[%c60] : memref<84xf32, #tpu.memory_space<smem>>
    %c61 = arith.constant 61 : index
    %365 = memref.load %arg0[%c61] : memref<84xf32, #tpu.memory_space<smem>>
    %c64_87 = arith.constant 64 : index
    %366 = memref.load %arg0[%c64_87] : memref<84xf32, #tpu.memory_space<smem>>
    %367 = vector.extract_strided_slice %315 {offsets = [48, 0], sizes = [8, 128], strides = [1, 1]} : vector<64x128xf32> to vector<8x128xf32>
    %368 = vector.extract_strided_slice %315 {offsets = [56, 0], sizes = [8, 128], strides = [1, 1]} : vector<64x128xf32> to vector<8x128xf32>
    %369 = vector.broadcast %364 : f32 to vector<8x128xf32>
    %370 = arith.mulf %369, %287 : vector<8x128xf32>
    %371 = vector.broadcast %365 : f32 to vector<8x128xf32>
    %372 = arith.mulf %371, %263 : vector<8x128xf32>
    %373 = arith.addf %370, %372 : vector<8x128xf32>
    %374 = arith.addf %373, %367 : vector<8x128xf32>
    %375 = arith.addf %374, %368 : vector<8x128xf32>
    %376 = vector.broadcast %366 : f32 to vector<8x128xf32>
    %377 = arith.mulf %376, %33 : vector<8x128xf32>
    %378 = arith.addf %375, %377 : vector<8x128xf32>
    %379 = arith.addf %228, %378 : vector<8x128xf32>
    %c9_i32_88 = arith.constant 9 : i32
    %380 = tpu.dynamic_rotate %331 by %c9_i32_88 dim 1 : vector<8x128xf32>, i32 -> vector<8x128xf32>
    %381 = vector.broadcast %35 : vector<1x128xf32> to vector<8x128xf32>
    %382 = arith.mulf %380, %381 : vector<8x128xf32>
    %c8_i32_89 = arith.constant 8 : i32
    %383 = tpu.dynamic_rotate %331 by %c8_i32_89 dim 1 : vector<8x128xf32>, i32 -> vector<8x128xf32>
    %384 = vector.broadcast %37 : vector<1x128xf32> to vector<8x128xf32>
    %385 = arith.mulf %383, %384 : vector<8x128xf32>
    %c7_i32_90 = arith.constant 7 : i32
    %386 = tpu.dynamic_rotate %331 by %c7_i32_90 dim 1 : vector<8x128xf32>, i32 -> vector<8x128xf32>
    %387 = vector.broadcast %39 : vector<1x128xf32> to vector<8x128xf32>
    %388 = arith.mulf %386, %387 : vector<8x128xf32>
    %c1_i32_91 = arith.constant 1 : i32
    %389 = tpu.dynamic_rotate %331 by %c1_i32_91 dim 1 : vector<8x128xf32>, i32 -> vector<8x128xf32>
    %390 = vector.broadcast %41 : vector<1x128xf32> to vector<8x128xf32>
    %391 = arith.mulf %389, %390 : vector<8x128xf32>
    %c127_i32_92 = arith.constant 127 : i32
    %392 = tpu.dynamic_rotate %331 by %c127_i32_92 dim 1 : vector<8x128xf32>, i32 -> vector<8x128xf32>
    %393 = vector.broadcast %43 : vector<1x128xf32> to vector<8x128xf32>
    %394 = arith.mulf %392, %393 : vector<8x128xf32>
    %c121_i32_93 = arith.constant 121 : i32
    %395 = tpu.dynamic_rotate %331 by %c121_i32_93 dim 1 : vector<8x128xf32>, i32 -> vector<8x128xf32>
    %396 = vector.broadcast %45 : vector<1x128xf32> to vector<8x128xf32>
    %397 = arith.mulf %395, %396 : vector<8x128xf32>
    %c120_i32_94 = arith.constant 120 : i32
    %398 = tpu.dynamic_rotate %331 by %c120_i32_94 dim 1 : vector<8x128xf32>, i32 -> vector<8x128xf32>
    %399 = vector.broadcast %47 : vector<1x128xf32> to vector<8x128xf32>
    %400 = arith.mulf %398, %399 : vector<8x128xf32>
    %c119_i32_95 = arith.constant 119 : i32
    %401 = tpu.dynamic_rotate %331 by %c119_i32_95 dim 1 : vector<8x128xf32>, i32 -> vector<8x128xf32>
    %402 = vector.broadcast %49 : vector<1x128xf32> to vector<8x128xf32>
    %403 = arith.mulf %401, %402 : vector<8x128xf32>
    %404 = tpu.concatenate %382, %385, %388, %391, %331, %394, %397, %400, %403 in 0 : vector<8x128xf32>, vector<8x128xf32>, vector<8x128xf32>, vector<8x128xf32>, vector<8x128xf32>, vector<8x128xf32>, vector<8x128xf32>, vector<8x128xf32>, vector<8x128xf32> -> vector<72x128xf32>
    %405 = arith.addf %382, %385 : vector<8x128xf32>
    %406 = arith.addf %405, %388 : vector<8x128xf32>
    %407 = arith.addf %406, %391 : vector<8x128xf32>
    %408 = arith.addf %407, %331 : vector<8x128xf32>
    %409 = arith.addf %408, %394 : vector<8x128xf32>
    %410 = arith.addf %409, %397 : vector<8x128xf32>
    %411 = arith.addf %410, %400 : vector<8x128xf32>
    %412 = arith.addf %411, %403 : vector<8x128xf32>
    %cst_96 = arith.constant 0.111111112 : f32
    %413 = vector.broadcast %cst_96 : f32 to vector<8x128xf32>
    %414 = arith.mulf %412, %413 : vector<8x128xf32>
    %415 = vector.broadcast %53 : vector<1x128xf32> to vector<8x128xf32>
    %416 = arith.addf %382, %415 : vector<8x128xf32>
    %417 = arith.maximumf %331, %416 : vector<8x128xf32>
    %418 = vector.broadcast %57 : vector<1x128xf32> to vector<8x128xf32>
    %419 = arith.addf %385, %418 : vector<8x128xf32>
    %420 = arith.maximumf %417, %419 : vector<8x128xf32>
    %421 = vector.broadcast %61 : vector<1x128xf32> to vector<8x128xf32>
    %422 = arith.addf %388, %421 : vector<8x128xf32>
    %423 = arith.maximumf %420, %422 : vector<8x128xf32>
    %424 = vector.broadcast %65 : vector<1x128xf32> to vector<8x128xf32>
    %425 = arith.addf %391, %424 : vector<8x128xf32>
    %426 = arith.maximumf %423, %425 : vector<8x128xf32>
    %427 = vector.broadcast %69 : vector<1x128xf32> to vector<8x128xf32>
    %428 = arith.addf %394, %427 : vector<8x128xf32>
    %429 = arith.maximumf %426, %428 : vector<8x128xf32>
    %430 = vector.broadcast %73 : vector<1x128xf32> to vector<8x128xf32>
    %431 = arith.addf %397, %430 : vector<8x128xf32>
    %432 = arith.maximumf %429, %431 : vector<8x128xf32>
    %433 = vector.broadcast %77 : vector<1x128xf32> to vector<8x128xf32>
    %434 = arith.addf %400, %433 : vector<8x128xf32>
    %435 = arith.maximumf %432, %434 : vector<8x128xf32>
    %436 = vector.broadcast %81 : vector<1x128xf32> to vector<8x128xf32>
    %437 = arith.addf %403, %436 : vector<8x128xf32>
    %438 = arith.maximumf %435, %437 : vector<8x128xf32>
    %c128 = arith.constant 128 : index
    %c0_97 = arith.constant 0 : index
    %439 = vector.load %arg7[%c128, %c0_97] : memref<224x72xf32, #tpu.memory_space<vmem>>, vector<48x72xf32>
    %cst_98 = arith.constant dense<0.000000e+00> : vector<48x128xf32>
    %440 = tpu.matmul %439, %404, %cst_98 {dimension_numbers = #tpu.dot_dimension_numbers<[1], [0], [0], [1], [0, 0, 1, 1], [], []>} : vector<48x72xf32>, vector<72x128xf32>, vector<48x128xf32> -> vector<48x128xf32>
    %c128_99 = arith.constant 128 : index
    %c0_100 = arith.constant 0 : index
    %441 = vector.load %arg8[%c128_99, %c0_100] : memref<224x1xf32, #tpu.memory_space<vmem>>, vector<48x1xf32>
    %c128_101 = arith.constant 128 : index
    %c0_102 = arith.constant 0 : index
    %442 = vector.load %arg9[%c128_101, %c0_102] : memref<224x1xf32, #tpu.memory_space<vmem>>, vector<48x1xf32>
    %cst_103 = arith.constant dense<0.000000e+00> : vector<48xf32>
    %443 = vector.multi_reduction <add>, %440, %cst_103 [1] : vector<48x128xf32> to vector<48xf32>
    %444 = vector.shape_cast %443 : vector<48xf32> to vector<48x1xf32>
    %cst_104 = arith.constant 1.280000e+02 : f32
    %445 = vector.broadcast %cst_104 : f32 to vector<48x1xf32>
    %446 = arith.divf %444, %445 : vector<48x1xf32>
    %447 = vector.broadcast %446 : vector<48x1xf32> to vector<48x128xf32>
    %448 = arith.subf %440, %447 : vector<48x128xf32>
    %449 = arith.mulf %448, %448 : vector<48x128xf32>
    %cst_105 = arith.constant dense<0.000000e+00> : vector<48xf32>
    %450 = vector.multi_reduction <add>, %449, %cst_105 [1] : vector<48x128xf32> to vector<48xf32>
    %451 = vector.shape_cast %450 : vector<48xf32> to vector<48x1xf32>
    %cst_106 = arith.constant 1.280000e+02 : f32
    %452 = vector.broadcast %cst_106 : f32 to vector<48x1xf32>
    %453 = arith.divf %451, %452 : vector<48x1xf32>
    %454 = vector.broadcast %446 : vector<48x1xf32> to vector<48x128xf32>
    %455 = arith.subf %440, %454 : vector<48x128xf32>
    %cst_107 = arith.constant 9.99999974E-6 : f32
    %456 = vector.broadcast %cst_107 : f32 to vector<48x1xf32>
    %457 = arith.addf %453, %456 : vector<48x1xf32>
    %458 = math.rsqrt %457 : vector<48x1xf32>
    %459 = vector.broadcast %458 : vector<48x1xf32> to vector<48x128xf32>
    %460 = arith.mulf %455, %459 : vector<48x128xf32>
    %461 = vector.broadcast %441 : vector<48x1xf32> to vector<48x128xf32>
    %462 = arith.mulf %460, %461 : vector<48x128xf32>
    %463 = vector.broadcast %442 : vector<48x1xf32> to vector<48x128xf32>
    %464 = arith.addf %462, %463 : vector<48x128xf32>
    %cst_108 = arith.constant 0.000000e+00 : f32
    %465 = vector.broadcast %cst_108 : f32 to vector<48x128xf32>
    %466 = arith.maximumf %464, %465 : vector<48x128xf32>
    %c24 = arith.constant 24 : index
    %467 = memref.load %arg0[%c24] : memref<84xf32, #tpu.memory_space<smem>>
    %c25 = arith.constant 25 : index
    %468 = memref.load %arg0[%c25] : memref<84xf32, #tpu.memory_space<smem>>
    %c28 = arith.constant 28 : index
    %469 = memref.load %arg0[%c28] : memref<84xf32, #tpu.memory_space<smem>>
    %470 = vector.extract_strided_slice %466 {offsets = [0, 0], sizes = [8, 128], strides = [1, 1]} : vector<48x128xf32> to vector<8x128xf32>
    %471 = vector.extract_strided_slice %466 {offsets = [8, 0], sizes = [8, 128], strides = [1, 1]} : vector<48x128xf32> to vector<8x128xf32>
    %472 = vector.broadcast %467 : f32 to vector<8x128xf32>
    %473 = arith.mulf %472, %438 : vector<8x128xf32>
    %474 = vector.broadcast %468 : f32 to vector<8x128xf32>
    %475 = arith.mulf %474, %414 : vector<8x128xf32>
    %476 = arith.addf %473, %475 : vector<8x128xf32>
    %477 = arith.addf %476, %470 : vector<8x128xf32>
    %478 = arith.addf %477, %471 : vector<8x128xf32>
    %479 = vector.broadcast %469 : f32 to vector<8x128xf32>
    %480 = arith.mulf %479, %331 : vector<8x128xf32>
    %481 = arith.addf %478, %480 : vector<8x128xf32>
    %482 = arith.addf %347, %481 : vector<8x128xf32>
    %c42 = arith.constant 42 : index
    %483 = memref.load %arg0[%c42] : memref<84xf32, #tpu.memory_space<smem>>
    %c43 = arith.constant 43 : index
    %484 = memref.load %arg0[%c43] : memref<84xf32, #tpu.memory_space<smem>>
    %c46 = arith.constant 46 : index
    %485 = memref.load %arg0[%c46] : memref<84xf32, #tpu.memory_space<smem>>
    %486 = vector.extract_strided_slice %466 {offsets = [16, 0], sizes = [8, 128], strides = [1, 1]} : vector<48x128xf32> to vector<8x128xf32>
    %487 = vector.extract_strided_slice %466 {offsets = [24, 0], sizes = [8, 128], strides = [1, 1]} : vector<48x128xf32> to vector<8x128xf32>
    %488 = vector.broadcast %483 : f32 to vector<8x128xf32>
    %489 = arith.mulf %488, %438 : vector<8x128xf32>
    %490 = vector.broadcast %484 : f32 to vector<8x128xf32>
    %491 = arith.mulf %490, %414 : vector<8x128xf32>
    %492 = arith.addf %489, %491 : vector<8x128xf32>
    %493 = arith.addf %492, %486 : vector<8x128xf32>
    %494 = arith.addf %493, %487 : vector<8x128xf32>
    %495 = vector.broadcast %485 : f32 to vector<8x128xf32>
    %496 = arith.mulf %495, %331 : vector<8x128xf32>
    %497 = arith.addf %494, %496 : vector<8x128xf32>
    %498 = arith.addf %363, %497 : vector<8x128xf32>
    %c66 = arith.constant 66 : index
    %499 = memref.load %arg0[%c66] : memref<84xf32, #tpu.memory_space<smem>>
    %c67 = arith.constant 67 : index
    %500 = memref.load %arg0[%c67] : memref<84xf32, #tpu.memory_space<smem>>
    %c70 = arith.constant 70 : index
    %501 = memref.load %arg0[%c70] : memref<84xf32, #tpu.memory_space<smem>>
    %502 = vector.extract_strided_slice %466 {offsets = [32, 0], sizes = [8, 128], strides = [1, 1]} : vector<48x128xf32> to vector<8x128xf32>
    %503 = vector.extract_strided_slice %466 {offsets = [40, 0], sizes = [8, 128], strides = [1, 1]} : vector<48x128xf32> to vector<8x128xf32>
    %504 = vector.broadcast %499 : f32 to vector<8x128xf32>
    %505 = arith.mulf %504, %438 : vector<8x128xf32>
    %506 = vector.broadcast %500 : f32 to vector<8x128xf32>
    %507 = arith.mulf %506, %414 : vector<8x128xf32>
    %508 = arith.addf %505, %507 : vector<8x128xf32>
    %509 = arith.addf %508, %502 : vector<8x128xf32>
    %510 = arith.addf %509, %503 : vector<8x128xf32>
    %511 = vector.broadcast %501 : f32 to vector<8x128xf32>
    %512 = arith.mulf %511, %331 : vector<8x128xf32>
    %513 = arith.addf %510, %512 : vector<8x128xf32>
    %514 = arith.addf %379, %513 : vector<8x128xf32>
    %c9_i32_109 = arith.constant 9 : i32
    %515 = tpu.dynamic_rotate %482 by %c9_i32_109 dim 1 : vector<8x128xf32>, i32 -> vector<8x128xf32>
    %516 = vector.broadcast %35 : vector<1x128xf32> to vector<8x128xf32>
    %517 = arith.mulf %515, %516 : vector<8x128xf32>
    %c8_i32_110 = arith.constant 8 : i32
    %518 = tpu.dynamic_rotate %482 by %c8_i32_110 dim 1 : vector<8x128xf32>, i32 -> vector<8x128xf32>
    %519 = vector.broadcast %37 : vector<1x128xf32> to vector<8x128xf32>
    %520 = arith.mulf %518, %519 : vector<8x128xf32>
    %c7_i32_111 = arith.constant 7 : i32
    %521 = tpu.dynamic_rotate %482 by %c7_i32_111 dim 1 : vector<8x128xf32>, i32 -> vector<8x128xf32>
    %522 = vector.broadcast %39 : vector<1x128xf32> to vector<8x128xf32>
    %523 = arith.mulf %521, %522 : vector<8x128xf32>
    %c1_i32_112 = arith.constant 1 : i32
    %524 = tpu.dynamic_rotate %482 by %c1_i32_112 dim 1 : vector<8x128xf32>, i32 -> vector<8x128xf32>
    %525 = vector.broadcast %41 : vector<1x128xf32> to vector<8x128xf32>
    %526 = arith.mulf %524, %525 : vector<8x128xf32>
    %c127_i32_113 = arith.constant 127 : i32
    %527 = tpu.dynamic_rotate %482 by %c127_i32_113 dim 1 : vector<8x128xf32>, i32 -> vector<8x128xf32>
    %528 = vector.broadcast %43 : vector<1x128xf32> to vector<8x128xf32>
    %529 = arith.mulf %527, %528 : vector<8x128xf32>
    %c121_i32_114 = arith.constant 121 : i32
    %530 = tpu.dynamic_rotate %482 by %c121_i32_114 dim 1 : vector<8x128xf32>, i32 -> vector<8x128xf32>
    %531 = vector.broadcast %45 : vector<1x128xf32> to vector<8x128xf32>
    %532 = arith.mulf %530, %531 : vector<8x128xf32>
    %c120_i32_115 = arith.constant 120 : i32
    %533 = tpu.dynamic_rotate %482 by %c120_i32_115 dim 1 : vector<8x128xf32>, i32 -> vector<8x128xf32>
    %534 = vector.broadcast %47 : vector<1x128xf32> to vector<8x128xf32>
    %535 = arith.mulf %533, %534 : vector<8x128xf32>
    %c119_i32_116 = arith.constant 119 : i32
    %536 = tpu.dynamic_rotate %482 by %c119_i32_116 dim 1 : vector<8x128xf32>, i32 -> vector<8x128xf32>
    %537 = vector.broadcast %49 : vector<1x128xf32> to vector<8x128xf32>
    %538 = arith.mulf %536, %537 : vector<8x128xf32>
    %539 = tpu.concatenate %517, %520, %523, %526, %482, %529, %532, %535, %538 in 0 : vector<8x128xf32>, vector<8x128xf32>, vector<8x128xf32>, vector<8x128xf32>, vector<8x128xf32>, vector<8x128xf32>, vector<8x128xf32>, vector<8x128xf32>, vector<8x128xf32> -> vector<72x128xf32>
    %540 = arith.addf %517, %520 : vector<8x128xf32>
    %541 = arith.addf %540, %523 : vector<8x128xf32>
    %542 = arith.addf %541, %526 : vector<8x128xf32>
    %543 = arith.addf %542, %482 : vector<8x128xf32>
    %544 = arith.addf %543, %529 : vector<8x128xf32>
    %545 = arith.addf %544, %532 : vector<8x128xf32>
    %546 = arith.addf %545, %535 : vector<8x128xf32>
    %547 = arith.addf %546, %538 : vector<8x128xf32>
    %cst_117 = arith.constant 0.111111112 : f32
    %548 = vector.broadcast %cst_117 : f32 to vector<8x128xf32>
    %549 = arith.mulf %547, %548 : vector<8x128xf32>
    %550 = vector.broadcast %53 : vector<1x128xf32> to vector<8x128xf32>
    %551 = arith.addf %517, %550 : vector<8x128xf32>
    %552 = arith.maximumf %482, %551 : vector<8x128xf32>
    %553 = vector.broadcast %57 : vector<1x128xf32> to vector<8x128xf32>
    %554 = arith.addf %520, %553 : vector<8x128xf32>
    %555 = arith.maximumf %552, %554 : vector<8x128xf32>
    %556 = vector.broadcast %61 : vector<1x128xf32> to vector<8x128xf32>
    %557 = arith.addf %523, %556 : vector<8x128xf32>
    %558 = arith.maximumf %555, %557 : vector<8x128xf32>
    %559 = vector.broadcast %65 : vector<1x128xf32> to vector<8x128xf32>
    %560 = arith.addf %526, %559 : vector<8x128xf32>
    %561 = arith.maximumf %558, %560 : vector<8x128xf32>
    %562 = vector.broadcast %69 : vector<1x128xf32> to vector<8x128xf32>
    %563 = arith.addf %529, %562 : vector<8x128xf32>
    %564 = arith.maximumf %561, %563 : vector<8x128xf32>
    %565 = vector.broadcast %73 : vector<1x128xf32> to vector<8x128xf32>
    %566 = arith.addf %532, %565 : vector<8x128xf32>
    %567 = arith.maximumf %564, %566 : vector<8x128xf32>
    %568 = vector.broadcast %77 : vector<1x128xf32> to vector<8x128xf32>
    %569 = arith.addf %535, %568 : vector<8x128xf32>
    %570 = arith.maximumf %567, %569 : vector<8x128xf32>
    %571 = vector.broadcast %81 : vector<1x128xf32> to vector<8x128xf32>
    %572 = arith.addf %538, %571 : vector<8x128xf32>
    %573 = arith.maximumf %570, %572 : vector<8x128xf32>
    %c176 = arith.constant 176 : index
    %c0_118 = arith.constant 0 : index
    %574 = vector.load %arg7[%c176, %c0_118] : memref<224x72xf32, #tpu.memory_space<vmem>>, vector<32x72xf32>
    %cst_119 = arith.constant dense<0.000000e+00> : vector<32x128xf32>
    %575 = tpu.matmul %574, %539, %cst_119 {dimension_numbers = #tpu.dot_dimension_numbers<[1], [0], [0], [1], [0, 0, 1, 1], [], []>} : vector<32x72xf32>, vector<72x128xf32>, vector<32x128xf32> -> vector<32x128xf32>
    %c176_120 = arith.constant 176 : index
    %c0_121 = arith.constant 0 : index
    %576 = vector.load %arg8[%c176_120, %c0_121] : memref<224x1xf32, #tpu.memory_space<vmem>>, vector<32x1xf32>
    %c176_122 = arith.constant 176 : index
    %c0_123 = arith.constant 0 : index
    %577 = vector.load %arg9[%c176_122, %c0_123] : memref<224x1xf32, #tpu.memory_space<vmem>>, vector<32x1xf32>
    %cst_124 = arith.constant dense<0.000000e+00> : vector<32xf32>
    %578 = vector.multi_reduction <add>, %575, %cst_124 [1] : vector<32x128xf32> to vector<32xf32>
    %579 = vector.shape_cast %578 : vector<32xf32> to vector<32x1xf32>
    %cst_125 = arith.constant 1.280000e+02 : f32
    %580 = vector.broadcast %cst_125 : f32 to vector<32x1xf32>
    %581 = arith.divf %579, %580 : vector<32x1xf32>
    %582 = vector.broadcast %581 : vector<32x1xf32> to vector<32x128xf32>
    %583 = arith.subf %575, %582 : vector<32x128xf32>
    %584 = arith.mulf %583, %583 : vector<32x128xf32>
    %cst_126 = arith.constant dense<0.000000e+00> : vector<32xf32>
    %585 = vector.multi_reduction <add>, %584, %cst_126 [1] : vector<32x128xf32> to vector<32xf32>
    %586 = vector.shape_cast %585 : vector<32xf32> to vector<32x1xf32>
    %cst_127 = arith.constant 1.280000e+02 : f32
    %587 = vector.broadcast %cst_127 : f32 to vector<32x1xf32>
    %588 = arith.divf %586, %587 : vector<32x1xf32>
    %589 = vector.broadcast %581 : vector<32x1xf32> to vector<32x128xf32>
    %590 = arith.subf %575, %589 : vector<32x128xf32>
    %cst_128 = arith.constant 9.99999974E-6 : f32
    %591 = vector.broadcast %cst_128 : f32 to vector<32x1xf32>
    %592 = arith.addf %588, %591 : vector<32x1xf32>
    %593 = math.rsqrt %592 : vector<32x1xf32>
    %594 = vector.broadcast %593 : vector<32x1xf32> to vector<32x128xf32>
    %595 = arith.mulf %590, %594 : vector<32x128xf32>
    %596 = vector.broadcast %576 : vector<32x1xf32> to vector<32x128xf32>
    %597 = arith.mulf %595, %596 : vector<32x128xf32>
    %598 = vector.broadcast %577 : vector<32x1xf32> to vector<32x128xf32>
    %599 = arith.addf %597, %598 : vector<32x128xf32>
    %cst_129 = arith.constant 0.000000e+00 : f32
    %600 = vector.broadcast %cst_129 : f32 to vector<32x128xf32>
    %601 = arith.maximumf %599, %600 : vector<32x128xf32>
    %c48 = arith.constant 48 : index
    %602 = memref.load %arg0[%c48] : memref<84xf32, #tpu.memory_space<smem>>
    %c49 = arith.constant 49 : index
    %603 = memref.load %arg0[%c49] : memref<84xf32, #tpu.memory_space<smem>>
    %c52 = arith.constant 52 : index
    %604 = memref.load %arg0[%c52] : memref<84xf32, #tpu.memory_space<smem>>
    %605 = vector.extract_strided_slice %601 {offsets = [0, 0], sizes = [8, 128], strides = [1, 1]} : vector<32x128xf32> to vector<8x128xf32>
    %606 = vector.extract_strided_slice %601 {offsets = [8, 0], sizes = [8, 128], strides = [1, 1]} : vector<32x128xf32> to vector<8x128xf32>
    %607 = vector.broadcast %602 : f32 to vector<8x128xf32>
    %608 = arith.mulf %607, %573 : vector<8x128xf32>
    %609 = vector.broadcast %603 : f32 to vector<8x128xf32>
    %610 = arith.mulf %609, %549 : vector<8x128xf32>
    %611 = arith.addf %608, %610 : vector<8x128xf32>
    %612 = arith.addf %611, %605 : vector<8x128xf32>
    %613 = arith.addf %612, %606 : vector<8x128xf32>
    %614 = vector.broadcast %604 : f32 to vector<8x128xf32>
    %615 = arith.mulf %614, %482 : vector<8x128xf32>
    %616 = arith.addf %613, %615 : vector<8x128xf32>
    %617 = arith.addf %498, %616 : vector<8x128xf32>
    %c72 = arith.constant 72 : index
    %618 = memref.load %arg0[%c72] : memref<84xf32, #tpu.memory_space<smem>>
    %c73 = arith.constant 73 : index
    %619 = memref.load %arg0[%c73] : memref<84xf32, #tpu.memory_space<smem>>
    %c76 = arith.constant 76 : index
    %620 = memref.load %arg0[%c76] : memref<84xf32, #tpu.memory_space<smem>>
    %621 = vector.extract_strided_slice %601 {offsets = [16, 0], sizes = [8, 128], strides = [1, 1]} : vector<32x128xf32> to vector<8x128xf32>
    %622 = vector.extract_strided_slice %601 {offsets = [24, 0], sizes = [8, 128], strides = [1, 1]} : vector<32x128xf32> to vector<8x128xf32>
    %623 = vector.broadcast %618 : f32 to vector<8x128xf32>
    %624 = arith.mulf %623, %573 : vector<8x128xf32>
    %625 = vector.broadcast %619 : f32 to vector<8x128xf32>
    %626 = arith.mulf %625, %549 : vector<8x128xf32>
    %627 = arith.addf %624, %626 : vector<8x128xf32>
    %628 = arith.addf %627, %621 : vector<8x128xf32>
    %629 = arith.addf %628, %622 : vector<8x128xf32>
    %630 = vector.broadcast %620 : f32 to vector<8x128xf32>
    %631 = arith.mulf %630, %482 : vector<8x128xf32>
    %632 = arith.addf %629, %631 : vector<8x128xf32>
    %633 = arith.addf %514, %632 : vector<8x128xf32>
    %c9_i32_130 = arith.constant 9 : i32
    %634 = tpu.dynamic_rotate %617 by %c9_i32_130 dim 1 : vector<8x128xf32>, i32 -> vector<8x128xf32>
    %635 = vector.broadcast %35 : vector<1x128xf32> to vector<8x128xf32>
    %636 = arith.mulf %634, %635 : vector<8x128xf32>
    %c8_i32_131 = arith.constant 8 : i32
    %637 = tpu.dynamic_rotate %617 by %c8_i32_131 dim 1 : vector<8x128xf32>, i32 -> vector<8x128xf32>
    %638 = vector.broadcast %37 : vector<1x128xf32> to vector<8x128xf32>
    %639 = arith.mulf %637, %638 : vector<8x128xf32>
    %c7_i32_132 = arith.constant 7 : i32
    %640 = tpu.dynamic_rotate %617 by %c7_i32_132 dim 1 : vector<8x128xf32>, i32 -> vector<8x128xf32>
    %641 = vector.broadcast %39 : vector<1x128xf32> to vector<8x128xf32>
    %642 = arith.mulf %640, %641 : vector<8x128xf32>
    %c1_i32_133 = arith.constant 1 : i32
    %643 = tpu.dynamic_rotate %617 by %c1_i32_133 dim 1 : vector<8x128xf32>, i32 -> vector<8x128xf32>
    %644 = vector.broadcast %41 : vector<1x128xf32> to vector<8x128xf32>
    %645 = arith.mulf %643, %644 : vector<8x128xf32>
    %c127_i32_134 = arith.constant 127 : i32
    %646 = tpu.dynamic_rotate %617 by %c127_i32_134 dim 1 : vector<8x128xf32>, i32 -> vector<8x128xf32>
    %647 = vector.broadcast %43 : vector<1x128xf32> to vector<8x128xf32>
    %648 = arith.mulf %646, %647 : vector<8x128xf32>
    %c121_i32_135 = arith.constant 121 : i32
    %649 = tpu.dynamic_rotate %617 by %c121_i32_135 dim 1 : vector<8x128xf32>, i32 -> vector<8x128xf32>
    %650 = vector.broadcast %45 : vector<1x128xf32> to vector<8x128xf32>
    %651 = arith.mulf %649, %650 : vector<8x128xf32>
    %c120_i32_136 = arith.constant 120 : i32
    %652 = tpu.dynamic_rotate %617 by %c120_i32_136 dim 1 : vector<8x128xf32>, i32 -> vector<8x128xf32>
    %653 = vector.broadcast %47 : vector<1x128xf32> to vector<8x128xf32>
    %654 = arith.mulf %652, %653 : vector<8x128xf32>
    %c119_i32_137 = arith.constant 119 : i32
    %655 = tpu.dynamic_rotate %617 by %c119_i32_137 dim 1 : vector<8x128xf32>, i32 -> vector<8x128xf32>
    %656 = vector.broadcast %49 : vector<1x128xf32> to vector<8x128xf32>
    %657 = arith.mulf %655, %656 : vector<8x128xf32>
    %658 = tpu.concatenate %636, %639, %642, %645, %617, %648, %651, %654, %657 in 0 : vector<8x128xf32>, vector<8x128xf32>, vector<8x128xf32>, vector<8x128xf32>, vector<8x128xf32>, vector<8x128xf32>, vector<8x128xf32>, vector<8x128xf32>, vector<8x128xf32> -> vector<72x128xf32>
    %659 = arith.addf %636, %639 : vector<8x128xf32>
    %660 = arith.addf %659, %642 : vector<8x128xf32>
    %661 = arith.addf %660, %645 : vector<8x128xf32>
    %662 = arith.addf %661, %617 : vector<8x128xf32>
    %663 = arith.addf %662, %648 : vector<8x128xf32>
    %664 = arith.addf %663, %651 : vector<8x128xf32>
    %665 = arith.addf %664, %654 : vector<8x128xf32>
    %666 = arith.addf %665, %657 : vector<8x128xf32>
    %cst_138 = arith.constant 0.111111112 : f32
    %667 = vector.broadcast %cst_138 : f32 to vector<8x128xf32>
    %668 = arith.mulf %666, %667 : vector<8x128xf32>
    %669 = vector.broadcast %53 : vector<1x128xf32> to vector<8x128xf32>
    %670 = arith.addf %636, %669 : vector<8x128xf32>
    %671 = arith.maximumf %617, %670 : vector<8x128xf32>
    %672 = vector.broadcast %57 : vector<1x128xf32> to vector<8x128xf32>
    %673 = arith.addf %639, %672 : vector<8x128xf32>
    %674 = arith.maximumf %671, %673 : vector<8x128xf32>
    %675 = vector.broadcast %61 : vector<1x128xf32> to vector<8x128xf32>
    %676 = arith.addf %642, %675 : vector<8x128xf32>
    %677 = arith.maximumf %674, %676 : vector<8x128xf32>
    %678 = vector.broadcast %65 : vector<1x128xf32> to vector<8x128xf32>
    %679 = arith.addf %645, %678 : vector<8x128xf32>
    %680 = arith.maximumf %677, %679 : vector<8x128xf32>
    %681 = vector.broadcast %69 : vector<1x128xf32> to vector<8x128xf32>
    %682 = arith.addf %648, %681 : vector<8x128xf32>
    %683 = arith.maximumf %680, %682 : vector<8x128xf32>
    %684 = vector.broadcast %73 : vector<1x128xf32> to vector<8x128xf32>
    %685 = arith.addf %651, %684 : vector<8x128xf32>
    %686 = arith.maximumf %683, %685 : vector<8x128xf32>
    %687 = vector.broadcast %77 : vector<1x128xf32> to vector<8x128xf32>
    %688 = arith.addf %654, %687 : vector<8x128xf32>
    %689 = arith.maximumf %686, %688 : vector<8x128xf32>
    %690 = vector.broadcast %81 : vector<1x128xf32> to vector<8x128xf32>
    %691 = arith.addf %657, %690 : vector<8x128xf32>
    %692 = arith.maximumf %689, %691 : vector<8x128xf32>
    %c208 = arith.constant 208 : index
    %c0_139 = arith.constant 0 : index
    %693 = vector.load %arg7[%c208, %c0_139] : memref<224x72xf32, #tpu.memory_space<vmem>>, vector<16x72xf32>
    %cst_140 = arith.constant dense<0.000000e+00> : vector<16x128xf32>
    %694 = tpu.matmul %693, %658, %cst_140 {dimension_numbers = #tpu.dot_dimension_numbers<[1], [0], [0], [1], [0, 0, 1, 1], [], []>} : vector<16x72xf32>, vector<72x128xf32>, vector<16x128xf32> -> vector<16x128xf32>
    %c208_141 = arith.constant 208 : index
    %c0_142 = arith.constant 0 : index
    %695 = vector.load %arg8[%c208_141, %c0_142] : memref<224x1xf32, #tpu.memory_space<vmem>>, vector<16x1xf32>
    %c208_143 = arith.constant 208 : index
    %c0_144 = arith.constant 0 : index
    %696 = vector.load %arg9[%c208_143, %c0_144] : memref<224x1xf32, #tpu.memory_space<vmem>>, vector<16x1xf32>
    %cst_145 = arith.constant dense<0.000000e+00> : vector<16xf32>
    %697 = vector.multi_reduction <add>, %694, %cst_145 [1] : vector<16x128xf32> to vector<16xf32>
    %698 = vector.shape_cast %697 : vector<16xf32> to vector<16x1xf32>
    %cst_146 = arith.constant 1.280000e+02 : f32
    %699 = vector.broadcast %cst_146 : f32 to vector<16x1xf32>
    %700 = arith.divf %698, %699 : vector<16x1xf32>
    %701 = vector.broadcast %700 : vector<16x1xf32> to vector<16x128xf32>
    %702 = arith.subf %694, %701 : vector<16x128xf32>
    %703 = arith.mulf %702, %702 : vector<16x128xf32>
    %cst_147 = arith.constant dense<0.000000e+00> : vector<16xf32>
    %704 = vector.multi_reduction <add>, %703, %cst_147 [1] : vector<16x128xf32> to vector<16xf32>
    %705 = vector.shape_cast %704 : vector<16xf32> to vector<16x1xf32>
    %cst_148 = arith.constant 1.280000e+02 : f32
    %706 = vector.broadcast %cst_148 : f32 to vector<16x1xf32>
    %707 = arith.divf %705, %706 : vector<16x1xf32>
    %708 = vector.broadcast %700 : vector<16x1xf32> to vector<16x128xf32>
    %709 = arith.subf %694, %708 : vector<16x128xf32>
    %cst_149 = arith.constant 9.99999974E-6 : f32
    %710 = vector.broadcast %cst_149 : f32 to vector<16x1xf32>
    %711 = arith.addf %707, %710 : vector<16x1xf32>
    %712 = math.rsqrt %711 : vector<16x1xf32>
    %713 = vector.broadcast %712 : vector<16x1xf32> to vector<16x128xf32>
    %714 = arith.mulf %709, %713 : vector<16x128xf32>
    %715 = vector.broadcast %695 : vector<16x1xf32> to vector<16x128xf32>
    %716 = arith.mulf %714, %715 : vector<16x128xf32>
    %717 = vector.broadcast %696 : vector<16x1xf32> to vector<16x128xf32>
    %718 = arith.addf %716, %717 : vector<16x128xf32>
    %cst_150 = arith.constant 0.000000e+00 : f32
    %719 = vector.broadcast %cst_150 : f32 to vector<16x128xf32>
    %720 = arith.maximumf %718, %719 : vector<16x128xf32>
    %c78 = arith.constant 78 : index
    %721 = memref.load %arg0[%c78] : memref<84xf32, #tpu.memory_space<smem>>
    %c79 = arith.constant 79 : index
    %722 = memref.load %arg0[%c79] : memref<84xf32, #tpu.memory_space<smem>>
    %c82 = arith.constant 82 : index
    %723 = memref.load %arg0[%c82] : memref<84xf32, #tpu.memory_space<smem>>
    %724 = vector.extract_strided_slice %720 {offsets = [0, 0], sizes = [8, 128], strides = [1, 1]} : vector<16x128xf32> to vector<8x128xf32>
    %725 = vector.extract_strided_slice %720 {offsets = [8, 0], sizes = [8, 128], strides = [1, 1]} : vector<16x128xf32> to vector<8x128xf32>
    %726 = vector.broadcast %721 : f32 to vector<8x128xf32>
    %727 = arith.mulf %726, %692 : vector<8x128xf32>
    %728 = vector.broadcast %722 : f32 to vector<8x128xf32>
    %729 = arith.mulf %728, %668 : vector<8x128xf32>
    %730 = arith.addf %727, %729 : vector<8x128xf32>
    %731 = arith.addf %730, %724 : vector<8x128xf32>
    %732 = arith.addf %731, %725 : vector<8x128xf32>
    %733 = vector.broadcast %723 : f32 to vector<8x128xf32>
    %734 = arith.mulf %733, %617 : vector<8x128xf32>
    %735 = arith.addf %732, %734 : vector<8x128xf32>
    %736 = arith.addf %633, %735 : vector<8x128xf32>
    %c0_151 = arith.constant 0 : index
    %c0_152 = arith.constant 0 : index
    %737 = vector.load %arg10[%c0_151, %c0_152] : memref<8x128xf32, #tpu.memory_space<vmem>>, vector<8x128xf32>
    tpu.vector_store %arg10[%c0_151, %c0_152], %736 {strides = array<i32>} : memref<8x128xf32, #tpu.memory_space<vmem>>, vector<8x128xf32>,
    return
  }
}

</mosaic_0001>

<bundles_post_ra>
// kernel: cell_forward.1
= control target key start
LH: loop header
LB: loop body
LE: loop exit
PB: predicated region body
PF: predicated region fallthrough
CT: control target
= control target key end

     0   :  { %15 = vsyncpa [#allocation3], 0  ;;  %s3470_s0 = inlined_call_operand.vmem [shape: f32[84], index: 0, kind: input, shape index: {}]   ;;  %s3471_s1 = inlined_call_operand.vmem [shape: f32[8,128], index: 1, kind: input, shape index: {}]   ;;  %s3472_s2 = inlined_call_operand.vmem [shape: f32[9,1,128], index: 2, kind: input, shape index: {}]   ;;  %s3473_s3 = inlined_call_operand.vmem [shape: f32[16,8], index: 3, kind: input, shape index: {}]   ;;  %s3474_s4 = inlined_call_operand.vmem [shape: f32[16,1], index: 4, kind: input, shape index: {}]   ;;  %s3475_s5 = inlined_call_operand.vmem [shape: f32[16,1], index: 5, kind: input, shape index: {}]   ;;  %s3476_s6 = inlined_call_operand.vmem [shape: f32[16,1], index: 6, kind: input, shape index: {}]   ;;  %s3477_s7 = inlined_call_operand.vmem [shape: f32[224,72], index: 7, kind: input, shape index: {}]   ;;  %s3478_s8 = inlined_call_operand.vmem [shape: f32[224,1], index: 8, kind: input, shape index: {}]   ;;  %s3479_s9 = inlined_call_operand.vmem [shape: f32[224,1], index: 9, kind: input, shape index: {}]   ;;  %s3480_s10 = inlined_call_operand.vmem [shape: f32[8,128], index: 10, kind: output, shape index: {}]  }
   0x1   :  { %s22_s15 = sshll.u32 %s3470_s0, 4  ;;  %s23_s15 = int_to_ptr.vmem [resolvable:$true] %s22_s15 }
   0x2   :  { %s2444_s16 = scalar_lea.vmem %s23_s15, 16  ;;  %p2449_p1 = scmp.lt.s32.totalorder %s23_s15, %s23_s15 }
   0x3   :  { %p2445_p0 = scmp.ne.s32.totalorder %s23_s15, %s2444_s16  ;;  %p2450_p2 = scmp.lt.s32.totalorder %s2444_s16, %s2444_s16 }
   0x5   :  { %p2451_p3 = por %p2450_p2, %p2449_p1 }
   0x7   :  { %p2452_p4 = pnand %p2451_p3, %p2445_p0 }
   0x9   :  { %2455 = shalt.err (!%p2452_p4)
}
   0xa   :  { %s2458_s17 = smov [#allocation2]  }
   0xb   :  { %25 = dma.vmem_to_smem %s23_s15, 16, %s2458_s17, [#allocation3]  }
   0xc   :  { %2456 = dma.done.wait [#allocation3], 16  }
   0xd   :  { %2457 = vsyncadd [#allocation3], 4294967280 }
   0xe   :  { %47 = sfence }
   0xf   :  { %v48_v0 = vld [vmem:[%s3471_s1] sm:$0xff]  ;;  %vm64_vm0 = vcmask 64512   ;;  %v2459_v3 = vmov 0   ;;  %v51_v5 = vld [vmem:[%s3473_s3 + $0x8] sm:$0xff]  ;;  %s2462_s12 = smov 1   ;;  %s2463_s13 = smov 120   ;;  %v231_v45 = vlaneseq }
  0x10   :  { %v50_v1 = vld [vmem:[%s3473_s3] sm:$0xff]  ;;  %v49_v2 = vmax.f32 %v48_v0, 0.0  ;;  %2382 = vset.pattern.permute.xlu0 %v2459_v3  ;;  %2383 = vset.pattern.permute.xlu1 %v2459_v3  ;;  %v53_v6 = vld [vmem:[%s3474_s4 + $0x8] sm:$0xff]  ;;  %s2464_s14 = smov 7   ;;  %s2465_s15 = smov 121   ;;  %vm381_vm1 = vcmask 588800  }
  0x11   :  { %2237 = vmatprep.mubr.msk.f32.mxu0 %vm64_vm0, %v50_v1  ;;  %v52_v4 = vld [vmem:[%s3474_s4] sm:$0xff]  ;;  %v147_v22 = vld [vmem:[%s3475_s5 + $0x8] sm:$0xff]  ;;  %s2466_s16 = smov 8   ;;  %s2467_s17 = smov 9   ;;  %v232_v46 = vshrl.u32 %v231_v45, 7 }
  0x12   :  { %56 = vperm.xlu0 %2382, %v52_v4   ;;  %2235 = vmatprep.subr.mxu0 %v49_v2  ;;  %v146_v21 = vld [vmem:[%s3475_s5] sm:$0xff]  ;;  %v149_v24 = vld [vmem:[%s3476_s6 + $0x8] sm:$0xff]  ;;  %s2460_s5 = smov 119   ;;  %s2721_s20 = sld [smem:[#allocation2 + $0x1]] }
  0x13   :  { %2236 = vmatpush3.msra.mxu0 %v49_v2  ;;  %v148_v23 = vld [vmem:[%s3476_s6] sm:$0xff]  ;;  %s2461_s6 = smov 127   ;;  %v2597_v47 = vsub.s32 0, %v232_v46  ;;  %v2602_v48 = vld [vmem:[%s3472_s2 + $0x8] sm:$0x1]  ;;  %s2727_s21 = sld [smem:[#allocation2 + $0xc]] }
  0x14   :  { %2238 = vmatmul.mubr.msk.f32.vlgmr.msra.gmra.mxu0 %vm64_vm0, %v51_v5  ;;  %v373_v43 = vld [vmem:[%s3477_s7] sm:$0xff]  ;;  %s2729_s0 = sld [smem:[#allocation2 + $0xd]] }
  0x15   :  { %v820_v44 = vld [vmem:[%s3477_s7 + $0x40] sm:$0xff]  ;;  %2258 = vmatprep.mubr.msk.f32.mxu1 %vm381_vm1, %v373_v43  ;;  %v2606_v49 = vrot.slane %v2602_v48, %v2597_v47  ;;  %s2734_s22 = sld [smem:[#allocation2 + $0x1e]] }
  0x16   :  { %61 = vperm.xlu0 %2382, %v53_v6   ;;  %2288 = vmatprep.mubr.msk.f32.mxu0 %vm381_vm1, %v820_v44  ;;  %v2080_v54 = vld [vmem:[%s3472_s2 + $0x7] sm:$0x1]  ;;  %v2079_v59 = vld [vmem:[%s3472_s2 + $0x6] sm:$0x1]  ;;  %v197_v60 = vld [vmem:[%s3472_s2] sm:$0x1] }
  0x17   :  { %v2622_v56 = vrot.slane %v2080_v54, %v2597_v47  ;;  %v2636_v62 = vrot.slane %v2079_v59, %v2597_v47  ;;  %v2075_v63 = vld [vmem:[%s3472_s2 + $0x1] sm:$0x1]  ;;  %v2082_v0 = vadd.f32 -1.0, %v197_v60  ;;  %v2076_v1 = vld [vmem:[%s3472_s2 + $0x2] sm:$0x1]  ;;  %s2736_s23 = sld [smem:[#allocation2 + $0x1f]] }
  0x18   :  { %v2077_v4 = vld [vmem:[%s3472_s2 + $0x3] sm:$0x1]  ;;  %v2083_v6 = vadd.f32 -1.0, %v2075_v63  ;;  %s2742_s24 = sld [smem:[#allocation2 + $0x36]] }
  0x19   :  { %s2750_s1 = sld [smem:[#allocation2 + $0x37]] }
  0x1a   :  { %s2789_s27 = sld [smem:[#allocation2 + $0x6]] }
  0x1b   :  { %s2800_s28 = sld [smem:[#allocation2 + $0x7]] }
  0x1c   :  { %s2802_s29 = sld [smem:[#allocation2 + $0x12]] }
  0x1d   :  { %s2809_s30 = sld [smem:[#allocation2 + $0x13]] }
  0x1e   :  { %s2811_s11 = sld [smem:[#allocation2 + $0x24]] }
  0x1f   :  { %s2124_s18 = sld [smem:[#allocation2 + $0x25]] }
  0x20   :  { %s2126_s19 = sld [smem:[#allocation2 + $0x3c]] }
  0x21   :  { %s2128_s25 = sld [smem:[#allocation2 + $0x40]] }
  0x22   :  { %s2143_s3 = sld [smem:[#allocation2 + $0x46]] }
  0x23   :  { %s2153_s4 = sld [smem:[#allocation2 + $0x4c]] }
  0x8d   :  { %v57_v7 = vpop.permute.xlu0 %56 }
  0x91   :  { %v62_v11 = vpop.permute.xlu0 %61 }
  0xd4   :  { %v2239_v8 = vpop.f32.mrf.mxu0 }
  0xd5   :  { %v143_v12 = vadd.f32 %v2239_v8, %v62_v11  ;;  %v2085_v11 = vadd.f32 -1.0, %v2077_v4 }
  0xd6   :  { %v137_v9 = vpop.f32.mrf.mxu0 }
  0xd7   :  { %v138_v10 = vadd.f32 %v137_v9, %v57_v7  ;;  %v2078_v7 = vld [vmem:[%s3472_s2 + $0x5] sm:$0x1]  ;;  %v2084_v9 = vadd.f32 -1.0, %v2076_v1  ;;  %s2716_s2 = sld [smem:[#allocation2]] }
  0xd8   :  { %v2656_v8 = vrot.slane %v2078_v7, %v2597_v47 }
  0xd9   :  { %150 = vadd.xlane.f32.xlu1 %v138_v10 }
  0xdd   :  { %152 = vadd.xlane.f32.xlu1 %v143_v12 }
 0x162   :  { %v151_v13 = vpop.xlane.xlu1 %150 }
 0x163   :  { %v155_v14 = vmul.f32 0.0078125, %v151_v13 }
 0x165   :  { %v157_v15 = vsub.f32 %v138_v10, %v155_v14  ;;  %v213_v10 = vmul.f32 1e+30, %v2082_v0  ;;  %v215_v14 = vmul.f32 1e+30, %v2083_v6 }
 0x166   :  { %v153_v16 = vpop.xlane.xlu1 %152 }
 0x167   :  { %v156_v17 = vmul.f32 0.0078125, %v153_v16  ;;  %v159_v18 = vmul.f32 %v157_v15, %v157_v15 }
 0x169   :  { %161 = vadd.xlane.f32.xlu0 %v159_v18  ;;  %v158_v19 = vsub.f32 %v143_v12, %v156_v17  ;;  %v2667_v17 = vrot.slane %v197_v60, %v2597_v47  ;;  %v2086_v18 = vadd.f32 -1.0, %v2078_v7 }
 0x16b   :  { %v160_v20 = vmul.f32 %v158_v19, %v158_v19 }
 0x16d   :  { %163 = vadd.xlane.f32.xlu1 %v160_v20  ;;  %v217_v20 = vmul.f32 1e+30, %v2084_v9 }
 0x17e   :  { %175 = vperm.xlu1 %2383, %v146_v21   ;;  %v2673_v21 = vrot.slane %v2076_v1, %v2597_v47 }
 0x182   :  { %180 = vperm.xlu1 %2383, %v147_v22   ;;  %v2677_v22 = vrot.slane %v213_v10, %v2597_v47 }
 0x186   :  { %187 = vperm.xlu1 %2383, %v148_v23   ;;  %v219_v23 = vmul.f32 1e+30, %v2085_v11 }
 0x18a   :  { %192 = vperm.xlu1 %2383, %v149_v24  }
 0x1f2   :  { %v162_v25 = vpop.xlane.xlu0 %161 }
 0x1f3   :  { %v165_v26 = vmul.f32 0.0078125, %v162_v25 }
 0x1f5   :  { %v167_v27 = vadd.f32 1e-05, %v165_v26  ;;  %v2681_v26 = vrot.slane %v215_v14, %v2597_v47 }
 0x1f6   :  { %v164_v28 = vpop.xlane.xlu1 %163 }
 0x1f7   :  { %2384 = vrsqrt.f32 %v167_v27  ;;  %v166_v29 = vmul.f32 0.0078125, %v164_v28 }
 0x1f9   :  { %v168_v30 = vadd.f32 1e-05, %v166_v29 }
 0x1fa   :  { %v176_v31 = vpop.permute.xlu1 %175 }
 0x1fb   :  { %2386 = vrsqrt.f32 %v168_v30  ;;  %v221_v30 = vmul.f32 1e+30, %v2086_v18 }
 0x1fe   :  { %v181_v32 = vpop.permute.xlu1 %180 }
 0x202   :  { %v188_v35 = vpop.permute.xlu1 %187 }
 0x204   :  { %v2385_v33 = vpop.eup %2384 }
 0x205   :  { %v171_v34 = vmul.f32 %v2385_v33, %v157_v15  ;;  %v2661_v15 = vrot.slane %v2075_v63, %v2597_v47 }
 0x206   :  { %v193_v41 = vpop.permute.xlu1 %192 }
 0x207   :  { %v183_v36 = vmul.f32 %v176_v31, %v171_v34  ;;  %v2087_v31 = vadd.f32 -1.0, %v2079_v59 }
 0x208   :  { %v2387_v37 = vpop.eup %2386 }
 0x209   :  { %v172_v38 = vmul.f32 %v2387_v37, %v158_v19  ;;  %v2553_v39 = vadd.f32 %v188_v35, %v183_v36  ;;  %v2670_v19 = vrot.slane %v2077_v4, %v2597_v47  ;;  %v2089_v36 = vadd.f32 -1.0, %v2602_v48 }
 0x20a   :  { %v2707_v37 = vrot.slane %v219_v23, %v2597_v47  ;;  %v2719_v48 = vrot.slane %v221_v30, %v2597_v47 }
 0x20b   :  { %v184_v40 = vmul.f32 %v181_v32, %v172_v38  ;;  %291 = vrot.lane.b32.xlu0 %v2553_v39, %s2460_s5  ;;  %v2695_v32 = vrot.slane %v217_v20, %v2597_v47  ;;  %v227_v59 = vmul.f32 1e+30, %v2089_v36  ;;  %v724_v36 = vstv %s2721_s20  ;;  %s2951_s20 = sld [smem:[#allocation2 + $0x18]] }
 0x20d   :  { %v2557_v42 = vadd.f32 %v193_v41, %v184_v40  ;;  %v2088_v40 = vadd.f32 -1.0, %v2080_v54  ;;  %v2745_v9 = vrot.slane %v227_v59, %v2597_v47  ;;  %v374_v59 = vld [vmem:[%s3477_s7 + $0x8] sm:$0xff] }
 0x20f   :  { %264 = vrot.lane.b32.xlu0 %v2553_v39, %s2461_s6  ;;  %792 = vrot.lane.b32.xlu1 %v2557_v42, %s2460_s5  ;;  %v225_v60 = vmul.f32 1e+30, %v2088_v40  ;;  %v735_v40 = vstv %s2727_s21  ;;  %s2954_s21 = sld [smem:[#allocation2 + $0x19]] }
 0x211   :  { %v2748_v10 = vrot.slane %v225_v60, %v2597_v47 }
 0x213   :  { %255 = vrot.lane.b32.xlu0 %v2553_v39, %s2462_s12  ;;  %789 = vrot.lane.b32.xlu1 %v2557_v42, %s2463_s13 }
 0x217   :  { %246 = vrot.lane.b32.xlu0 %v2553_v39, %s2464_s14  ;;  %786 = vrot.lane.b32.xlu1 %v2557_v42, %s2465_s15 }
 0x21b   :  { %237 = vrot.lane.b32.xlu0 %v2553_v39, %s2466_s16  ;;  %783 = vrot.lane.b32.xlu1 %v2557_v42, %s2461_s6 }
 0x21f   :  { %228 = vrot.lane.b32.xlu0 %v2553_v39, %s2467_s17  ;;  %780 = vrot.lane.b32.xlu1 %v2557_v42, %s2462_s12 }
 0x223   :  { %282 = vrot.lane.b32.xlu1 %v2553_v39, %s2463_s13 }
 0x227   :  { %273 = vrot.lane.b32.xlu1 %v2553_v39, %s2465_s15 }
 0x22b   :  { %777 = vrot.lane.b32.xlu1 %v2557_v42, %s2464_s14 }
 0x22f   :  { %774 = vrot.lane.b32.xlu1 %v2557_v42, %s2466_s16 }
 0x233   :  { %771 = vrot.lane.b32.xlu1 %v2557_v42, %s2467_s17 }
 0x27d   :  { %v292_v50 = vpop.permute.xlu0 %291 }
 0x27e   :  { %v2609_v51 = vmul.f32 %v2606_v49, %v292_v50  ;;  %v223_v50 = vmul.f32 1e+30, %v2087_v31 }
 0x280   :  { %2240 = vmatprep.subr.mxu1 %v2609_v51  ;;  %v2740_v4 = vrot.slane %v223_v50, %v2597_v47  ;;  %v371_v30 = vadd.f32 %v2745_v9, %v2609_v51  ;;  %v761_v50 = vstv %s2742_s24  ;;  %s2099_s24 = sld [smem:[#allocation2 + $0x4]] }
 0x281   :  { %2241 = vmatpush3.msra.mxu1 %v2609_v51  ;;  %v2613_v52 = vpop.permute.xlu0 %264  ;;  %v793_v53 = vpop.permute.xlu1 %792 }
 0x282   :  { %v2619_v55 = vmul.f32 %v793_v53, %v2606_v49  ;;  %v272_v53 = vmul.f32 %v2656_v8, %v2613_v52 }
 0x284   :  { %2270 = vmatprep.subr.mxu0 %v2619_v55 }
 0x285   :  { %v256_v57 = vpop.permute.xlu0 %255  ;;  %2271 = vmatpush3.msra.mxu0 %v2619_v55  ;;  %v790_v58 = vpop.permute.xlu1 %789 }
 0x286   :  { %v2633_v61 = vmul.f32 %v790_v58, %v2622_v56  ;;  %v263_v38 = vmul.f32 %v2670_v19, %v256_v57 }
 0x288   :  { %2272 = vmatprep.subr.mxu0 %v2633_v61  ;;  %v339_v0 = vadd.f32 %v2707_v37, %v263_v38 }
 0x289   :  { %v247_v2 = vpop.permute.xlu0 %246  ;;  %2273 = vmatpush3.msra.mxu0 %v2633_v61  ;;  %v787_v3 = vpop.permute.xlu1 %786 }
 0x28a   :  { %v2650_v5 = vmul.f32 %v787_v3, %v2636_v62  ;;  %v2698_v33 = vmul.f32 %v2673_v21, %v247_v2  ;;  %v347_v3 = vadd.f32 %v2719_v48, %v272_v53 }
 0x28c   :  { %2274 = vmatprep.subr.mxu0 %v2650_v5  ;;  %v331_v54 = vadd.f32 %v2695_v32, %v2698_v33 }
 0x28d   :  { %v238_v12 = vpop.permute.xlu0 %237  ;;  %2275 = vmatpush3.msra.mxu0 %v2650_v5  ;;  %v784_v13 = vpop.permute.xlu1 %783 }
 0x28e   :  { %v2664_v16 = vmul.f32 %v784_v13, %v2656_v8  ;;  %v2684_v27 = vmul.f32 %v2661_v15, %v238_v12 }
 0x290   :  { %2276 = vmatprep.subr.mxu0 %v2664_v16  ;;  %v323_v43 = vadd.f32 %v2681_v26, %v2684_v27 }
 0x291   :  { %v229_v24 = vpop.permute.xlu0 %228  ;;  %2277 = vmatpush3.msra.mxu0 %v2664_v16  ;;  %v781_v25 = vpop.permute.xlu1 %780 }
 0x292   :  { %v2687_v28 = vmul.f32 %v2667_v17, %v229_v24  ;;  %v2690_v29 = vmul.f32 %v781_v25, %v2670_v19  ;;  %2278 = vmatprep.subr.mxu0 %v2557_v42  ;;  %v722_v25 = vstv %s2716_s2  ;;  %s2127_s2 = sld [smem:[#allocation2 + $0x3d]] }
 0x293   :  { %2279 = vmatpush3.msra.mxu0 %v2557_v42 }
 0x294   :  { %v300_v34 = vadd.f32 %v2684_v27, %v2687_v28  ;;  %v315_v35 = vadd.f32 %v2677_v22, %v2687_v28  ;;  %2280 = vmatprep.subr.mxu0 %v2690_v29 }
 0x295   :  { %2281 = vmatpush3.msra.mxu0 %v2690_v29  ;;  %v283_v41 = vpop.permute.xlu1 %282 }
 0x296   :  { %v301_v44 = vadd.f32 %v300_v34, %v2698_v33  ;;  %v316_v45 = vmax.f32 %v2553_v39, %v315_v35  ;;  %v290_v46 = vmul.f32 %v2622_v56, %v283_v41  ;;  %v737_v41 = vstv %s2729_s0  ;;  %s2138_s0 = sld [smem:[#allocation2 + $0x2a]] }
 0x298   :  { %v302_v57 = vadd.f32 %v301_v44, %v263_v38  ;;  %v324_v58 = vmax.f32 %v316_v45, %v323_v43  ;;  %2242 = vmatprep.subr.mxu1 %v290_v46  ;;  %v363_v20 = vadd.f32 %v2748_v10, %v290_v46  ;;  %v748_v43 = vstv %s2734_s22  ;;  %s2139_s22 = sld [smem:[#allocation2 + $0x2b]] }
 0x299   :  { %2243 = vmatpush3.msra.mxu1 %v290_v46  ;;  %v274_v63 = vpop.permute.xlu1 %273 }
 0x29a   :  { %v332_v1 = vmax.f32 %v324_v58, %v331_v54  ;;  %v303_v2 = vadd.f32 %v302_v57, %v2553_v39  ;;  %v281_v52 = vmul.f32 %v2636_v62, %v274_v63 }
 0x29c   :  { %v304_v6 = vadd.f32 %v303_v2, %v272_v53  ;;  %v340_v7 = vmax.f32 %v332_v1, %v339_v0  ;;  %2244 = vmatprep.subr.mxu1 %v281_v52  ;;  %v355_v14 = vadd.f32 %v2740_v4, %v281_v52 }
 0x29d   :  { %2245 = vmatpush3.msra.mxu1 %v281_v52  ;;  %v778_v11 = vpop.permute.xlu1 %777 }
 0x29e   :  { %v348_v12 = vmax.f32 %v340_v7, %v347_v3  ;;  %v305_v13 = vadd.f32 %v304_v6, %v281_v52  ;;  %v2754_v18 = vmul.f32 %v778_v11, %v2673_v21  ;;  %2246 = vmatprep.subr.mxu1 %v272_v53 }
 0x29f   :  { %2247 = vmatpush3.msra.mxu1 %v272_v53  ;;  %v763_v53 = vstv %s2750_s1  ;;  %s2119_s1 = sld [smem:[#allocation2 + $0xa]] }
 0x2a0   :  { %v306_v47 = vadd.f32 %v305_v13, %v290_v46  ;;  %v356_v23 = vmax.f32 %v348_v12, %v355_v14  ;;  %2248 = vmatprep.subr.mxu1 %v2553_v39  ;;  %2282 = vmatprep.subr.mxu0 %v2754_v18  ;;  %v750_v46 = vstv %s2736_s23  ;;  %v808_v14 = vadd.f32 %v2754_v18, %v2695_v32  ;;  %s2141_s23 = sld [smem:[#allocation2 + $0x42]] }
 0x2a1   :  { %2249 = vmatpush3.msra.mxu1 %v2553_v39  ;;  %2283 = vmatpush3.msra.mxu0 %v2754_v18  ;;  %v775_v24 = vpop.permute.xlu1 %774 }
 0x2a2   :  { %v307_v31 = vadd.f32 %v306_v47, %v2609_v51  ;;  %v364_v34 = vmax.f32 %v356_v23, %v363_v20  ;;  %v776_v35 = vmul.f32 %v775_v24, %v2661_v15  ;;  %2250 = vmatprep.subr.mxu1 %v263_v38  ;;  %v810_v23 = vadd.f32 %v2690_v29, %v2707_v37 }
 0x2a3   :  { %2251 = vmatpush3.msra.mxu1 %v263_v38 }
 0x2a4   :  { %v308_v44 = vmul.f32 0.11111111, %v307_v31  ;;  %v372_v45 = vmax.f32 %v364_v34, %v371_v30  ;;  %2252 = vmatprep.subr.mxu1 %v2698_v33  ;;  %2284 = vmatprep.subr.mxu0 %v776_v35  ;;  %v806_v11 = vadd.f32 %v776_v35, %v2681_v26  ;;  %v814_v34 = vadd.f32 %v2650_v5, %v2740_v4 }
 0x2a5   :  { %2253 = vmatpush3.msra.mxu1 %v2698_v33  ;;  %2285 = vmatpush3.msra.mxu0 %v776_v35  ;;  %v772_v51 = vpop.permute.xlu1 %771  ;;  %v821_v33 = vld [vmem:[%s3477_s7 + $0x48] sm:$0xff] }
 0x2a6   :  { %v773_v54 = vmul.f32 %v772_v51, %v2667_v17  ;;  %2254 = vmatprep.subr.mxu1 %v2684_v27  ;;  %v723_v38 = vmul.f32 %v722_v25, %v372_v45  ;;  %v725_v57 = vmul.f32 %v724_v36, %v308_v44  ;;  %v736_v58 = vmul.f32 %v735_v40, %v372_v45 }
 0x2a7   :  { %2255 = vmatpush3.msra.mxu1 %v2684_v27  ;;  %v738_v60 = vmul.f32 %v737_v41, %v308_v44  ;;  %v749_v63 = vmul.f32 %v748_v43, %v372_v45  ;;  %v751_v0 = vmul.f32 %v750_v46, %v308_v44  ;;  %v762_v1 = vmul.f32 %v761_v50, %v372_v45 }
 0x2a8   :  { %v795_v2 = vadd.f32 %v776_v35, %v773_v54  ;;  %v804_v52 = vadd.f32 %v773_v54, %v2677_v22  ;;  %2256 = vmatprep.subr.mxu1 %v2687_v28  ;;  %2286 = vmatprep.subr.mxu0 %v773_v54  ;;  %v2786_v3 = vadd.f32 %v725_v57, %v723_v38  ;;  %v1168_v43 = vstv %s2789_s27  ;;  %s2148_s27 = sld [smem:[#allocation2 + $0x30]] }
 0x2a9   :  { %2257 = vmatpush3.msra.mxu1 %v2687_v28  ;;  %2287 = vmatpush3.msra.mxu0 %v773_v54  ;;  %v2791_v27 = vadd.f32 %v738_v60, %v736_v58  ;;  %v2793_v6 = vadd.f32 %v751_v0, %v749_v63  ;;  %v764_v7 = vmul.f32 %v763_v53, %v308_v44  ;;  %v1170_v46 = vstv %s2800_s28  ;;  %s2149_s28 = sld [smem:[#allocation2 + $0x31]] }
 0x2aa   :  { %v796_v12 = vadd.f32 %v795_v2, %v2754_v18  ;;  %v805_v13 = vmax.f32 %v2557_v42, %v804_v52  ;;  %2259 = vmatmul.mubr.msk.f32.vlgmr.msra.gmra.mxu1 %vm381_vm1, %v374_v59  ;;  %2289 = vmatmul.mubr.msk.f32.vlgmr.msra.gmra.mxu0 %vm381_vm1, %v821_v33  ;;  %v812_v18 = vadd.f32 %v2664_v16, %v2719_v48  ;;  %v1182_v50 = vstv %s2802_s29  ;;  %s2151_s29 = sld [smem:[#allocation2 + $0x48]] }
 0x2ab   :  { %v2804_v28 = vadd.f32 %v764_v7, %v762_v1  ;;  %v816_v36 = vadd.f32 %v2633_v61, %v2748_v10  ;;  %v818_v44 = vadd.f32 %v2619_v55, %v2745_v9  ;;  %v1184_v51 = vstv %s2809_s30  ;;  %s2152_s30 = sld [smem:[#allocation2 + $0x49]] }
 0x2ac   :  { %v797_v20 = vadd.f32 %v796_v12, %v2690_v29  ;;  %v807_v47 = vmax.f32 %v805_v13, %v806_v11  ;;  %v1196_v53 = vstv %s2811_s11  ;;  %v1198_v54 = vstv %s2124_s18  ;;  %s2102_s11 = sld [smem:[#allocation2 + $0x10]] }
 0x2ad   :  { %v1210_v57 = vstv %s2126_s19  ;;  %v1212_v58 = vstv %s2127_s2  ;;  %s2122_s2 = sld [smem:[#allocation2 + $0x16]] }
 0x2ae   :  { %v798_v24 = vadd.f32 %v797_v20, %v2557_v42  ;;  %v809_v25 = vmax.f32 %v807_v47, %v808_v14  ;;  %v511_v47 = vld [vmem:[%s3478_s8] sm:$0xff] }
 0x2b0   :  { %v799_v30 = vadd.f32 %v798_v24, %v2664_v16  ;;  %v811_v31 = vmax.f32 %v809_v25, %v810_v23  ;;  %v512_v23 = vld [vmem:[%s3478_s8 + $0x8] sm:$0xff]  ;;  %v519_v24 = vld [vmem:[%s3479_s9] sm:$0xff] }
 0x2b1   :  { %v957_v25 = vld [vmem:[%s3478_s8 + $0x40] sm:$0xff] }
 0x2b2   :  { %v800_v29 = vadd.f32 %v799_v30, %v2650_v5  ;;  %v813_v35 = vmax.f32 %v811_v31, %v812_v18  ;;  %v965_v18 = vld [vmem:[%s3479_s9 + $0x40] sm:$0xff]  ;;  %v958_v30 = vld [vmem:[%s3478_s8 + $0x48] sm:$0xff]  ;;  %v375_v31 = vld [vmem:[%s3477_s7 + $0x10] sm:$0xff] }
 0x2b3   :  { %2261 = vmatprep.mubr.msk.f32.mxu1 %vm381_vm1, %v375_v31 }
 0x2b4   :  { %v801_v40 = vadd.f32 %v800_v29, %v2633_v61  ;;  %v815_v41 = vmax.f32 %v813_v35, %v814_v34  ;;  %v376_v34 = vld [vmem:[%s3477_s7 + $0x18] sm:$0xff]  ;;  %v822_v29 = vld [vmem:[%s3477_s7 + $0x50] sm:$0xff] }
 0x2b5   :  { %2262 = vmatmul.mubr.msk.f32.gmra.mxu1 %vm381_vm1, %v376_v34  ;;  %v823_v35 = vld [vmem:[%s3477_s7 + $0x58] sm:$0xff]  ;;  %2291 = vmatprep.mubr.msk.f32.mxu0 %vm381_vm1, %v822_v29 }
 0x2b6   :  { %v802_v16 = vadd.f32 %v801_v40, %v2619_v55  ;;  %v817_v45 = vmax.f32 %v815_v41, %v816_v36  ;;  %2292 = vmatmul.mubr.msk.f32.gmra.mxu0 %vm381_vm1, %v823_v35 }
 0x2b8   :  { %v803_v5 = vmul.f32 0.11111111, %v802_v16  ;;  %v819_v38 = vmax.f32 %v817_v45, %v818_v44 }
 0x2ba   :  { %v1169_v59 = vmul.f32 %v1168_v43, %v819_v38  ;;  %v1171_v33 = vmul.f32 %v1170_v46, %v803_v5  ;;  %v1183_v61 = vmul.f32 %v1182_v50, %v819_v38  ;;  %v1185_v60 = vmul.f32 %v1184_v51, %v803_v5 }
 0x2bb   :  { %v1197_v63 = vmul.f32 %v1196_v53, %v819_v38  ;;  %v1199_v0 = vmul.f32 %v1198_v54, %v803_v5  ;;  %v1211_v1 = vmul.f32 %v1210_v57, %v819_v38  ;;  %v1213_v2 = vmul.f32 %v1212_v58, %v803_v5 }
 0x2bc   :  { %v2833_v52 = vadd.f32 %v1171_v33, %v1169_v59  ;;  %v2835_v55 = vadd.f32 %v1185_v60, %v1183_v61  ;;  %v966_v59 = vld [vmem:[%s3479_s9 + $0x48] sm:$0xff] }
 0x2bd   :  { %v2837_v7 = vadd.f32 %v1199_v0, %v1197_v63  ;;  %v2839_v11 = vadd.f32 %v1213_v2, %v1211_v1  ;;  %v520_v33 = vld [vmem:[%s3479_s9 + $0x8] sm:$0xff] }
 0x36a   :  { %v2260_v12 = vpop.f32.mrf.mxu1  ;;  %v2290_v13 = vpop.f32.mrf.mxu0 }
 0x36b   :  { %529 = vadd.xlane.f32.xlu0 %v2260_v12 }
 0x36c   :  { %v918_v14 = vpop.f32.mrf.mxu0  ;;  %v472_v20 = vpop.f32.mrf.mxu1 }
 0x36d   :  { %973 = vadd.xlane.f32.xlu1 %v918_v14 }
 0x36f   :  { %527 = vadd.xlane.f32.xlu0 %v472_v20 }
 0x373   :  { %975 = vadd.xlane.f32.xlu0 %v2290_v13 }
 0x37e   :  { %617 = vperm.xlu1 %2383, %v511_v47  }
 0x382   :  { %622 = vperm.xlu1 %2383, %v512_v23  }
 0x386   :  { %665 = vperm.xlu1 %2383, %v519_v24  }
 0x389   :  { %1063 = vperm.xlu0 %2382, %v957_v25  }
 0x38a   :  { %1111 = vperm.xlu1 %2383, %v965_v18  }
 0x38d   :  { %1068 = vperm.xlu0 %2382, %v958_v30  }
 0x3f4   :  { %v530_v36 = vpop.xlane.xlu0 %529 }
 0x3f5   :  { %v544_v40 = vmul.f32 0.0078125, %v530_v36 }
 0x3f6   :  { %v974_v45 = vpop.xlane.xlu1 %973 }
 0x3f7   :  { %v552_v41 = vsub.f32 %v2260_v12, %v544_v40  ;;  %v989_v51 = vmul.f32 0.0078125, %v974_v45 }
 0x3f8   :  { %v528_v43 = vpop.xlane.xlu0 %527 }
 0x3f9   :  { %v543_v44 = vmul.f32 0.0078125, %v528_v43  ;;  %v560_v16 = vmul.f32 %v552_v41, %v552_v41  ;;  %v997_v57 = vsub.f32 %v918_v14, %v989_v51 }
 0x3fa   :  { %v618_v61 = vpop.permute.xlu1 %617 }
 0x3fb   :  { %569 = vadd.xlane.f32.xlu1 %v560_v16  ;;  %v551_v46 = vsub.f32 %v472_v20, %v543_v44  ;;  %v1005_v58 = vmul.f32 %v997_v57, %v997_v57 }
 0x3fc   :  { %v976_v50 = vpop.xlane.xlu0 %975 }
 0x3fd   :  { %v990_v53 = vmul.f32 0.0078125, %v976_v50  ;;  %v559_v54 = vmul.f32 %v551_v46, %v551_v46 }
 0x3fe   :  { %v623_v60 = vpop.permute.xlu1 %622 }
 0x3ff   :  { %567 = vadd.xlane.f32.xlu1 %v559_v54  ;;  %v998_v5 = vsub.f32 %v2290_v13, %v990_v53 }
 0x401   :  { %v1006_v38 = vmul.f32 %v998_v5, %v998_v5 }
 0x402   :  { %v666_v63 = vpop.permute.xlu1 %665 }
 0x403   :  { %1015 = vadd.xlane.f32.xlu0 %v1006_v38 }
 0x404   :  { %v1064_v1 = vpop.permute.xlu0 %1063 }
 0x406   :  { %v1112_v0 = vpop.permute.xlu1 %1111 }
 0x407   :  { %1013 = vadd.xlane.f32.xlu0 %v1005_v58 }
 0x408   :  { %v1069_v13 = vpop.permute.xlu0 %1068 }
 0x410   :  { %1116 = vperm.xlu1 %2383, %v966_v59  }
 0x41d   :  { %670 = vperm.xlu0 %2382, %v520_v33  }
 0x484   :  { %v570_v2 = vpop.xlane.xlu1 %569 }
 0x485   :  { %v584_v12 = vmul.f32 0.0078125, %v570_v2 }
 0x487   :  { %v592_v14 = vadd.f32 1e-05, %v584_v12 }
 0x488   :  { %v568_v20 = vpop.xlane.xlu1 %567 }
 0x489   :  { %v583_v47 = vmul.f32 0.0078125, %v568_v20  ;;  %2388 = vrsqrt.f32 %v592_v14  ;;  %v729_v20 = vstv %s2099_s24  ;;  %s2142_s24 = sld [smem:[#allocation2 + $0x43]] }
 0x48b   :  { %v591_v23 = vadd.f32 1e-05, %v583_v47 }
 0x48c   :  { %v1016_v24 = vpop.xlane.xlu0 %1015  ;;  %v1117_v2 = vpop.permute.xlu1 %1116 }
 0x48d   :  { %2390 = vrsqrt.f32 %v591_v23  ;;  %v1030_v25 = vmul.f32 0.0078125, %v1016_v24 }
 0x48f   :  { %v1038_v18 = vadd.f32 1e-05, %v1030_v25  ;;  %v379_v25 = vld [vmem:[%s3477_s7 + $0x30] sm:$0xff] }
 0x490   :  { %v1014_v30 = vpop.xlane.xlu0 %1013 }
 0x491   :  { %2392 = vrsqrt.f32 %v1038_v18  ;;  %v1029_v31 = vmul.f32 0.0078125, %v1014_v30  ;;  %v380_v18 = vld [vmem:[%s3477_s7 + $0x38] sm:$0xff]  ;;  %v1270_v30 = vld [vmem:[%s3477_s7 + $0x80] sm:$0xff] }
 0x493   :  { %v1037_v34 = vadd.f32 1e-05, %v1029_v31  ;;  %v2923_v31 = vpop.f32.mrf.mxu1 }
 0x495   :  { %2394 = vrsqrt.f32 %v1037_v34  ;;  %v2925_v34 = vpop.f32.mrf.mxu1 }
 0x496   :  { %v2389_v29 = vpop.eup %2388 }
 0x497   :  { %v608_v40 = vmul.f32 %v2389_v29, %v552_v41  ;;  %v2927_v29 = vpop.f32.mrf.mxu0 }
 0x498   :  { %v671_v58 = vpop.permute.xlu0 %670 }
 0x499   :  { %v656_v50 = vmul.f32 %v623_v60, %v608_v40 }
 0x49a   :  { %v2391_v35 = vpop.eup %2390 }
 0x49b   :  { %v607_v36 = vmul.f32 %v2391_v35, %v551_v46  ;;  %v704_v33 = vadd.f32 %v671_v58, %v656_v50  ;;  %v2930_v35 = vpop.f32.mrf.mxu0 }
 0x49d   :  { %v655_v43 = vmul.f32 %v618_v61, %v607_v36  ;;  %v712_v41 = vmax.f32 %v704_v33, 0.0 }
 0x49e   :  { %v2393_v44 = vpop.eup %2392 }
 0x49f   :  { %v1054_v16 = vmul.f32 %v2393_v44, %v998_v5  ;;  %v703_v45 = vadd.f32 %v666_v63, %v655_v43  ;;  %v1175_v5 = vstv %s2119_s1 }
 0x4a0   :  { %v1176_v23 = vmul.f32 %v1175_v5, %v2557_v42  ;;  %v1271_v5 = vld [vmem:[%s3477_s7 + $0x88] sm:$0xff] }
 0x4a1   :  { %v1102_v53 = vmul.f32 %v1069_v13, %v1054_v16  ;;  %v711_v38 = vmax.f32 %v703_v45, 0.0  ;;  %v730_v13 = vmul.f32 %v729_v20, %v2553_v39 }
 0x4a2   :  { %v2395_v51 = vpop.eup %2394 }
 0x4a3   :  { %v1053_v54 = vmul.f32 %v2395_v51, %v997_v57  ;;  %v1150_v12 = vadd.f32 %v1117_v2, %v1102_v53  ;;  %v727_v14 = vadd.f32 %v2786_v3, %v711_v38 }
 0x4a5   :  { %v1101_v59 = vmul.f32 %v1064_v1, %v1053_v54  ;;  %v1158_v63 = vmax.f32 %v1150_v12, 0.0  ;;  %v728_v47 = vadd.f32 %v727_v14, %v712_v41  ;;  %v377_v1 = vld [vmem:[%s3477_s7 + $0x20] sm:$0xff] }
 0x4a6   :  { %2264 = vmatprep.mubr.msk.f32.mxu1 %vm381_vm1, %v377_v1 }
 0x4a7   :  { %v1149_v46 = vadd.f32 %v1112_v0, %v1101_v59  ;;  %v731_v24 = vadd.f32 %v730_v13, %v728_v47  ;;  %v378_v0 = vld [vmem:[%s3477_s7 + $0x28] sm:$0xff] }
 0x4a8   :  { %2265 = vmatmul.mubr.msk.f32.gmra.mxu1 %vm381_vm1, %v378_v0 }
 0x4a9   :  { %v1157_v61 = vmax.f32 %v1149_v46, 0.0  ;;  %2267 = vmatprep.mubr.msk.f32.mxu1 %vm381_vm1, %v379_v25 }
 0x4ab   :  { %v1173_v60 = vadd.f32 %v2833_v52, %v1157_v61 }
 0x4ac   :  { %2268 = vmatmul.mubr.msk.f32.gmra.mxu1 %vm381_vm1, %v380_v18 }
 0x4ad   :  { %v1174_v57 = vadd.f32 %v1173_v60, %v1158_v63  ;;  %2318 = vmatprep.mubr.msk.f32.mxu1 %vm381_vm1, %v1270_v30 }
 0x4af   :  { %v1177_v3 = vadd.f32 %v1176_v23, %v1174_v57 }
 0x4b1   :  { %v2893_v52 = vadd.f32 %v1177_v3, %v731_v24 }
 0x4b3   :  { %1239 = vrot.lane.b32.xlu1 %v2893_v52, %s2463_s13  ;;  %1242 = vrot.lane.b32.xlu0 %v2893_v52, %s2460_s5 }
 0x4b7   :  { %1233 = vrot.lane.b32.xlu1 %v2893_v52, %s2461_s6  ;;  %1236 = vrot.lane.b32.xlu0 %v2893_v52, %s2465_s15 }
 0x4bb   :  { %1227 = vrot.lane.b32.xlu1 %v2893_v52, %s2464_s14  ;;  %1230 = vrot.lane.b32.xlu0 %v2893_v52, %s2462_s12 }
 0x4bf   :  { %1221 = vrot.lane.b32.xlu1 %v2893_v52, %s2467_s17  ;;  %1224 = vrot.lane.b32.xlu0 %v2893_v52, %s2466_s16 }
 0x4de   :  { %531 = vadd.xlane.f32.xlu0 %v2925_v34 }
 0x4e2   :  { %533 = vadd.xlane.f32.xlu0 %v2923_v31 }
 0x4e3   :  { %977 = vadd.xlane.f32.xlu1 %v2930_v35 }
 0x4e6   :  { %979 = vadd.xlane.f32.xlu0 %v2927_v29 }
 0x525   :  { %v1240_v36 = vpop.permute.xlu1 %1239  ;;  %v1243_v40 = vpop.permute.xlu0 %1242 }
 0x526   :  { %v1244_v43 = vmul.f32 %v1243_v40, %v2606_v49  ;;  %v1241_v44 = vmul.f32 %v1240_v36, %v2622_v56 }
 0x528   :  { %2300 = vmatprep.subr.mxu1 %v1244_v43  ;;  %v1266_v30 = vadd.f32 %v1241_v44, %v2748_v10 }
 0x529   :  { %v1234_v16 = vpop.permute.xlu1 %1233  ;;  %2301 = vmatpush3.msra.mxu1 %v1244_v43  ;;  %v1237_v45 = vpop.permute.xlu0 %1236 }
 0x52a   :  { %v1238_v50 = vmul.f32 %v1237_v45, %v2636_v62  ;;  %2302 = vmatprep.subr.mxu1 %v1241_v44  ;;  %v1235_v51 = vmul.f32 %v1234_v16, %v2656_v8  ;;  %v1268_v16 = vadd.f32 %v1244_v43, %v2745_v9 }
 0x52b   :  { %2303 = vmatpush3.msra.mxu1 %v1241_v44 }
 0x52c   :  { %2304 = vmatprep.subr.mxu1 %v1238_v50  ;;  %v1262_v1 = vadd.f32 %v1235_v51, %v2719_v48  ;;  %v1264_v0 = vadd.f32 %v1238_v50, %v2740_v4 }
 0x52d   :  { %v1228_v53 = vpop.permute.xlu1 %1227  ;;  %2305 = vmatpush3.msra.mxu1 %v1238_v50  ;;  %v1231_v54 = vpop.permute.xlu0 %1230 }
 0x52e   :  { %2306 = vmatprep.subr.mxu1 %v1235_v51  ;;  %v1232_v38 = vmul.f32 %v1231_v54, %v2670_v19  ;;  %v1229_v33 = vmul.f32 %v1228_v53, %v2673_v21  ;;  %v1548_v54 = vstv %s2951_s20 }
 0x52f   :  { %2307 = vmatpush3.msra.mxu1 %v1235_v51 }
 0x530   :  { %2308 = vmatprep.subr.mxu1 %v2893_v52  ;;  %v1258_v63 = vadd.f32 %v1229_v33, %v2695_v32  ;;  %v1260_v13 = vadd.f32 %v1232_v38, %v2707_v37 }
 0x531   :  { %v1222_v58 = vpop.permute.xlu1 %1221  ;;  %2309 = vmatpush3.msra.mxu1 %v2893_v52  ;;  %v1225_v59 = vpop.permute.xlu0 %1224 }
 0x532   :  { %v1223_v2 = vmul.f32 %v1222_v58, %v2667_v17  ;;  %v1226_v12 = vmul.f32 %v1225_v59, %v2661_v15  ;;  %2310 = vmatprep.subr.mxu1 %v1232_v38  ;;  %v1562_v58 = vstv %s2138_s0  ;;  %v1564_v59 = vstv %s2139_s22  ;;  %s2137_s0 = sld [smem:[#allocation2 + $0x1c]] }
 0x533   :  { %2311 = vmatpush3.msra.mxu1 %v1232_v38 }
 0x534   :  { %v1254_v14 = vadd.f32 %v1223_v2, %v2677_v22  ;;  %v1245_v46 = vadd.f32 %v1226_v12, %v1223_v2  ;;  %2312 = vmatprep.subr.mxu1 %v1229_v33  ;;  %v1256_v20 = vadd.f32 %v1226_v12, %v2681_v26 }
 0x535   :  { %2313 = vmatpush3.msra.mxu1 %v1229_v33 }
 0x536   :  { %v1255_v41 = vmax.f32 %v2893_v52, %v1254_v14  ;;  %v1246_v61 = vadd.f32 %v1245_v46, %v1229_v33  ;;  %2314 = vmatprep.subr.mxu1 %v1226_v12 }
 0x537   :  { %2315 = vmatpush3.msra.mxu1 %v1226_v12  ;;  %v1578_v12 = vstv %s2142_s24 }
 0x538   :  { %v1247_v47 = vadd.f32 %v1246_v61, %v1232_v38  ;;  %v1257_v60 = vmax.f32 %v1255_v41, %v1256_v20  ;;  %2316 = vmatprep.subr.mxu1 %v1223_v2  ;;  %v1550_v38 = vstv %s2954_s21  ;;  %s2150_s21 = sld [smem:[#allocation2 + $0x34]] }
 0x539   :  { %2317 = vmatpush3.msra.mxu1 %v1223_v2  ;;  %v1576_v2 = vstv %s2141_s23 }
 0x53a   :  { %v1248_v57 = vadd.f32 %v1247_v47, %v2893_v52  ;;  %v1259_v23 = vmax.f32 %v1257_v60, %v1258_v63  ;;  %2319 = vmatmul.mubr.msk.f32.vlgmr.msra.gmra.mxu1 %vm381_vm1, %v1271_v5 }
 0x53c   :  { %v1249_v24 = vadd.f32 %v1248_v57, %v1235_v51  ;;  %v1261_v3 = vmax.f32 %v1259_v23, %v1260_v13 }
 0x53e   :  { %v1250_v25 = vadd.f32 %v1249_v24, %v1238_v50  ;;  %v1263_v18 = vmax.f32 %v1261_v3, %v1262_v1 }
 0x540   :  { %v1251_v36 = vadd.f32 %v1250_v25, %v1241_v44  ;;  %v1265_v40 = vmax.f32 %v1263_v18, %v1264_v0 }
 0x542   :  { %v1252_v45 = vadd.f32 %v1251_v36, %v1244_v43  ;;  %v1267_v53 = vmax.f32 %v1265_v40, %v1266_v30 }
 0x544   :  { %v1253_v33 = vmul.f32 0.11111111, %v1252_v45  ;;  %v1269_v51 = vmax.f32 %v1267_v53, %v1268_v16 }
 0x546   :  { %v1549_v14 = vmul.f32 %v1548_v54, %v1269_v51  ;;  %v1551_v46 = vmul.f32 %v1550_v38, %v1253_v33  ;;  %v1563_v50 = vmul.f32 %v1562_v58, %v1269_v51  ;;  %v1565_v41 = vmul.f32 %v1564_v59, %v1253_v33  ;;  %v514_v58 = vld [vmem:[%s3478_s8 + $0x18] sm:$0xff]  ;;  %v959_v59 = vld [vmem:[%s3478_s8 + $0x50] sm:$0xff] }
 0x547   :  { %v1577_v61 = vmul.f32 %v1576_v2, %v1269_v51  ;;  %v1579_v20 = vmul.f32 %v1578_v12, %v1253_v33  ;;  %v967_v33 = vld [vmem:[%s3479_s9 + $0x50] sm:$0xff]  ;;  %v960_v51 = vld [vmem:[%s3478_s8 + $0x58] sm:$0xff]  ;;  %v1389_v12 = vld [vmem:[%s3478_s8 + $0x80] sm:$0xff] }
 0x548   :  { %v2965_v44 = vadd.f32 %v1551_v46, %v1549_v14  ;;  %v2967_v5 = vadd.f32 %v1565_v41, %v1563_v50  ;;  %v522_v2 = vld [vmem:[%s3479_s9 + $0x18] sm:$0xff]  ;;  %v1390_v14 = vld [vmem:[%s3478_s8 + $0x88] sm:$0xff]  ;;  %v824_v50 = vld [vmem:[%s3477_s7 + $0x60] sm:$0xff] }
 0x549   :  { %v2969_v43 = vadd.f32 %v1579_v20, %v1577_v61  ;;  %v968_v46 = vld [vmem:[%s3479_s9 + $0x58] sm:$0xff]  ;;  %2294 = vmatprep.mubr.msk.f32.mxu0 %vm381_vm1, %v824_v50  ;;  %v825_v41 = vld [vmem:[%s3477_s7 + $0x68] sm:$0xff]  ;;  %v1272_v61 = vld [vmem:[%s3477_s7 + $0x90] sm:$0xff] }
 0x54a   :  { %2295 = vmatmul.mubr.msk.f32.gmra.mxu0 %vm381_vm1, %v825_v41  ;;  %2321 = vmatprep.mubr.msk.f32.mxu1 %vm381_vm1, %v1272_v61  ;;  %v1273_v20 = vld [vmem:[%s3477_s7 + $0x98] sm:$0xff] }
 0x54b   :  { %2322 = vmatmul.mubr.msk.f32.gmra.mxu1 %vm381_vm1, %v1273_v20 }
 0x567   :  { %v532_v63 = vpop.xlane.xlu0 %531 }
 0x568   :  { %v545_v47 = vmul.f32 0.0078125, %v532_v63  ;;  %v2981_v3 = vpop.f32.mrf.mxu1 }
 0x56a   :  { %v2972_v60 = vsub.f32 %v2925_v34, %v545_v47  ;;  %v2983_v0 = vpop.f32.mrf.mxu1 }
 0x56b   :  { %v534_v13 = vpop.xlane.xlu0 %533 }
 0x56c   :  { %v546_v57 = vmul.f32 0.0078125, %v534_v13  ;;  %v561_v23 = vmul.f32 %v2972_v60, %v2972_v60  ;;  %v978_v25 = vpop.xlane.xlu1 %977  ;;  %v2985_v34 = vpop.f32.mrf.mxu1 }
 0x56d   :  { %v991_v18 = vmul.f32 0.0078125, %v978_v25 }
 0x56e   :  { %571 = vadd.xlane.f32.xlu1 %v561_v23  ;;  %v2977_v1 = vsub.f32 %v2923_v31, %v546_v57  ;;  %v2987_v36 = vpop.f32.mrf.mxu1 }
 0x56f   :  { %v980_v30 = vpop.xlane.xlu0 %979  ;;  %v2990_v16 = vsub.f32 %v2930_v35, %v991_v18  ;;  %v513_v35 = vld [vmem:[%s3478_s8 + $0x10] sm:$0xff] }
 0x570   :  { %v562_v24 = vmul.f32 %v2977_v1, %v2977_v1  ;;  %v992_v40 = vmul.f32 0.0078125, %v980_v30 }
 0x571   :  { %v1007_v53 = vmul.f32 %v2990_v16, %v2990_v16 }
 0x572   :  { %573 = vadd.xlane.f32.xlu1 %v562_v24  ;;  %v2995_v54 = vsub.f32 %v2927_v29, %v992_v40  ;;  %v521_v29 = vld [vmem:[%s3479_s9 + $0x10] sm:$0xff] }
 0x574   :  { %v1008_v38 = vmul.f32 %v2995_v54, %v2995_v54 }
 0x5f7   :  { %v572_v63 = vpop.xlane.xlu1 %571 }
 0x5f8   :  { %v585_v13 = vmul.f32 0.0078125, %v572_v63 }
 0x5fa   :  { %v2320_v31 = vpop.f32.mrf.mxu1  ;;  %v593_v23 = vadd.f32 1e-05, %v585_v13 }
 0x5fb   :  { %1403 = vadd.xlane.f32.xlu0 %v2320_v31  ;;  %v574_v47 = vpop.xlane.xlu1 %573 }
 0x5fc   :  { %v1360_v45 = vpop.f32.mrf.mxu1  ;;  %v586_v57 = vmul.f32 0.0078125, %v574_v47  ;;  %2396 = vrsqrt.f32 %v593_v23 }
 0x5fd   :  { %1401 = vadd.xlane.f32.xlu1 %v1360_v45 }
 0x5fe   :  { %v594_v25 = vadd.f32 1e-05, %v586_v57 }
 0x5ff   :  { %1017 = vadd.xlane.f32.xlu0 %v1007_v53 }
 0x600   :  { %2398 = vrsqrt.f32 %v594_v25 }
 0x603   :  { %1019 = vadd.xlane.f32.xlu0 %v1008_v38 }
 0x609   :  { %v2397_v50 = vpop.eup %2396 }
 0x60d   :  { %v2399_v61 = vpop.eup %2398 }
 0x60e   :  { %627 = vperm.xlu1 %2383, %v513_v35   ;;  %v610_v13 = vmul.f32 %v2399_v61, %v2977_v1  ;;  %v1395_v1 = vld [vmem:[%s3479_s9 + $0x80] sm:$0xff] }
 0x612   :  { %632 = vperm.xlu1 %2383, %v514_v58  }
 0x616   :  { %675 = vperm.xlu1 %2383, %v521_v29  }
 0x619   :  { %1073 = vperm.xlu0 %2382, %v959_v59  }
 0x61a   :  { %1121 = vperm.xlu1 %2383, %v967_v33  }
 0x61d   :  { %1078 = vperm.xlu0 %2382, %v960_v51  }
 0x61e   :  { %680 = vperm.xlu1 %2383, %v522_v2  }
 0x621   :  { %1469 = vperm.xlu0 %2382, %v1389_v12  }
 0x622   :  { %1474 = vperm.xlu1 %2383, %v1390_v14  }
 0x625   :  { %1126 = vperm.xlu0 %2382, %v968_v46  }
 0x684   :  { %v1404_v24 = vpop.xlane.xlu0 %1403 }
 0x685   :  { %v1414_v18 = vmul.f32 0.0078125, %v1404_v24 }
 0x686   :  { %v1402_v30 = vpop.xlane.xlu1 %1401 }
 0x687   :  { %v1413_v40 = vmul.f32 0.0078125, %v1402_v30  ;;  %v3045_v53 = vsub.f32 %v2320_v31, %v1414_v18  ;;  %v1396_v30 = vld [vmem:[%s3479_s9 + $0x88] sm:$0xff] }
 0x688   :  { %v1018_v38 = vpop.xlane.xlu0 %1017 }
 0x689   :  { %v1031_v35 = vmul.f32 0.0078125, %v1018_v38  ;;  %v1426_v58 = vmul.f32 %v3045_v53, %v3045_v53  ;;  %v3049_v29 = vsub.f32 %v1360_v45, %v1413_v40  ;;  %v609_v45 = vmul.f32 %v2397_v50, %v2972_v60 }
 0x68a   :  { %v628_v59 = vpop.permute.xlu1 %627  ;;  %v1189_v50 = vstv %s2122_s2 }
 0x68b   :  { %v1039_v33 = vadd.f32 1e-05, %v1031_v35  ;;  %1433 = vadd.xlane.f32.xlu0 %v1426_v58  ;;  %v1425_v51 = vmul.f32 %v3049_v29, %v3049_v29  ;;  %v657_v47 = vmul.f32 %v628_v59, %v609_v45 }
 0x68c   :  { %v1020_v2 = vpop.xlane.xlu0 %1019 }
 0x68d   :  { %2400 = vrsqrt.f32 %v1039_v33  ;;  %v1032_v12 = vmul.f32 0.0078125, %v1020_v2  ;;  %1431 = vadd.xlane.f32.xlu1 %v1425_v51 }
 0x68e   :  { %v633_v31 = vpop.permute.xlu1 %632 }
 0x68f   :  { %v1040_v14 = vadd.f32 1e-05, %v1032_v12  ;;  %v658_v24 = vmul.f32 %v633_v31, %v610_v13 }
 0x691   :  { %2402 = vrsqrt.f32 %v1040_v14 }
 0x692   :  { %v676_v46 = vpop.permute.xlu1 %675 }
 0x693   :  { %v705_v25 = vadd.f32 %v676_v46, %v657_v47  ;;  %v742_v46 = vstv %s2102_s11  ;;  %s2140_s11 = sld [smem:[#allocation2 + $0x2e]] }
 0x694   :  { %v1074_v41 = vpop.permute.xlu0 %1073  ;;  %v743_v47 = vmul.f32 %v742_v46, %v2553_v39 }
 0x695   :  { %v713_v58 = vmax.f32 %v705_v25, 0.0 }
 0x696   :  { %v1122_v20 = vpop.permute.xlu1 %1121 }
 0x697   :  { %v740_v31 = vadd.f32 %v2791_v27, %v713_v58 }
 0x698   :  { %v1079_v63 = vpop.permute.xlu0 %1078 }
 0x69a   :  { %v2401_v57 = vpop.eup %2400  ;;  %v681_v23 = vpop.permute.xlu1 %680 }
 0x69b   :  { %v1055_v18 = vmul.f32 %v2401_v57, %v2990_v16  ;;  %v706_v35 = vadd.f32 %v681_v23, %v658_v24 }
 0x69c   :  { %v1470_v40 = vpop.permute.xlu0 %1469 }
 0x69d   :  { %v1103_v38 = vmul.f32 %v1074_v41, %v1055_v18  ;;  %v714_v2 = vmax.f32 %v706_v35, 0.0 }
 0x69e   :  { %v2403_v60 = vpop.eup %2402  ;;  %1510 = vperm.xlu1 %2383, %v1396_v30   ;;  %v1475_v23 = vpop.permute.xlu1 %1474 }
 0x69f   :  { %v1151_v59 = vadd.f32 %v1122_v20, %v1103_v38  ;;  %v1056_v33 = vmul.f32 %v2403_v60, %v2995_v54  ;;  %v741_v61 = vadd.f32 %v740_v31, %v714_v2  ;;  %v1190_v20 = vmul.f32 %v1189_v50, %v2557_v42 }
 0x6a0   :  { %v1127_v12 = vpop.permute.xlu0 %1126  ;;  %v1555_v31 = vstv %s2137_s0 }
 0x6a1   :  { %v1159_v16 = vmax.f32 %v1151_v59, 0.0  ;;  %v1104_v51 = vmul.f32 %v1079_v63, %v1056_v33  ;;  %1505 = vperm.xlu0 %2382, %v1395_v1   ;;  %v744_v54 = vadd.f32 %v743_v47, %v741_v61 }
 0x6a3   :  { %v1152_v14 = vadd.f32 %v1127_v12, %v1104_v51  ;;  %v1187_v41 = vadd.f32 %v2835_v55, %v1159_v16 }
 0x6a5   :  { %v1160_v45 = vmax.f32 %v1152_v14, 0.0 }
 0x6a7   :  { %v1188_v13 = vadd.f32 %v1187_v41, %v1160_v45  ;;  %v1556_v41 = vmul.f32 %v1555_v31, %v2893_v52  ;;  %v3101_v45 = vpop.f32.mrf.mxu0  ;;  %v1637_v31 = vld [vmem:[%s3477_s7 + $0xb8] sm:$0xff] }
 0x6a9   :  { %v1191_v57 = vadd.f32 %v1190_v20, %v1188_v13  ;;  %v3104_v47 = vpop.f32.mrf.mxu0  ;;  %v3106_v20 = vpop.f32.mrf.mxu1 }
 0x6ab   :  { %v1192_v63 = vadd.f32 %v1191_v57, %v744_v54  ;;  %v3110_v13 = vpop.f32.mrf.mxu1 }
 0x714   :  { %v1434_v24 = vpop.xlane.xlu0 %1433 }
 0x715   :  { %v1444_v25 = vmul.f32 0.0078125, %v1434_v24 }
 0x716   :  { %v1432_v18 = vpop.xlane.xlu1 %1431 }
 0x717   :  { %v1450_v27 = vadd.f32 1e-05, %v1444_v25  ;;  %v1443_v30 = vmul.f32 0.0078125, %v1432_v18 }
 0x719   :  { %2404 = vrsqrt.f32 %v1450_v27  ;;  %v1449_v38 = vadd.f32 1e-05, %v1443_v30 }
 0x71a   :  { %v1511_v33 = vpop.permute.xlu1 %1510 }
 0x71b   :  { %2406 = vrsqrt.f32 %v1449_v38 }
 0x71c   :  { %v1506_v16 = vpop.permute.xlu0 %1505 }
 0x726   :  { %v2405_v55 = vpop.eup %2404 }
 0x727   :  { %v1462_v35 = vmul.f32 %v2405_v55, %v3045_v53 }
 0x728   :  { %v2407_v60 = vpop.eup %2406 }
 0x729   :  { %v1498_v1 = vmul.f32 %v1475_v23, %v1462_v35  ;;  %v1461_v58 = vmul.f32 %v2407_v60, %v3049_v29  ;;  %v826_v29 = vld [vmem:[%s3477_s7 + $0x70] sm:$0xff] }
 0x72a   :  { %2297 = vmatprep.mubr.msk.f32.mxu0 %vm381_vm1, %v826_v29 }
 0x72b   :  { %v1497_v59 = vmul.f32 %v1470_v40, %v1461_v58  ;;  %v1534_v51 = vadd.f32 %v1511_v33, %v1498_v1  ;;  %v1636_v40 = vld [vmem:[%s3477_s7 + $0xb0] sm:$0xff] }
 0x72d   :  { %v1533_v2 = vadd.f32 %v1506_v16, %v1497_v59  ;;  %v1540_v14 = vmax.f32 %v1534_v51, 0.0 }
 0x72f   :  { %v1539_v12 = vmax.f32 %v1533_v2, 0.0 }
 0x731   :  { %v1553_v46 = vadd.f32 %v2965_v44, %v1539_v12  ;;  %v827_v44 = vld [vmem:[%s3477_s7 + $0x78] sm:$0xff] }
 0x732   :  { %2298 = vmatmul.mubr.msk.f32.gmra.mxu0 %vm381_vm1, %v827_v44 }
 0x733   :  { %v1554_v50 = vadd.f32 %v1553_v46, %v1540_v14  ;;  %2345 = vmatprep.mubr.msk.f32.mxu0 %vm381_vm1, %v1636_v40 }
 0x735   :  { %v1557_v61 = vadd.f32 %v1556_v41, %v1554_v50 }
 0x737   :  { %v3071_v53 = vadd.f32 %v1557_v61, %v1192_v63 }
 0x739   :  { %1605 = vrot.lane.b32.xlu1 %v3071_v53, %s2463_s13  ;;  %1608 = vrot.lane.b32.xlu0 %v3071_v53, %s2460_s5 }
 0x73d   :  { %1599 = vrot.lane.b32.xlu1 %v3071_v53, %s2461_s6  ;;  %1602 = vrot.lane.b32.xlu0 %v3071_v53, %s2465_s15 }
 0x741   :  { %1593 = vrot.lane.b32.xlu1 %v3071_v53, %s2464_s14  ;;  %1596 = vrot.lane.b32.xlu0 %v3071_v53, %s2462_s12 }
 0x745   :  { %1587 = vrot.lane.b32.xlu1 %v3071_v53, %s2467_s17  ;;  %1590 = vrot.lane.b32.xlu0 %v3071_v53, %s2466_s16 }
 0x764   :  { %535 = vadd.xlane.f32.xlu0 %v2983_v0 }
 0x768   :  { %537 = vadd.xlane.f32.xlu0 %v2981_v3 }
 0x769   :  { %981 = vadd.xlane.f32.xlu1 %v3104_v47 }
 0x76c   :  { %983 = vadd.xlane.f32.xlu0 %v3101_v45 }
 0x76d   :  { %1405 = vadd.xlane.f32.xlu1 %v3110_v13 }
 0x770   :  { %1407 = vadd.xlane.f32.xlu0 %v3106_v20 }
 0x7ab   :  { %v1606_v54 = vpop.permute.xlu1 %1605  ;;  %v1609_v57 = vpop.permute.xlu0 %1608 }
 0x7ac   :  { %v1610_v63 = vmul.f32 %v1609_v57, %v2606_v49  ;;  %v1607_v23 = vmul.f32 %v1606_v54, %v2622_v56 }
 0x7ae   :  { %2327 = vmatprep.subr.mxu0 %v1610_v63 }
 0x7af   :  { %v1600_v24 = vpop.permute.xlu1 %1599  ;;  %2328 = vmatpush3.msra.mxu0 %v1610_v63  ;;  %v1603_v25 = vpop.permute.xlu0 %1602 }
 0x7b0   :  { %v1604_v18 = vmul.f32 %v1603_v25, %v2636_v62  ;;  %2329 = vmatprep.subr.mxu0 %v1607_v23  ;;  %v1601_v27 = vmul.f32 %v1600_v24, %v2656_v8 }
 0x7b1   :  { %2330 = vmatpush3.msra.mxu0 %v1607_v23 }
 0x7b2   :  { %2331 = vmatprep.subr.mxu0 %v1604_v18  ;;  %v1628_v44 = vadd.f32 %v1601_v27, %v2719_v48  ;;  %v1630_v57 = vadd.f32 %v1604_v18, %v2740_v4 }
 0x7b3   :  { %v1594_v30 = vpop.permute.xlu1 %1593  ;;  %2332 = vmatpush3.msra.mxu0 %v1604_v18  ;;  %v1597_v38 = vpop.permute.xlu0 %1596 }
 0x7b4   :  { %2333 = vmatprep.subr.mxu0 %v1601_v27  ;;  %v1598_v55 = vmul.f32 %v1597_v38, %v2670_v19  ;;  %v1595_v1 = vmul.f32 %v1594_v30, %v2673_v21  ;;  %v1632_v30 = vadd.f32 %v1607_v23, %v2748_v10 }
 0x7b5   :  { %2334 = vmatpush3.msra.mxu0 %v1601_v27 }
 0x7b6   :  { %2335 = vmatprep.subr.mxu0 %v3071_v53  ;;  %v1624_v14 = vadd.f32 %v1595_v1, %v2695_v32  ;;  %v1626_v41 = vadd.f32 %v1598_v55, %v2707_v37 }
 0x7b7   :  { %v1588_v35 = vpop.permute.xlu1 %1587  ;;  %2336 = vmatpush3.msra.mxu0 %v3071_v53  ;;  %v1591_v60 = vpop.permute.xlu0 %1590 }
 0x7b8   :  { %v1589_v58 = vmul.f32 %v1588_v35, %v2667_v17  ;;  %v1592_v59 = vmul.f32 %v1591_v60, %v2661_v15  ;;  %2337 = vmatprep.subr.mxu0 %v1598_v55 }
 0x7b9   :  { %2338 = vmatpush3.msra.mxu0 %v1598_v55 }
 0x7ba   :  { %v1620_v33 = vadd.f32 %v1589_v58, %v2677_v22  ;;  %v1611_v16 = vadd.f32 %v1592_v59, %v1589_v58  ;;  %2339 = vmatprep.subr.mxu0 %v1595_v1  ;;  %v1622_v12 = vadd.f32 %v1592_v59, %v2681_v26 }
 0x7bb   :  { %2340 = vmatpush3.msra.mxu0 %v1595_v1 }
 0x7bc   :  { %v1621_v51 = vmax.f32 %v3071_v53, %v1620_v33  ;;  %v1612_v2 = vadd.f32 %v1611_v16, %v1595_v1  ;;  %2341 = vmatprep.subr.mxu0 %v1592_v59  ;;  %v1858_v33 = vstv %s2151_s29  ;;  %v1860_v16 = vstv %s2152_s30  ;;  %s2105_s29 = sld [smem:[#allocation2 + $0x22]] }
 0x7bd   :  { %2342 = vmatpush3.msra.mxu0 %v1592_v59  ;;  %v1846_v59 = vstv %s2149_s28  ;;  %s2125_s30 = sld [smem:[#allocation2 + $0x28]] }
 0x7be   :  { %v1613_v46 = vadd.f32 %v1612_v2, %v1598_v55  ;;  %v1623_v50 = vmax.f32 %v1621_v51, %v1622_v12  ;;  %2343 = vmatprep.subr.mxu0 %v1589_v58  ;;  %v1634_v55 = vadd.f32 %v1610_v63, %v2745_v9 }
 0x7bf   :  { %2344 = vmatpush3.msra.mxu0 %v1589_v58  ;;  %v1844_v58 = vstv %s2148_s27 }
 0x7c0   :  { %v1614_v61 = vadd.f32 %v1613_v46, %v3071_v53  ;;  %v1625_v29 = vmax.f32 %v1623_v50, %v1624_v14  ;;  %2346 = vmatmul.mubr.msk.f32.vlgmr.msra.gmra.mxu0 %vm381_vm1, %v1637_v31 }
 0x7c2   :  { %v1627_v40 = vmax.f32 %v1625_v29, %v1626_v41  ;;  %v1615_v54 = vadd.f32 %v1614_v61, %v1601_v27 }
 0x7c4   :  { %v1616_v24 = vadd.f32 %v1615_v54, %v1604_v18  ;;  %v1629_v25 = vmax.f32 %v1627_v40, %v1628_v44 }
 0x7c6   :  { %v1617_v38 = vadd.f32 %v1616_v24, %v1607_v23  ;;  %v1631_v35 = vmax.f32 %v1629_v25, %v1630_v57 }
 0x7c8   :  { %v1618_v60 = vadd.f32 %v1617_v38, %v1610_v63  ;;  %v1633_v1 = vmax.f32 %v1631_v35, %v1632_v30 }
 0x7ca   :  { %v1619_v51 = vmul.f32 0.11111111, %v1618_v60  ;;  %v1635_v2 = vmax.f32 %v1633_v1, %v1634_v55 }
 0x7cc   :  { %v1845_v12 = vmul.f32 %v1844_v58, %v1635_v2  ;;  %v1847_v27 = vmul.f32 %v1846_v59, %v1619_v51  ;;  %v1859_v31 = vmul.f32 %v1858_v33, %v1635_v2  ;;  %v1861_v14 = vmul.f32 %v1860_v16, %v1619_v51  ;;  %v516_v33 = vld [vmem:[%s3478_s8 + $0x28] sm:$0xff] }
 0x7ce   :  { %v3139_v18 = vadd.f32 %v1847_v27, %v1845_v12  ;;  %v3141_v46 = vadd.f32 %v1861_v14, %v1859_v31 }
 0x7ed   :  { %v536_v23 = vpop.xlane.xlu0 %535 }
 0x7ee   :  { %v547_v50 = vmul.f32 0.0078125, %v536_v23 }
 0x7f0   :  { %v555_v41 = vsub.f32 %v2983_v0, %v547_v50 }
 0x7f1   :  { %v538_v63 = vpop.xlane.xlu0 %537 }
 0x7f2   :  { %v548_v61 = vmul.f32 0.0078125, %v538_v63  ;;  %v982_v29 = vpop.xlane.xlu1 %981  ;;  %v563_v44 = vmul.f32 %v555_v41, %v555_v41  ;;  %v3175_v16 = vpop.f32.mrf.mxu0 }
 0x7f3   :  { %v993_v40 = vmul.f32 0.0078125, %v982_v29  ;;  %v523_v29 = vld [vmem:[%s3479_s9 + $0x20] sm:$0xff] }
 0x7f4   :  { %v3145_v54 = vsub.f32 %v2981_v3, %v548_v61  ;;  %575 = vadd.xlane.f32.xlu1 %v563_v44  ;;  %v3177_v51 = vpop.f32.mrf.mxu0 }
 0x7f5   :  { %v3148_v57 = vsub.f32 %v3104_v47, %v993_v40  ;;  %v984_v24 = vpop.xlane.xlu0 %983  ;;  %v961_v40 = vld [vmem:[%s3478_s8 + $0x60] sm:$0xff] }
 0x7f6   :  { %v994_v25 = vmul.f32 0.0078125, %v984_v24  ;;  %v1406_v30 = vpop.xlane.xlu1 %1405  ;;  %v564_v38 = vmul.f32 %v3145_v54, %v3145_v54  ;;  %v969_v24 = vld [vmem:[%s3479_s9 + $0x60] sm:$0xff] }
 0x7f7   :  { %v1415_v35 = vmul.f32 0.0078125, %v1406_v30  ;;  %v1009_v0 = vmul.f32 %v3148_v57, %v3148_v57  ;;  %v1391_v30 = vld [vmem:[%s3478_s8 + $0x90] sm:$0xff] }
 0x7f8   :  { %v3155_v55 = vsub.f32 %v3101_v45, %v994_v25  ;;  %577 = vadd.xlane.f32.xlu1 %v564_v38  ;;  %v524_v25 = vld [vmem:[%s3479_s9 + $0x28] sm:$0xff]  ;;  %v1392_v38 = vld [vmem:[%s3478_s8 + $0x98] sm:$0xff] }
 0x7f9   :  { %v3158_v3 = vsub.f32 %v3110_v13, %v1415_v35  ;;  %1021 = vadd.xlane.f32.xlu0 %v1009_v0  ;;  %v1408_v47 = vpop.xlane.xlu0 %1407  ;;  %v515_v13 = vld [vmem:[%s3478_s8 + $0x20] sm:$0xff]  ;;  %v970_v35 = vld [vmem:[%s3479_s9 + $0x68] sm:$0xff]  ;;  %v1737_v0 = vld [vmem:[%s3478_s8 + $0xb0] sm:$0xff] }
 0x7fa   :  { %v1416_v60 = vmul.f32 0.0078125, %v1408_v47  ;;  %v1010_v1 = vmul.f32 %v3155_v55, %v3155_v55  ;;  %v1397_v47 = vld [vmem:[%s3479_s9 + $0x90] sm:$0xff] }
 0x7fb   :  { %v1427_v58 = vmul.f32 %v3158_v3, %v3158_v3 }
 0x7fc   :  { %v3165_v59 = vsub.f32 %v3106_v20, %v1416_v60  ;;  %v1738_v60 = vld [vmem:[%s3478_s8 + $0xb8] sm:$0xff] }
 0x7fd   :  { %1435 = vadd.xlane.f32.xlu1 %v1427_v58  ;;  %1023 = vadd.xlane.f32.xlu0 %v1010_v1  ;;  %v1398_v1 = vld [vmem:[%s3479_s9 + $0x98] sm:$0xff]  ;;  %v1274_v58 = vld [vmem:[%s3477_s7 + $0xa0] sm:$0xff] }
 0x7fe   :  { %v1428_v45 = vmul.f32 %v3165_v59, %v3165_v59  ;;  %2324 = vmatprep.mubr.msk.f32.mxu1 %vm381_vm1, %v1274_v58 }
 0x801   :  { %1437 = vadd.xlane.f32.xlu0 %v1428_v45  ;;  %v1275_v45 = vld [vmem:[%s3477_s7 + $0xa8] sm:$0xff] }
 0x802   :  { %2325 = vmatmul.mubr.msk.f32.gmra.mxu1 %vm381_vm1, %v1275_v45 }
 0x80e   :  { %637 = vperm.xlu1 %2383, %v515_v13   ;;  %v1638_v13 = vld [vmem:[%s3477_s7 + $0xc0] sm:$0xff] }
 0x80f   :  { %2348 = vmatprep.mubr.msk.f32.mxu0 %vm381_vm1, %v1638_v13 }
 0x812   :  { %642 = vperm.xlu1 %2383, %v516_v33   ;;  %v1639_v33 = vld [vmem:[%s3477_s7 + $0xc8] sm:$0xff] }
 0x813   :  { %2349 = vmatmul.mubr.msk.f32.gmra.mxu0 %vm381_vm1, %v1639_v33 }
 0x87d   :  { %v576_v20 = vpop.xlane.xlu1 %575 }
 0x87e   :  { %v587_v2 = vmul.f32 0.0078125, %v576_v20 }
 0x880   :  { %v595_v12 = vadd.f32 1e-05, %v587_v2  ;;  %v2347_v27 = vpop.f32.mrf.mxu0 }
 0x881   :  { %1747 = vadd.xlane.f32.xlu0 %v2347_v27  ;;  %v578_v14 = vpop.xlane.xlu1 %577 }
 0x882   :  { %2408 = vrsqrt.f32 %v595_v12  ;;  %v3179_v31 = vpop.f32.mrf.mxu0  ;;  %v1022_v20 = vpop.xlane.xlu0 %1021  ;;  %v588_v12 = vmul.f32 0.0078125, %v578_v14 }
 0x883   :  { %1745 = vadd.xlane.f32.xlu1 %v3179_v31  ;;  %v1033_v2 = vmul.f32 0.0078125, %v1022_v20 }
 0x886   :  { %v1436_v23 = vpop.xlane.xlu1 %1435 }
 0x88a   :  { %v638_v61 = vpop.permute.xlu1 %637 }
 0x88f   :  { %v2409_v50 = vpop.eup %2408 }
 0x890   :  { %v611_v63 = vmul.f32 %v2409_v50, %v555_v41  ;;  %v962_v41 = vld [vmem:[%s3478_s8 + $0x68] sm:$0xff]  ;;  %v1041_v50 = vadd.f32 1e-05, %v1033_v2 }
 0x892   :  { %v659_v44 = vmul.f32 %v638_v61, %v611_v63  ;;  %v596_v63 = vadd.f32 1e-05, %v588_v12  ;;  %v1024_v61 = vpop.xlane.xlu0 %1023  ;;  %2410 = vrsqrt.f32 %v1041_v50 }
 0x894   :  { %685 = vperm.xlu1 %2383, %v523_v29   ;;  %2412 = vrsqrt.f32 %v596_v63  ;;  %v1034_v29 = vmul.f32 0.0078125, %v1024_v61 }
 0x897   :  { %1083 = vperm.xlu0 %2382, %v961_v40   ;;  %v1438_v40 = vpop.xlane.xlu0 %1437 }
 0x898   :  { %1131 = vperm.xlu1 %2383, %v969_v24   ;;  %v1445_v24 = vmul.f32 0.0078125, %v1436_v23 }
 0x89b   :  { %1088 = vperm.xlu0 %2382, %v962_v41   ;;  %v1042_v41 = vadd.f32 1e-05, %v1034_v29 }
 0x89c   :  { %690 = vperm.xlu1 %2383, %v524_v25   ;;  %v643_v25 = vpop.permute.xlu1 %642 }
 0x89d   :  { %2414 = vrsqrt.f32 %v1042_v41 }
 0x89f   :  { %1479 = vperm.xlu0 %2382, %v1391_v30   ;;  %v2411_v14 = vpop.eup %2410 }
 0x8a0   :  { %1484 = vperm.xlu1 %2383, %v1392_v38   ;;  %v1451_v38 = vadd.f32 1e-05, %v1445_v24  ;;  %v1057_v2 = vmul.f32 %v2411_v14, %v3148_v57 }
 0x8a1   :  { %v2413_v13 = vpop.eup %2412 }
 0x8a2   :  { %2416 = vrsqrt.f32 %v1451_v38  ;;  %v612_v50 = vmul.f32 %v2413_v13, %v3145_v54 }
 0x8a3   :  { %1136 = vperm.xlu0 %2382, %v970_v35   ;;  %v1446_v35 = vmul.f32 0.0078125, %v1438_v40 }
 0x8a4   :  { %1791 = vperm.xlu1 %2383, %v1737_v0   ;;  %v660_v41 = vmul.f32 %v643_v25, %v612_v50 }
 0x8a5   :  { %v1452_v58 = vadd.f32 1e-05, %v1446_v35 }
 0x8a7   :  { %1515 = vperm.xlu0 %2382, %v1397_v47   ;;  %2418 = vrsqrt.f32 %v1452_v58 }
 0x8a8   :  { %1796 = vperm.xlu1 %2383, %v1738_v60  }
 0x8ab   :  { %1520 = vperm.xlu0 %2382, %v1398_v1  }
 0x90a   :  { %v1748_v30 = vpop.xlane.xlu0 %1747 }
 0x90b   :  { %v1754_v0 = vmul.f32 0.0078125, %v1748_v30  ;;  %v2415_v30 = vpop.eup %2414 }
 0x90c   :  { %v1746_v47 = vpop.xlane.xlu1 %1745  ;;  %v1058_v54 = vmul.f32 %v2415_v30, %v3155_v55 }
 0x90d   :  { %v3234_v60 = vsub.f32 %v2347_v27, %v1754_v0  ;;  %v1753_v1 = vmul.f32 0.0078125, %v1746_v47 }
 0x90f   :  { %v3237_v45 = vsub.f32 %v3179_v31, %v1753_v1  ;;  %v1762_v23 = vmul.f32 %v3234_v60, %v3234_v60  ;;  %v2417_v1 = vpop.eup %2416 }
 0x910   :  { %v686_v33 = vpop.permute.xlu1 %685  ;;  %v1463_v13 = vmul.f32 %v2417_v1, %v3158_v3 }
 0x911   :  { %v707_v20 = vadd.f32 %v686_v33, %v659_v44  ;;  %1767 = vadd.xlane.f32.xlu0 %v1762_v23  ;;  %v1761_v27 = vmul.f32 %v3237_v45, %v3237_v45  ;;  %v2419_v33 = vpop.eup %2418 }
 0x912   :  { %v1084_v12 = vpop.permute.xlu0 %1083 }
 0x913   :  { %v715_v63 = vmax.f32 %v707_v20, 0.0  ;;  %v1105_v61 = vmul.f32 %v1084_v12, %v1057_v2  ;;  %1765 = vadd.xlane.f32.xlu1 %v1761_v27  ;;  %v1203_v20 = vstv %s2125_s30 }
 0x914   :  { %v1132_v31 = vpop.permute.xlu1 %1131 }
 0x915   :  { %v753_v29 = vadd.f32 %v2793_v6, %v715_v63  ;;  %v1153_v40 = vadd.f32 %v1132_v31, %v1105_v61  ;;  %v755_v6 = vstv %s2105_s29  ;;  %v1464_v63 = vmul.f32 %v2419_v33, %v3165_v59 }
 0x916   :  { %v1089_v24 = vpop.permute.xlu0 %1088  ;;  %v756_v55 = vmul.f32 %v755_v6, %v2553_v39  ;;  %v1204_v61 = vmul.f32 %v1203_v20, %v2557_v42  ;;  %v1569_v59 = vstv %s2140_s11 }
 0x917   :  { %v1161_v44 = vmax.f32 %v1153_v40, 0.0  ;;  %v1106_v14 = vmul.f32 %v1089_v24, %v1058_v54 }
 0x918   :  { %v691_v57 = vpop.permute.xlu1 %690 }
 0x919   :  { %v1201_v38 = vadd.f32 %v2837_v7, %v1161_v44  ;;  %v708_v35 = vadd.f32 %v691_v57, %v660_v41  ;;  %v1742_v7 = vld [vmem:[%s3479_s9 + $0xb8] sm:$0xff] }
 0x91a   :  { %v1480_v0 = vpop.permute.xlu0 %1479 }
 0x91b   :  { %v716_v47 = vmax.f32 %v708_v35, 0.0  ;;  %v1499_v2 = vmul.f32 %v1480_v0, %v1463_v13 }
 0x91c   :  { %v1485_v12 = vpop.permute.xlu1 %1484 }
 0x91d   :  { %v754_v58 = vadd.f32 %v753_v29, %v716_v47  ;;  %v1741_v29 = vld [vmem:[%s3479_s9 + $0xb0] sm:$0xff]  ;;  %v1500_v24 = vmul.f32 %v1485_v12, %v1464_v63 }
 0x91e   :  { %v1137_v23 = vpop.permute.xlu0 %1136 }
 0x91f   :  { %v1154_v25 = vadd.f32 %v1137_v23, %v1106_v14  ;;  %v757_v40 = vadd.f32 %v756_v55, %v754_v58 }
 0x920   :  { %v1792_v23 = vpop.permute.xlu1 %1791 }
 0x921   :  { %v1162_v27 = vmax.f32 %v1154_v25, 0.0 }
 0x922   :  { %v1516_v50 = vpop.permute.xlu0 %1515 }
 0x923   :  { %v1202_v31 = vadd.f32 %v1201_v38, %v1162_v27  ;;  %v1535_v3 = vadd.f32 %v1516_v50, %v1499_v2  ;;  %v1570_v38 = vmul.f32 %v1569_v59, %v2893_v52 }
 0x924   :  { %1820 = vperm.xlu1 %2383, %v1742_v7   ;;  %v1797_v6 = vpop.permute.xlu1 %1796 }
 0x925   :  { %v1205_v41 = vadd.f32 %v1204_v61, %v1202_v31  ;;  %v1541_v44 = vmax.f32 %v1535_v3, 0.0 }
 0x926   :  { %v1521_v30 = vpop.permute.xlu0 %1520 }
 0x927   :  { %v1206_v57 = vadd.f32 %v1205_v41, %v757_v40  ;;  %v1567_v35 = vadd.f32 %v2967_v5, %v1541_v44  ;;  %v1536_v0 = vadd.f32 %v1521_v30, %v1500_v24  ;;  %1815 = vperm.xlu0 %2382, %v1741_v29   ;;  %v1851_v40 = vstv %s2150_s21 }
 0x928   :  { %v1852_v30 = vmul.f32 %v1851_v40, %v3071_v53 }
 0x929   :  { %v1542_v54 = vmax.f32 %v1536_v0, 0.0  ;;  %v3293_v0 = vpop.f32.mrf.mxu0 }
 0x92b   :  { %v1568_v47 = vadd.f32 %v1567_v35, %v1542_v54  ;;  %v3297_v59 = vpop.f32.mrf.mxu0 }
 0x92d   :  { %v1571_v1 = vadd.f32 %v1570_v38, %v1568_v47 }
 0x92f   :  { %v1572_v14 = vadd.f32 %v1571_v1, %v1206_v57 }
 0x99a   :  { %v1768_v13 = vpop.xlane.xlu0 %1767 }
 0x99b   :  { %v1774_v58 = vmul.f32 0.0078125, %v1768_v13 }
 0x99c   :  { %v1766_v25 = vpop.xlane.xlu1 %1765 }
 0x99d   :  { %v1778_v33 = vadd.f32 1e-05, %v1774_v58  ;;  %v1773_v20 = vmul.f32 0.0078125, %v1766_v25 }
 0x99f   :  { %2420 = vrsqrt.f32 %v1778_v33  ;;  %v1777_v2 = vadd.f32 1e-05, %v1773_v20 }
 0x9a0   :  { %v1821_v63 = vpop.permute.xlu1 %1820 }
 0x9a1   :  { %2422 = vrsqrt.f32 %v1777_v2 }
 0x9a2   :  { %v1816_v61 = vpop.permute.xlu0 %1815 }
 0x9ac   :  { %v2421_v5 = vpop.eup %2420 }
 0x9ad   :  { %v1786_v27 = vmul.f32 %v2421_v5, %v3234_v60 }
 0x9ae   :  { %v2423_v7 = vpop.eup %2422 }
 0x9af   :  { %v1810_v55 = vmul.f32 %v1797_v6, %v1786_v27  ;;  %v1785_v12 = vmul.f32 %v2423_v7, %v3237_v45  ;;  %v3287_v45 = vpop.f32.mrf.mxu1 }
 0x9b1   :  { %v1809_v50 = vmul.f32 %v1792_v23, %v1785_v12  ;;  %v1834_v31 = vadd.f32 %v1821_v63, %v1810_v55  ;;  %v3291_v35 = vpop.f32.mrf.mxu1 }
 0x9b3   :  { %v1833_v3 = vadd.f32 %v1816_v61, %v1809_v50  ;;  %v1838_v24 = vmax.f32 %v1834_v31, 0.0 }
 0x9b5   :  { %v1837_v29 = vmax.f32 %v1833_v3, 0.0 }
 0x9b7   :  { %v1849_v41 = vadd.f32 %v3139_v18, %v1837_v29  ;;  %v1918_v18 = vld [vmem:[%s3477_s7 + $0xd0] sm:$0xff] }
 0x9b8   :  { %2369 = vmatprep.mubr.msk.f32.mxu1 %vm381_vm1, %v1918_v18 }
 0x9b9   :  { %v1850_v44 = vadd.f32 %v1849_v41, %v1838_v24 }
 0x9bb   :  { %v1853_v57 = vadd.f32 %v1852_v30, %v1850_v44 }
 0x9bd   :  { %v3264_v60 = vadd.f32 %v1853_v57, %v1572_v14 }
 0x9bf   :  { %1887 = vrot.lane.b32.xlu1 %v3264_v60, %s2463_s13  ;;  %1890 = vrot.lane.b32.xlu0 %v3264_v60, %s2460_s5  ;;  %s2157_s13 = sld [smem:[#allocation2 + $0x4f]] }
 0x9c3   :  { %1881 = vrot.lane.b32.xlu1 %v3264_v60, %s2461_s6  ;;  %1884 = vrot.lane.b32.xlu0 %v3264_v60, %s2465_s15 }
 0x9c5   :  { %v2058_v57 = vstv %s2157_s13 }
 0x9c7   :  { %1875 = vrot.lane.b32.xlu1 %v3264_v60, %s2464_s14  ;;  %1878 = vrot.lane.b32.xlu0 %v3264_v60, %s2462_s12  ;;  %s2156_s12 = sld [smem:[#allocation2 + $0x4e]] }
 0x9cb   :  { %1869 = vrot.lane.b32.xlu1 %v3264_v60, %s2467_s17  ;;  %1872 = vrot.lane.b32.xlu0 %v3264_v60, %s2466_s16 }
 0x9cd   :  { %v2056_v30 = vstv %s2156_s12 }
 0x9ea   :  { %539 = vadd.xlane.f32.xlu0 %v2987_v36 }
 0x9ee   :  { %541 = vadd.xlane.f32.xlu0 %v2985_v34 }
 0x9ef   :  { %985 = vadd.xlane.f32.xlu1 %v3177_v51 }
 0x9f2   :  { %987 = vadd.xlane.f32.xlu0 %v3175_v16 }
 0x9f3   :  { %1409 = vadd.xlane.f32.xlu1 %v3291_v35 }
 0x9f6   :  { %1411 = vadd.xlane.f32.xlu0 %v3287_v45 }
 0x9f7   :  { %1749 = vadd.xlane.f32.xlu1 %v3297_v59 }
 0x9fa   :  { %1751 = vadd.xlane.f32.xlu0 %v3293_v0 }
 0xa31   :  { %v1888_v54 = vpop.permute.xlu1 %1887  ;;  %v1891_v38 = vpop.permute.xlu0 %1890 }
 0xa32   :  { %v1892_v47 = vmul.f32 %v1891_v38, %v2606_v49  ;;  %v1889_v1 = vmul.f32 %v1888_v54, %v2622_v56 }
 0xa34   :  { %2351 = vmatprep.subr.mxu1 %v1892_v47  ;;  %v1914_v29 = vadd.f32 %v1889_v1, %v2748_v10 }
 0xa35   :  { %v1882_v14 = vpop.permute.xlu1 %1881  ;;  %2352 = vmatpush3.msra.mxu1 %v1892_v47  ;;  %v1885_v23 = vpop.permute.xlu0 %1884 }
 0xa36   :  { %v1886_v6 = vmul.f32 %v1885_v23, %v2636_v62  ;;  %2353 = vmatprep.subr.mxu1 %v1889_v1  ;;  %v1883_v13 = vmul.f32 %v1882_v14, %v2656_v8 }
 0xa37   :  { %2354 = vmatpush3.msra.mxu1 %v1889_v1 }
 0xa38   :  { %2355 = vmatprep.subr.mxu1 %v1886_v6  ;;  %v1912_v31 = vadd.f32 %v1886_v6, %v2740_v4 }
 0xa39   :  { %v1876_v58 = vpop.permute.xlu1 %1875  ;;  %2356 = vmatpush3.msra.mxu1 %v1886_v6  ;;  %v1879_v25 = vpop.permute.xlu0 %1878 }
 0xa3a   :  { %2357 = vmatprep.subr.mxu1 %v1883_v13  ;;  %v1880_v49 = vmul.f32 %v1879_v25, %v2670_v19  ;;  %v1877_v62 = vmul.f32 %v1876_v58, %v2673_v21 }
 0xa3b   :  { %2358 = vmatpush3.msra.mxu1 %v1883_v13 }
 0xa3c   :  { %2359 = vmatprep.subr.mxu1 %v3264_v60 }
 0xa3d   :  { %v1870_v56 = vpop.permute.xlu1 %1869  ;;  %2360 = vmatpush3.msra.mxu1 %v3264_v60  ;;  %v1873_v33 = vpop.permute.xlu0 %1872 }
 0xa3e   :  { %v1871_v20 = vmul.f32 %v1870_v56, %v2667_v17  ;;  %v1874_v8 = vmul.f32 %v1873_v33, %v2661_v15  ;;  %2361 = vmatprep.subr.mxu1 %v1880_v49  ;;  %v1919_v17 = vld [vmem:[%s3477_s7 + $0xd8] sm:$0xff]  ;;  %v1906_v15 = vadd.f32 %v1877_v62, %v2695_v32 }
 0xa3f   :  { %2362 = vmatpush3.msra.mxu1 %v1880_v49 }
 0xa40   :  { %v1902_v2 = vadd.f32 %v1871_v20, %v2677_v22  ;;  %v1893_v5 = vadd.f32 %v1874_v8, %v1871_v20  ;;  %2363 = vmatprep.subr.mxu1 %v1877_v62  ;;  %v1904_v7 = vadd.f32 %v1874_v8, %v2681_v26  ;;  %v1908_v22 = vadd.f32 %v1880_v49, %v2707_v37 }
 0xa41   :  { %2364 = vmatpush3.msra.mxu1 %v1877_v62  ;;  %v1910_v26 = vadd.f32 %v1883_v13, %v2719_v48  ;;  %v1916_v37 = vadd.f32 %v1892_v47, %v2745_v9 }
 0xa42   :  { %v1903_v19 = vmax.f32 %v3264_v60, %v1902_v2  ;;  %v1894_v27 = vadd.f32 %v1893_v5, %v1877_v62  ;;  %2365 = vmatprep.subr.mxu1 %v1874_v8  ;;  %v518_v2 = vld [vmem:[%s3478_s8 + $0x38] sm:$0xff]  ;;  %v525_v5 = vld [vmem:[%s3479_s9 + $0x30] sm:$0xff] }
 0xa43   :  { %2366 = vmatpush3.msra.mxu1 %v1874_v8 }
 0xa44   :  { %v1895_v21 = vadd.f32 %v1894_v27, %v1880_v49  ;;  %v1905_v55 = vmax.f32 %v1903_v19, %v1904_v7  ;;  %2367 = vmatprep.subr.mxu1 %v1871_v20  ;;  %v963_v19 = vld [vmem:[%s3478_s8 + $0x70] sm:$0xff] }
 0xa45   :  { %2368 = vmatpush3.msra.mxu1 %v1871_v20  ;;  %v971_v27 = vld [vmem:[%s3479_s9 + $0x70] sm:$0xff] }
 0xa46   :  { %v1896_v12 = vadd.f32 %v1895_v21, %v3264_v60  ;;  %v1907_v50 = vmax.f32 %v1905_v55, %v1906_v15  ;;  %2370 = vmatmul.mubr.msk.f32.vlgmr.msra.gmra.mxu1 %vm381_vm1, %v1919_v17 }
 0xa48   :  { %v1909_v63 = vmax.f32 %v1907_v50, %v1908_v22  ;;  %v1897_v61 = vadd.f32 %v1896_v12, %v1883_v13 }
 0xa4a   :  { %v1898_v32 = vadd.f32 %v1897_v61, %v1886_v6  ;;  %v1911_v3 = vmax.f32 %v1909_v63, %v1910_v26 }
 0xa4c   :  { %v1899_v40 = vadd.f32 %v1898_v32, %v1889_v1  ;;  %v1913_v24 = vmax.f32 %v1911_v3, %v1912_v31 }
 0xa4e   :  { %v1900_v41 = vadd.f32 %v1899_v40, %v1892_v47  ;;  %v1915_v44 = vmax.f32 %v1913_v24, %v1914_v29 }
 0xa50   :  { %v1901_v18 = vmul.f32 0.11111111, %v1900_v41  ;;  %v1917_v54 = vmax.f32 %v1915_v44, %v1916_v37 }
 0xa52   :  { %v2057_v38 = vmul.f32 %v2056_v30, %v1917_v54  ;;  %v2059_v48 = vmul.f32 %v2058_v57, %v1901_v18  ;;  %v1393_v54 = vld [vmem:[%s3478_s8 + $0xa0] sm:$0xff] }
 0xa54   :  { %v3326_v14 = vadd.f32 %v2059_v48, %v2057_v38 }
 0xa73   :  { %v540_v23 = vpop.xlane.xlu0 %539 }
 0xa74   :  { %v549_v4 = vmul.f32 0.0078125, %v540_v23 }
 0xa76   :  { %v3329_v6 = vsub.f32 %v2987_v36, %v549_v4 }
 0xa77   :  { %v542_v10 = vpop.xlane.xlu0 %541 }
 0xa78   :  { %v550_v1 = vmul.f32 0.0078125, %v542_v10  ;;  %v986_v13 = vpop.xlane.xlu1 %985  ;;  %v565_v9 = vmul.f32 %v3329_v6, %v3329_v6 }
 0xa79   :  { %v995_v7 = vmul.f32 0.0078125, %v986_v13 }
 0xa7a   :  { %v3334_v47 = vsub.f32 %v2985_v34, %v550_v1  ;;  %579 = vadd.xlane.f32.xlu1 %v565_v9  ;;  %v964_v1 = vld [vmem:[%s3478_s8 + $0x78] sm:$0xff] }
 0xa7b   :  { %v988_v58 = vpop.xlane.xlu0 %987  ;;  %v3367_v15 = vsub.f32 %v3177_v51, %v995_v7 }
 0xa7c   :  { %v996_v25 = vmul.f32 0.0078125, %v988_v58  ;;  %v1410_v49 = vpop.xlane.xlu1 %1409  ;;  %v566_v56 = vmul.f32 %v3334_v47, %v3334_v47 }
 0xa7d   :  { %v1417_v21 = vmul.f32 0.0078125, %v1410_v49  ;;  %v1011_v12 = vmul.f32 %v3367_v15, %v3367_v15 }
 0xa7e   :  { %v3339_v33 = vsub.f32 %v3175_v16, %v996_v25  ;;  %581 = vadd.xlane.f32.xlu0 %v566_v56  ;;  %v517_v16 = vld [vmem:[%s3478_s8 + $0x30] sm:$0xff] }
 0xa7f   :  { %v1412_v17 = vpop.xlane.xlu0 %1411  ;;  %v3370_v55 = vsub.f32 %v3291_v35, %v1417_v21 }
 0xa80   :  { %v1750_v36 = vpop.xlane.xlu1 %1749  ;;  %v1012_v62 = vmul.f32 %v3339_v33, %v3339_v33  ;;  %v1418_v22 = vmul.f32 0.0078125, %v1412_v17 }
 0xa81   :  { %v1755_v20 = vmul.f32 0.0078125, %v1750_v36  ;;  %v1429_v61 = vmul.f32 %v3370_v55, %v3370_v55  ;;  %v1739_v36 = vld [vmem:[%s3478_s8 + $0xc0] sm:$0xff] }
 0xa82   :  { %1027 = vadd.xlane.f32.xlu1 %v1012_v62  ;;  %v3375_v26 = vsub.f32 %v3287_v45, %v1418_v22 }
 0xa83   :  { %v3344_v34 = vsub.f32 %v3297_v59, %v1755_v20  ;;  %v526_v59 = vld [vmem:[%s3479_s9 + $0x38] sm:$0xff]  ;;  %v1752_v50 = vpop.xlane.xlu0 %1751 }
 0xa84   :  { %v1756_v63 = vmul.f32 0.0078125, %v1752_v50  ;;  %v1430_v35 = vmul.f32 %v3375_v26, %v3375_v26 }
 0xa85   :  { %v1763_v8 = vmul.f32 %v3344_v34, %v3344_v34 }
 0xa86   :  { %v3380_v51 = vsub.f32 %v3293_v0, %v1756_v63 }
 0xa87   :  { %1769 = vadd.xlane.f32.xlu1 %v1763_v8  ;;  %v1399_v8 = vld [vmem:[%s3479_s9 + $0xa0] sm:$0xff] }
 0xa88   :  { %v1764_v31 = vmul.f32 %v3380_v51, %v3380_v51 }
 0xa94   :  { %652 = vperm.xlu0 %2382, %v518_v2   ;;  %v1400_v2 = vld [vmem:[%s3479_s9 + $0xa8] sm:$0xff] }
 0xa98   :  { %647 = vperm.xlu1 %2383, %v517_v16   ;;  %v2001_v16 = vld [vmem:[%s3478_s8 + $0xd0] sm:$0xff] }
 0xa9c   :  { %695 = vperm.xlu1 %2383, %v525_v5   ;;  %v1743_v5 = vld [vmem:[%s3479_s9 + $0xc0] sm:$0xff] }
 0xaa0   :  { %700 = vperm.xlu1 %2383, %v526_v59   ;;  %v2002_v59 = vld [vmem:[%s3478_s8 + $0xd8] sm:$0xff] }
 0xaa4   :  { %1093 = vperm.xlu1 %2383, %v963_v19   ;;  %v1744_v19 = vld [vmem:[%s3479_s9 + $0xc8] sm:$0xff] }
 0xaa8   :  { %1141 = vperm.xlu1 %2383, %v971_v27  }
 0xab3   :  { %1025 = vadd.xlane.f32.xlu0 %v1011_v12 }
 0xab7   :  { %1439 = vadd.xlane.f32.xlu0 %v1429_v61 }
 0xabb   :  { %1441 = vadd.xlane.f32.xlu0 %v1430_v35 }
 0xabf   :  { %1771 = vadd.xlane.f32.xlu0 %v1764_v31 }
 0xb03   :  { %v580_v32 = vpop.xlane.xlu1 %579 }
 0xb04   :  { %v589_v3 = vmul.f32 0.0078125, %v580_v32 }
 0xb06   :  { %v597_v45 = vadd.f32 1e-05, %v589_v3  ;;  %v3386_v29 = vpop.f32.mrf.mxu1 }
 0xb07   :  { %2007 = vadd.xlane.f32.xlu0 %v3386_v29  ;;  %v582_v40 = vpop.xlane.xlu0 %581 }
 0xb08   :  { %2424 = vrsqrt.f32 %v597_v45  ;;  %v590_v24 = vmul.f32 0.0078125, %v582_v40  ;;  %v3389_v0 = vpop.f32.mrf.mxu1 }
 0xb09   :  { %2005 = vadd.xlane.f32.xlu1 %v3389_v0 }
 0xb0a   :  { %v598_v37 = vadd.f32 1e-05, %v590_v24 }
 0xb0b   :  { %v1028_v41 = vpop.xlane.xlu1 %1027 }
 0xb0c   :  { %2426 = vrsqrt.f32 %v598_v37  ;;  %v1036_v3 = vmul.f32 0.0078125, %v1028_v41 }
 0xb0e   :  { %v1044_v45 = vadd.f32 1e-05, %v1036_v3 }
 0xb0f   :  { %v653_v13 = vpop.permute.xlu0 %652 }
 0xb10   :  { %v1770_v44 = vpop.xlane.xlu1 %1769 }
 0xb14   :  { %v648_v30 = vpop.permute.xlu1 %647 }
 0xb15   :  { %v2425_v57 = vpop.eup %2424 }
 0xb16   :  { %v613_v18 = vmul.f32 %v2425_v57, %v3329_v6  ;;  %v1394_v6 = vld [vmem:[%s3478_s8 + $0xa8] sm:$0xff] }
 0xb18   :  { %v661_v38 = vmul.f32 %v648_v30, %v613_v18  ;;  %v696_v48 = vpop.permute.xlu1 %695  ;;  %v1775_v18 = vmul.f32 0.0078125, %v1770_v44 }
 0xb19   :  { %v2427_v23 = vpop.eup %2426 }
 0xb1a   :  { %v614_v4 = vmul.f32 %v2427_v23, %v3334_v47  ;;  %v709_v10 = vadd.f32 %v696_v48, %v661_v38  ;;  %1489 = vperm.xlu1 %2383, %v1393_v54   ;;  %v972_v47 = vld [vmem:[%s3479_s9 + $0x78] sm:$0xff] }
 0xb1c   :  { %v662_v9 = vmul.f32 %v653_v13, %v614_v4  ;;  %v717_v58 = vmax.f32 %v709_v10, 0.0  ;;  %v701_v25 = vpop.permute.xlu1 %700 }
 0xb1d   :  { %1098 = vperm.xlu0 %2382, %v964_v1  }
 0xb1e   :  { %v766_v49 = vadd.f32 %v2804_v28, %v717_v58  ;;  %v710_v56 = vadd.f32 %v701_v25, %v662_v9  ;;  %1494 = vperm.xlu1 %2383, %v1394_v6   ;;  %v1740_v28 = vld [vmem:[%s3478_s8 + $0xc8] sm:$0xff]  ;;  %s2108_s8 = sld [smem:[#allocation2 + $0x3a]] }
 0xb20   :  { %v718_v62 = vmax.f32 %v710_v56, 0.0  ;;  %v1094_v21 = vpop.permute.xlu1 %1093 }
 0xb21   :  { %1146 = vperm.xlu0 %2382, %v972_v47  }
 0xb22   :  { %v3410_v20 = vadd.f32 %v766_v49, %v718_v62  ;;  %1801 = vperm.xlu1 %2383, %v1739_v36  }
 0xb24   :  { %v1142_v63 = vpop.permute.xlu1 %1141  ;;  %v768_v47 = vstv %s2108_s8 }
 0xb25   :  { %1525 = vperm.xlu0 %2382, %v1399_v8  }
 0xb26   :  { %1806 = vperm.xlu1 %2383, %v1740_v28   ;;  %v1217_v28 = vstv %s2128_s25 }
 0xb29   :  { %1530 = vperm.xlu0 %2382, %v1400_v2  }
 0xb2a   :  { %2029 = vperm.xlu1 %2383, %v2001_v16  }
 0xb2d   :  { %1825 = vperm.xlu0 %2382, %v1743_v5   ;;  %v769_v5 = vmul.f32 %v768_v47, %v2553_v39 }
 0xb2e   :  { %2034 = vperm.xlu1 %2383, %v2002_v59  }
 0xb31   :  { %1830 = vperm.xlu0 %2382, %v1744_v19  }
 0xb3c   :  { %v1026_v27 = vpop.xlane.xlu0 %1025 }
 0xb3d   :  { %v1035_v7 = vmul.f32 0.0078125, %v1026_v27 }
 0xb3f   :  { %v1043_v17 = vadd.f32 1e-05, %v1035_v7 }
 0xb40   :  { %v1440_v32 = vpop.xlane.xlu0 %1439 }
 0xb41   :  { %2428 = vrsqrt.f32 %v1043_v17  ;;  %v1447_v40 = vmul.f32 0.0078125, %v1440_v32 }
 0xb42   :  { %2430 = vrsqrt.f32 %v1044_v45  ;;  %v2004_v45 = vld [vmem:[%s3479_s9 + $0xd8] sm:$0xff] }
 0xb43   :  { %v1453_v37 = vadd.f32 1e-05, %v1447_v40 }
 0xb44   :  { %v1442_v24 = vpop.xlane.xlu0 %1441 }
 0xb45   :  { %v1448_v30 = vmul.f32 0.0078125, %v1442_v24  ;;  %2432 = vrsqrt.f32 %v1453_v37 }
 0xb47   :  { %v1454_v54 = vadd.f32 1e-05, %v1448_v30 }
 0xb48   :  { %v1772_v57 = vpop.xlane.xlu0 %1771 }
 0xb49   :  { %2434 = vrsqrt.f32 %v1454_v54  ;;  %v1776_v48 = vmul.f32 0.0078125, %v1772_v57 }
 0xb4b   :  { %v1780_v10 = vadd.f32 1e-05, %v1776_v48 }
 0xb4e   :  { %v2429_v22 = vpop.eup %2428 }
 0xb4f   :  { %v1059_v12 = vmul.f32 %v2429_v22, %v3367_v15  ;;  %v1779_v15 = vadd.f32 1e-05, %v1775_v18  ;;  %v2431_v13 = vpop.eup %2430  ;;  %v770_v22 = vadd.f32 %v769_v5, %v3410_v20 }
 0xb51   :  { %v1107_v50 = vmul.f32 %v1094_v21, %v1059_v12  ;;  %2436 = vrsqrt.f32 %v1779_v15 }
 0xb52   :  { %2438 = vrsqrt.f32 %v1780_v10  ;;  %v2433_v25 = vpop.eup %2432 }
 0xb53   :  { %v1155_v61 = vadd.f32 %v1142_v63, %v1107_v50  ;;  %v1465_v36 = vmul.f32 %v2433_v25, %v3370_v55 }
 0xb55   :  { %v1163_v35 = vmax.f32 %v1155_v61, 0.0 }
 0xb56   :  { %v2435_v8 = vpop.eup %2434 }
 0xb57   :  { %v1215_v31 = vadd.f32 %v2839_v11, %v1163_v35  ;;  %v1466_v19 = vmul.f32 %v2435_v8, %v3375_v26  ;;  %v1583_v26 = vstv %s2143_s3 }
 0xb58   :  { %v1584_v37 = vmul.f32 %v1583_v26, %v2893_v52 }
 0xb5e   :  { %v2437_v17 = vpop.eup %2436 }
 0xb5f   :  { %v1787_v35 = vmul.f32 %v2437_v17, %v3344_v34  ;;  %v2439_v3 = vpop.eup %2438 }
 0xb60   :  { %v1788_v24 = vmul.f32 %v2439_v3, %v3380_v51 }
 0xb90   :  { %v2008_v38 = vpop.xlane.xlu0 %2007 }
 0xb91   :  { %v2010_v23 = vmul.f32 0.0078125, %v2008_v38 }
 0xb92   :  { %v2006_v4 = vpop.xlane.xlu1 %2005 }
 0xb93   :  { %v3436_v11 = vsub.f32 %v3386_v29, %v2010_v23  ;;  %v2009_v41 = vmul.f32 0.0078125, %v2006_v4  ;;  %v1060_v29 = vmul.f32 %v2431_v13, %v3339_v33  ;;  %v1218_v33 = vmul.f32 %v1217_v28, %v2557_v42 }
 0xb94   :  { %v1865_v4 = vstv %s2153_s4 }
 0xb95   :  { %v3439_v1 = vsub.f32 %v3389_v0, %v2009_v41  ;;  %v2014_v44 = vmul.f32 %v3436_v11, %v3436_v11  ;;  %v1866_v52 = vmul.f32 %v1865_v4, %v3071_v53 }
 0xb96   :  { %v1490_v6 = vpop.permute.xlu1 %1489 }
 0xb97   :  { %2017 = vadd.xlane.f32.xlu0 %v2014_v44  ;;  %v2013_v9 = vmul.f32 %v3439_v1, %v3439_v1  ;;  %v1501_v2 = vmul.f32 %v1490_v6, %v1465_v36 }
 0xb98   :  { %v1099_v58 = vpop.permute.xlu0 %1098 }
 0xb99   :  { %2015 = vadd.xlane.f32.xlu1 %v2013_v9  ;;  %v1108_v49 = vmul.f32 %v1099_v58, %v1060_v29 }
 0xb9a   :  { %v1495_v56 = vpop.permute.xlu1 %1494 }
 0xb9b   :  { %v1502_v55 = vmul.f32 %v1495_v56, %v1466_v19 }
 0xb9c   :  { %v1147_v0 = vpop.permute.xlu0 %1146 }
 0xb9d   :  { %v1156_v62 = vadd.f32 %v1147_v0, %v1108_v49 }
 0xb9e   :  { %v1802_v21 = vpop.permute.xlu1 %1801 }
 0xb9f   :  { %v1164_v16 = vmax.f32 %v1156_v62, 0.0  ;;  %v1811_v42 = vmul.f32 %v1802_v21, %v1787_v35 }
 0xba0   :  { %v1526_v59 = vpop.permute.xlu0 %1525 }
 0xba1   :  { %v1216_v27 = vadd.f32 %v1215_v31, %v1164_v16  ;;  %v1537_v7 = vadd.f32 %v1526_v59, %v1501_v2 }
 0xba2   :  { %v1807_v20 = vpop.permute.xlu1 %1806 }
 0xba3   :  { %v1219_v12 = vadd.f32 %v1218_v33, %v1216_v27  ;;  %v1543_v50 = vmax.f32 %v1537_v7, 0.0  ;;  %v1812_v57 = vmul.f32 %v1807_v20, %v1788_v24 }
 0xba4   :  { %v1531_v63 = vpop.permute.xlu0 %1530 }
 0xba5   :  { %v1220_v61 = vadd.f32 %v1219_v12, %v770_v22  ;;  %v1581_v39 = vadd.f32 %v2969_v43, %v1543_v50  ;;  %v1538_v32 = vadd.f32 %v1531_v63, %v1502_v55  ;;  %v2003_v43 = vld [vmem:[%s3479_s9 + $0xd0] sm:$0xff]  ;;  %s2158_s9 = sld [smem:[#allocation2 + $0x52]] }
 0xba6   :  { %v2030_v13 = vpop.permute.xlu1 %2029 }
 0xba7   :  { %v1544_v31 = vmax.f32 %v1538_v32, 0.0 }
 0xba8   :  { %v1826_v40 = vpop.permute.xlu0 %1825 }
 0xba9   :  { %v1582_v30 = vadd.f32 %v1581_v39, %v1544_v31  ;;  %v1835_v34 = vadd.f32 %v1826_v40, %v1811_v42 }
 0xbaa   :  { %2046 = vperm.xlu1 %2383, %v2004_v45   ;;  %v2035_v6 = vpop.permute.xlu1 %2034 }
 0xbab   :  { %v1585_v18 = vadd.f32 %v1584_v37, %v1582_v30  ;;  %v1839_v54 = vmax.f32 %v1835_v34, 0.0  ;;  %v2063_v59 = vstv %s2158_s9 }
 0xbac   :  { %v1831_v38 = vpop.permute.xlu0 %1830  ;;  %v2064_v7 = vmul.f32 %v2063_v59, %v3264_v60 }
 0xbad   :  { %v1586_v15 = vadd.f32 %v1585_v18, %v1220_v61  ;;  %v1863_v48 = vadd.f32 %v3141_v46, %v1839_v54  ;;  %v1836_v23 = vadd.f32 %v1831_v38, %v1812_v57  ;;  %2041 = vperm.xlu0 %2382, %v2003_v43  }
 0xbaf   :  { %v1840_v51 = vmax.f32 %v1836_v23, 0.0 }
 0xbb1   :  { %v1864_v41 = vadd.f32 %v1863_v48, %v1840_v51 }
 0xbb3   :  { %v1867_v10 = vadd.f32 %v1866_v52, %v1864_v41 }
 0xbb5   :  { %v1868_v44 = vadd.f32 %v1867_v10, %v1586_v15 }
 0xc20   :  { %v2018_v9 = vpop.xlane.xlu0 %2017 }
 0xc21   :  { %v2020_v58 = vmul.f32 0.0078125, %v2018_v9 }
 0xc22   :  { %v2016_v29 = vpop.xlane.xlu1 %2015 }
 0xc23   :  { %v2022_v25 = vadd.f32 1e-05, %v2020_v58  ;;  %v2019_v49 = vmul.f32 0.0078125, %v2016_v29 }
 0xc25   :  { %2440 = vrsqrt.f32 %v2022_v25  ;;  %v2021_v56 = vadd.f32 1e-05, %v2019_v49 }
 0xc26   :  { %v2047_v8 = vpop.permute.xlu1 %2046 }
 0xc27   :  { %2442 = vrsqrt.f32 %v2021_v56 }
 0xc28   :  { %v2042_v28 = vpop.permute.xlu0 %2041 }
 0xc32   :  { %v2441_v46 = vpop.eup %2440 }
 0xc33   :  { %v2026_v0 = vmul.f32 %v2441_v46, %v3436_v11 }
 0xc34   :  { %v2443_v47 = vpop.eup %2442 }
 0xc35   :  { %v2038_v36 = vmul.f32 %v2035_v6, %v2026_v0  ;;  %v2025_v53 = vmul.f32 %v2443_v47, %v3439_v1 }
 0xc37   :  { %v2037_v62 = vmul.f32 %v2030_v13, %v2025_v53  ;;  %v2050_v2 = vadd.f32 %v2047_v8, %v2038_v36 }
 0xc39   :  { %v2049_v16 = vadd.f32 %v2042_v28, %v2037_v62  ;;  %v2052_v19 = vmax.f32 %v2050_v2, 0.0 }
 0xc3b   :  { %v2051_v5 = vmax.f32 %v2049_v16, 0.0 }
 0xc3d   :  { %v2061_v33 = vadd.f32 %v3326_v14, %v2051_v5 }
 0xc3f   :  { %v2062_v27 = vadd.f32 %v2061_v33, %v2052_v19 }
 0xc41   :  { %v2065_v17 = vadd.f32 %v2064_v7, %v2062_v27 }
 0xc43   :  { %v2066_v11 = vadd.f32 %v2065_v17, %v1868_v44 }
 0xc45   :  { %2067 = vst [vmem:[%s3480_s10] sm:$0xff] %v2066_v11 }
 0xc46   :  { %2072 = vsyncpa [#allocation3], 1 }

</bundles_post_ra>
